<compile_context>
chip_gen: v5e
topology: v5e:2x2
jax: 0.10.0
libtpu: 0.0.40
codegen_flags: <defaults>
</compile_context>

<pallas_src>
import functools
import numpy as np
import jax
import jax.numpy as jnp
from jax import lax
from jax.experimental import pallas as pl
from jax.experimental.pallas import tpu as pltpu

DIMS = 16
N_HEADS = 4   # TODO(synk): MultiHeadedSelfAttention head count is not shown in the reference source; 4 heads (head_dim = dims // 4) assumed.
BN_EPS = 1e-5
LN_EPS = 1e-12
K_TAPS = 5    # all convs have temporal kernel 5, padding 2 ('same' in time)


# ----------------------------- in-kernel helpers -----------------------------
def _layer_norm(x, g, b):
    u = jnp.mean(x, axis=-1, keepdims=True)
    xc = x - u
    s = jnp.mean(xc * xc, axis=-1, keepdims=True)
    return g * (xc * lax.rsqrt(s + LN_EPS)) + b


def _erf(z):
    # Abramowitz & Stegun 7.1.26 polynomial, |error| < 1.5e-7 (matches the
    # module's erf-based GELU to well below test tolerance).
    a1 = np.float32(0.254829592); a2 = np.float32(-0.284496736)
    a3 = np.float32(1.421413741); a4 = np.float32(-1.453152027)
    a5 = np.float32(1.061405429); p = np.float32(0.3275911)
    sgn = jnp.where(z >= 0.0, np.float32(1.0), np.float32(-1.0))
    za = jnp.abs(z)
    t = np.float32(1.0) / (np.float32(1.0) + p * za)
    poly = ((((a5 * t + a4) * t + a3) * t + a2) * t + a1) * t
    return sgn * (np.float32(1.0) - poly * jnp.exp(-za * za))


def _gelu(x):
    # gelu(x) = 0.5 * x * (1 + erf(x / sqrt(2)))  (Hugging Face / LIMU-BERT form)
    return np.float32(0.5) * x * (np.float32(1.0) + _erf(x * np.float32(1.0 / np.sqrt(2.0))))


# ------------------------------ fused kernel --------------------------------
def _encoder_kernel(xf_ref, scat_ref, shift_ref, gath_ref, abias_ref, hmask_ref,
                    w1_ref, b1_ref, w2_ref, b2_ref, w3_ref, b3_ref,
                    w4_ref, b4_ref, w5_ref, b5_ref,
                    wqkvp_ref, bqkvp_ref, wf1_ref, bf1_ref, wf2_ref, bf2_ref,
                    ln_ref, o_ref, *, n, t, dims, n_heads, taps):
    f32 = jnp.float32
    nt = n * t

    def conv(a, get_w, b, residual=None):
        """Temporal conv as shift-matrix matmul + weight matmul per tap.

        a: (P, Cin) batch-flattened, time-padded activation (P = N*(T+4)).
        shift_ref[k] implements the zero 'same' padding: contributions from pad
        rows are structurally zero, so no masking / zeros residual is needed.
        Width taps and the width-column structure are folded into the packed
        (block-diagonal) weights, so Cout lanes stay dense (96/32/16).
        """
        acc = jnp.zeros((a.shape[0], b.shape[-1]), f32)
        for k in range(taps):
            ak = jnp.dot(shift_ref[k], a, preferred_element_type=f32)
            acc = acc + jnp.dot(ak, get_w(k), preferred_element_type=f32)
        acc = acc + b
        if residual is not None:
            acc = acc + residual
        return jnp.maximum(acc, 0.0)          # ReLU; dropout == identity (eval)

    # Place the (N*T, 6) raw rows into the zero-padded (N*(T+4), 6) time layout.
    a0 = jnp.dot(scat_ref[...], xf_ref[...], preferred_element_type=f32)

    h = conv(a0, lambda k: w1_ref[k], b1_ref[...])                 # conv1_acc|gyro + relu
    hb = conv(h, lambda k: w2_ref[0, k], b2_ref[0])                # conv2_*_1 + relu
    h = conv(hb, lambda k: w2_ref[1, k], b2_ref[1], residual=h)    # conv2_*_2 + res + relu
    # BN_acc / BN_gyro (affine=False) are folded into w3 at parameter-prep time.
    h = conv(h, lambda k: w3_ref[k], b3_ref[...])                  # conv3 (5,3)/(1,3) + relu
    hb = conv(h, lambda k: w4_ref[0, k], b4_ref[0])                # conv4_1 + relu
    h = conv(hb, lambda k: w4_ref[1, k], b4_ref[1], residual=h)    # conv4_2 + res + relu
    h = conv(h, lambda k: w5_ref[k], b5_ref[...])                  # conv5_1 (5,2) + relu

    # Drop the time padding rows -> (N*T, dims); equals view(N,dims,T).permute(0,2,1).
    hd = jnp.dot(gath_ref[...], h, preferred_element_type=f32)

    # ---------------- MultiHeadedSelfAttention (lane-masked heads) ----------------
    q = jnp.dot(hd, wqkvp_ref[0], preferred_element_type=f32) + bqkvp_ref[0]
    kk = jnp.dot(hd, wqkvp_ref[1], preferred_element_type=f32) + bqkvp_ref[1]
    v = jnp.dot(hd, wqkvp_ref[2], preferred_element_type=f32) + bqkvp_ref[2]
    q = q * f32(1.0 / np.sqrt(dims // n_heads))      # 1/sqrt(dh) folded into q once
    bias = abias_ref[...]                            # 0 same-sample / -1e9 cross-sample
    att = jnp.zeros((nt, dims), f32)
    dn = (((1,), (1,)), ((), ()))                    # q @ k^T (contract last dims)
    for hh in range(n_heads):
        m = hmask_ref[hh]                            # (1, dims) 0/1 head-lane mask
        sc = lax.dot_general(q * m, kk, dn, preferred_element_type=f32) + bias
        sc = sc - jnp.max(sc, axis=-1, keepdims=True)
        pr = jnp.exp(sc)
        pr = pr / jnp.sum(pr, axis=-1, keepdims=True)
        att = att + jnp.dot(pr, v * m, preferred_element_type=f32)   # merged heads

    # h = norm1(h + proj(h)), with h = attention output (exactly as written in the module)
    pj = jnp.dot(att, wqkvp_ref[3], preferred_element_type=f32) + bqkvp_ref[3]
    y = _layer_norm(att + pj, ln_ref[0], ln_ref[1])
    # h = norm2(h + pwff(h))
    f = jnp.dot(y, wf1_ref[...], preferred_element_type=f32) + bf1_ref[...]
    f = _gelu(f)
    f = jnp.dot(f, wf2_ref[...], preferred_element_type=f32) + bf2_ref[...]
    y = _layer_norm(y + f, ln_ref[2], ln_ref[3])

    o_ref[...] = y                                   # single lane-dense (N*T, dims) store


# ------------------------- structural constants (host) -----------------------
@functools.lru_cache(maxsize=None)
def _build_structure_constants(n, t, dims, n_heads, taps=K_TAPS):
    pad = (taps - 1) // 2
    tp = t + 2 * pad
    p_rows, nt = n * tp, n * t

    scatter = np.zeros((p_rows, nt), np.float32)     # place data rows into padded layout
    for s in range(n):
        for tt in range(t):
            scatter[s * tp + pad + tt, s * t + tt] = 1.0
    gather = np.ascontiguousarray(scatter.T)         # drop padding rows at the end

    data_row = np.zeros((p_rows,), bool)
    for s in range(n):
        data_row[s * tp + pad: s * tp + pad + t] = True
    shift = np.zeros((taps, p_rows, p_rows), np.float32)
    for k in range(taps):
        for row in range(p_rows):
            r = row - pad + k
            if 0 <= r < p_rows and data_row[r]:      # zero 'same' padding baked in
                shift[k, row, r] = 1.0

    sample = np.arange(nt) // t                      # additive block-diagonal batch mask
    attn_bias = np.where(sample[:, None] == sample[None, :], 0.0, -1e9).astype(np.float32)

    dh = dims // n_heads
    head_mask = np.zeros((n_heads, 1, dims), np.float32)
    for h in range(n_heads):
        head_mask[h, 0, h * dh:(h + 1) * dh] = 1.0

    return (jnp.asarray(scatter), jnp.asarray(shift), jnp.asarray(gather),
            jnp.asarray(attn_bias), jnp.asarray(head_mask))


# ------------------------------ full forward ---------------------------------
def contrastsense_encoder_forward(x, packed, n_heads=N_HEADS):
    """x: (N, 1, T, 6) float32 (NCHW like PyTorch) -> (N, T, dims)."""
    N, C, T, W = x.shape
    assert C == 1 and W == 6, "expected (N, 1, T, 6): 3 accel + 3 gyro columns"
    dims = int(packed["w5"].shape[-1])
    scatter, shift, gather, attn_bias, head_mask = _build_structure_constants(
        N, T, dims, n_heads)
    xf = x.reshape(N * T, W)                         # contiguous, effectively free

    args = (xf, scatter, shift, gather, attn_bias, head_mask,
            packed["w1"], packed["b1"], packed["w2"], packed["b2"],
            packed["w3"], packed["b3"], packed["w4"], packed["b4"],
            packed["w5"], packed["b5"], packed["wqkvp"], packed["bqkvp"],
            packed["wf1"], packed["bf1"], packed["wf2"], packed["bf2"],
            packed["ln"])
    vmem = pl.BlockSpec(memory_space=pltpu.MemorySpace.VMEM)     # whole array, VMEM-resident
    kernel = functools.partial(_encoder_kernel, n=N, t=T, dims=dims,
                               n_heads=n_heads, taps=K_TAPS)
    y = pl.pallas_call(
        kernel,
        out_shape=jax.ShapeDtypeStruct((N * T, dims), jnp.float32),
        in_specs=[vmem] * len(args),
        out_specs=vmem,
    )(*args)
    return y.reshape(N, T, dims)


# ------------------------- parameters (PyTorch layout) ------------------------
def init_torch_params(key, dims=DIMS):
    """Random parameters in PyTorch layouts: Conv2d (out,in,kh,kw), Linear (out,in)."""
    shapes = {
        "conv1_acc.weight": (dims, 1, 5, 1), "conv1_gyro.weight": (dims, 1, 5, 1),
        "conv2_acc_1.weight": (dims, dims, 5, 1), "conv2_acc_2.weight": (dims, dims, 5, 1),
        "conv2_gyro_1.weight": (dims, dims, 5, 1), "conv2_gyro_2.weight": (dims, dims, 5, 1),
        "conv3.weight": (dims, dims, 5, 3),
        "conv4_1.weight": (dims, dims, 5, 1), "conv4_2.weight": (dims, dims, 5, 1),
        "conv5_1.weight": (dims, dims, 5, 2),
        "attn.proj_q.weight": (dims, dims), "attn.proj_k.weight": (dims, dims),
        "attn.proj_v.weight": (dims, dims), "proj.weight": (dims, dims),
        "pwff.fc1.weight": (2 * dims, dims), "pwff.fc2.weight": (dims, 2 * dims),
    }
    p = {}
    keys = jax.random.split(key, 2 * len(shapes))
    for i, (name, shape) in enumerate(shapes.items()):
        fan_in = int(np.prod(shape[1:]))
        p[name] = jax.random.normal(keys[2 * i], shape, jnp.float32) / np.sqrt(fan_in)
        p[name.replace(".weight", ".bias")] = (
            jax.random.normal(keys[2 * i + 1], (shape[0],), jnp.float32) * 0.05)
    p["norm1.gamma"] = jnp.ones((dims,), jnp.float32)
    p["norm1.beta"] = jnp.zeros((dims,), jnp.float32)
    p["norm2.gamma"] = jnp.ones((dims,), jnp.float32)
    p["norm2.beta"] = jnp.zeros((dims,), jnp.float32)
    return p


def pack_params(tp, dims=DIMS):
    """One-time host-side packing: fold width columns into block-diagonal lane-dense
    conv weights, fold BN into conv3, transpose Linear weights to (in, out)."""
    D, K = dims, K_TAPS

    def w(name): return np.asarray(tp[name + ".weight"], np.float32)
    def b(name): return np.asarray(tp[name + ".bias"], np.float32)

    # conv1_acc / conv1_gyro: 6 width columns, Cin=1 each -> (K, 6, 6D)
    w1 = np.zeros((K, 6, 6 * D), np.float32)
    b1 = np.zeros((1, 6 * D), np.float32)
    for c in range(6):
        mod = "conv1_acc" if c < 3 else "conv1_gyro"
        w1[:, c, c * D:(c + 1) * D] = w(mod)[:, 0, :, 0].T
        b1[0, c * D:(c + 1) * D] = b(mod)

    # conv2_{acc,gyro}_{1,2}: block-diagonal (K, 6D, 6D), stacked over the 2 stages
    w2 = np.zeros((2, K, 6 * D, 6 * D), np.float32)
    b2 = np.zeros((2, 1, 6 * D), np.float32)
    for i, (ma, mg) in enumerate([("conv2_acc_1", "conv2_gyro_1"),
                                  ("conv2_acc_2", "conv2_gyro_2")]):
        for c in range(6):
            mod = ma if c < 3 else mg
            wm = w(mod)[:, :, :, 0]                       # (out, in, K)
            for k in range(K):
                w2[i, k, c * D:(c + 1) * D, c * D:(c + 1) * D] = wm[:, :, k].T
            b2[i, 0, c * D:(c + 1) * D] = b(mod)

    # TODO(synk): BN folding assumes eval mode with fresh running stats (mean=0, var=1); load real trained running stats here if available.
    bn_scale = np.float32(1.0 / np.sqrt(1.0 + BN_EPS))
    # conv3: kernel (5,3), stride (1,3): out col 0 <- acc widths 0..2, out col 1 <- gyro 3..5
    w3 = np.zeros((K, 6 * D, 2 * D), np.float32)
    b3 = np.zeros((1, 2 * D), np.float32)
    w3m = w("conv3")                                      # (out, in, K, 3)
    for g in range(2):
        for j in range(3):
            for k in range(K):
                w3[k, (3 * g + j) * D:(3 * g + j + 1) * D, g * D:(g + 1) * D] = (
                    w3m[:, :, k, j].T * bn_scale)
        b3[0, g * D:(g + 1) * D] = b("conv3")

    # conv4_{1,2}: width-2, block diagonal with shared (5,1) weights
    w4 = np.zeros((2, K, 2 * D, 2 * D), np.float32)
    b4 = np.zeros((2, 1, 2 * D), np.float32)
    for i, mod in enumerate(["conv4_1", "conv4_2"]):
        wm = w(mod)[:, :, :, 0]
        for c in range(2):
            for k in range(K):
                w4[i, k, c * D:(c + 1) * D, c * D:(c + 1) * D] = wm[:, :, k].T
            b4[i, 0, c * D:(c + 1) * D] = b(mod)

    # conv5_1: kernel (5,2) over width 2 -> width 1
    w5 = np.zeros((K, 2 * D, D), np.float32)
    w5m = w("conv5_1")                                    # (out, in, K, 2)
    for j in range(2):
        for k in range(K):
            w5[k, j * D:(j + 1) * D, :] = w5m[:, :, k, j].T
    b5 = b("conv5_1").reshape(1, D)

    # transformer: Linear weights transposed to (in, out); small params stacked
    wqkvp = np.stack([w("attn.proj_q").T, w("attn.proj_k").T,
                      w("attn.proj_v").T, w("proj").T], axis=0)
    bqkvp = np.stack([b("attn.proj_q"), b("attn.proj_k"),
                      b("attn.proj_v"), b("proj")], axis=0).reshape(4, 1, D)
    wf1 = w("pwff.fc1").T
    bf1 = b("pwff.fc1").reshape(1, 2 * D)
    wf2 = w("pwff.fc2").T
    bf2 = b("pwff.fc2").reshape(1, D)
    ln = np.stack([np.asarray(tp["norm1.gamma"]), np.asarray(tp["norm1.beta"]),
                   np.asarray(tp["norm2.gamma"]), np.asarray(tp["norm2.beta"])],
                  axis=0).astype(np.float32).reshape(4, 1, D)

    packed = dict(w1=w1, b1=b1, w2=w2, b2=b2, w3=w3, b3=b3, w4=w4, b4=b4,
                  w5=w5, b5=b5, wqkvp=wqkvp, bqkvp=bqkvp, wf1=wf1, bf1=bf1,
                  wf2=wf2, bf2=bf2, ln=ln)
    return {k: jnp.asarray(v) for k, v in packed.items()}


if __name__ == "__main__":
    key = jax.random.PRNGKey(0)
    k_x, k_p = jax.random.split(key)
    N, T = 2, 16
    x = jax.random.normal(k_x, (N, 1, T, 6), jnp.float32)    # NCHW like PyTorch
    torch_params = init_torch_params(k_p, DIMS)
    packed = pack_params(torch_params, DIMS)
    fwd = jax.jit(contrastsense_encoder_forward)
    out = jax.block_until_ready(fwd(x, packed))
    assert out.shape == (N, T, DIMS), out.shape
    assert bool(jnp.all(jnp.isfinite(out)))
    print("KERNEL_OK")
</pallas_src>

<mosaic_0001>
module attributes {stable_mosaic.version = 11 : i64} {
  func.func @_encoder_kernel(%arg0: memref<32x6xf32, #tpu.memory_space<vmem>>, %arg1: memref<40x32xf32, #tpu.memory_space<vmem>>, %arg2: memref<5x40x40xf32, #tpu.memory_space<vmem>>, %arg3: memref<32x40xf32, #tpu.memory_space<vmem>>, %arg4: memref<32x32xf32, #tpu.memory_space<vmem>>, %arg5: memref<4x1x16xf32, #tpu.memory_space<vmem>>, %arg6: memref<5x6x96xf32, #tpu.memory_space<vmem>>, %arg7: memref<1x96xf32, #tpu.memory_space<vmem>>, %arg8: memref<2x5x96x96xf32, #tpu.memory_space<vmem>>, %arg9: memref<2x1x96xf32, #tpu.memory_space<vmem>>, %arg10: memref<5x96x32xf32, #tpu.memory_space<vmem>>, %arg11: memref<1x32xf32, #tpu.memory_space<vmem>>, %arg12: memref<2x5x32x32xf32, #tpu.memory_space<vmem>>, %arg13: memref<2x1x32xf32, #tpu.memory_space<vmem>>, %arg14: memref<5x32x16xf32, #tpu.memory_space<vmem>>, %arg15: memref<1x16xf32, #tpu.memory_space<vmem>>, %arg16: memref<4x16x16xf32, #tpu.memory_space<vmem>>, %arg17: memref<4x1x16xf32, #tpu.memory_space<vmem>>, %arg18: memref<16x32xf32, #tpu.memory_space<vmem>>, %arg19: memref<1x32xf32, #tpu.memory_space<vmem>>, %arg20: memref<32x16xf32, #tpu.memory_space<vmem>>, %arg21: memref<1x16xf32, #tpu.memory_space<vmem>>, %arg22: memref<4x1x16xf32, #tpu.memory_space<vmem>>, %arg23: memref<32x16xf32, #tpu.memory_space<vmem>>) attributes {dimension_semantics = [], scalar_prefetch = 0 : i64, scratch_operands = 0 : i64, tpu.core_type = #tpu.core_type<tc>} {
    %c0 = arith.constant 0 : index
    %c0_0 = arith.constant 0 : index
    %0 = vector.load %arg1[%c0, %c0_0] : memref<40x32xf32, #tpu.memory_space<vmem>>, vector<40x32xf32>
    %c0_1 = arith.constant 0 : index
    %c0_2 = arith.constant 0 : index
    %1 = vector.load %arg0[%c0_1, %c0_2] : memref<32x6xf32, #tpu.memory_space<vmem>>, vector<32x6xf32>
    %cst = arith.constant dense<0.000000e+00> : vector<40x6xf32>
    %2 = tpu.matmul %0, %1, %cst {dimension_numbers = #tpu.dot_dimension_numbers<[1], [0], [0], [1], [0, 0, 1, 1], [], []>} : vector<40x32xf32>, vector<32x6xf32>, vector<40x6xf32> -> vector<40x6xf32>
    %c0_3 = arith.constant 0 : index
    %c0_4 = arith.constant 0 : index
    %3 = vector.load %arg7[%c0_3, %c0_4] : memref<1x96xf32, #tpu.memory_space<vmem>>, vector<1x96xf32>
    %cst_5 = arith.constant 0.000000e+00 : f32
    %4 = vector.broadcast %cst_5 : f32 to vector<40x96xf32>
    %c0_6 = arith.constant 0 : index
    %c0_7 = arith.constant 0 : index
    %c0_8 = arith.constant 0 : index
    %5 = vector.load %arg2[%c0_6, %c0_7, %c0_8] : memref<5x40x40xf32, #tpu.memory_space<vmem>>, vector<1x40x40xf32>
    %6 = vector.shape_cast %5 : vector<1x40x40xf32> to vector<40x40xf32>
    %cst_9 = arith.constant dense<0.000000e+00> : vector<40x6xf32>
    %7 = tpu.matmul %6, %2, %cst_9 {dimension_numbers = #tpu.dot_dimension_numbers<[1], [0], [0], [1], [0, 0, 1, 1], [], []>} : vector<40x40xf32>, vector<40x6xf32>, vector<40x6xf32> -> vector<40x6xf32>
    %c0_10 = arith.constant 0 : index
    %c0_11 = arith.constant 0 : index
    %c0_12 = arith.constant 0 : index
    %8 = vector.load %arg6[%c0_10, %c0_11, %c0_12] : memref<5x6x96xf32, #tpu.memory_space<vmem>>, vector<1x6x96xf32>
    %9 = vector.shape_cast %8 : vector<1x6x96xf32> to vector<6x96xf32>
    %cst_13 = arith.constant dense<0.000000e+00> : vector<40x96xf32>
    %10 = tpu.matmul %7, %9, %cst_13 {dimension_numbers = #tpu.dot_dimension_numbers<[1], [0], [0], [1], [0, 0, 1, 1], [], []>} : vector<40x6xf32>, vector<6x96xf32>, vector<40x96xf32> -> vector<40x96xf32>
    %11 = arith.addf %4, %10 : vector<40x96xf32>
    %c1 = arith.constant 1 : index
    %c0_14 = arith.constant 0 : index
    %c0_15 = arith.constant 0 : index
    %12 = vector.load %arg2[%c1, %c0_14, %c0_15] : memref<5x40x40xf32, #tpu.memory_space<vmem>>, vector<1x40x40xf32>
    %13 = vector.shape_cast %12 : vector<1x40x40xf32> to vector<40x40xf32>
    %cst_16 = arith.constant dense<0.000000e+00> : vector<40x6xf32>
    %14 = tpu.matmul %13, %2, %cst_16 {dimension_numbers = #tpu.dot_dimension_numbers<[1], [0], [0], [1], [0, 0, 1, 1], [], []>} : vector<40x40xf32>, vector<40x6xf32>, vector<40x6xf32> -> vector<40x6xf32>
    %c1_17 = arith.constant 1 : index
    %c0_18 = arith.constant 0 : index
    %c0_19 = arith.constant 0 : index
    %15 = vector.load %arg6[%c1_17, %c0_18, %c0_19] : memref<5x6x96xf32, #tpu.memory_space<vmem>>, vector<1x6x96xf32>
    %16 = vector.shape_cast %15 : vector<1x6x96xf32> to vector<6x96xf32>
    %cst_20 = arith.constant dense<0.000000e+00> : vector<40x96xf32>
    %17 = tpu.matmul %14, %16, %cst_20 {dimension_numbers = #tpu.dot_dimension_numbers<[1], [0], [0], [1], [0, 0, 1, 1], [], []>} : vector<40x6xf32>, vector<6x96xf32>, vector<40x96xf32> -> vector<40x96xf32>
    %18 = arith.addf %11, %17 : vector<40x96xf32>
    %c2 = arith.constant 2 : index
    %c0_21 = arith.constant 0 : index
    %c0_22 = arith.constant 0 : index
    %19 = vector.load %arg2[%c2, %c0_21, %c0_22] : memref<5x40x40xf32, #tpu.memory_space<vmem>>, vector<1x40x40xf32>
    %20 = vector.shape_cast %19 : vector<1x40x40xf32> to vector<40x40xf32>
    %cst_23 = arith.constant dense<0.000000e+00> : vector<40x6xf32>
    %21 = tpu.matmul %20, %2, %cst_23 {dimension_numbers = #tpu.dot_dimension_numbers<[1], [0], [0], [1], [0, 0, 1, 1], [], []>} : vector<40x40xf32>, vector<40x6xf32>, vector<40x6xf32> -> vector<40x6xf32>
    %c2_24 = arith.constant 2 : index
    %c0_25 = arith.constant 0 : index
    %c0_26 = arith.constant 0 : index
    %22 = vector.load %arg6[%c2_24, %c0_25, %c0_26] : memref<5x6x96xf32, #tpu.memory_space<vmem>>, vector<1x6x96xf32>
    %23 = vector.shape_cast %22 : vector<1x6x96xf32> to vector<6x96xf32>
    %cst_27 = arith.constant dense<0.000000e+00> : vector<40x96xf32>
    %24 = tpu.matmul %21, %23, %cst_27 {dimension_numbers = #tpu.dot_dimension_numbers<[1], [0], [0], [1], [0, 0, 1, 1], [], []>} : vector<40x6xf32>, vector<6x96xf32>, vector<40x96xf32> -> vector<40x96xf32>
    %25 = arith.addf %18, %24 : vector<40x96xf32>
    %c3 = arith.constant 3 : index
    %c0_28 = arith.constant 0 : index
    %c0_29 = arith.constant 0 : index
    %26 = vector.load %arg2[%c3, %c0_28, %c0_29] : memref<5x40x40xf32, #tpu.memory_space<vmem>>, vector<1x40x40xf32>
    %27 = vector.shape_cast %26 : vector<1x40x40xf32> to vector<40x40xf32>
    %cst_30 = arith.constant dense<0.000000e+00> : vector<40x6xf32>
    %28 = tpu.matmul %27, %2, %cst_30 {dimension_numbers = #tpu.dot_dimension_numbers<[1], [0], [0], [1], [0, 0, 1, 1], [], []>} : vector<40x40xf32>, vector<40x6xf32>, vector<40x6xf32> -> vector<40x6xf32>
    %c3_31 = arith.constant 3 : index
    %c0_32 = arith.constant 0 : index
    %c0_33 = arith.constant 0 : index
    %29 = vector.load %arg6[%c3_31, %c0_32, %c0_33] : memref<5x6x96xf32, #tpu.memory_space<vmem>>, vector<1x6x96xf32>
    %30 = vector.shape_cast %29 : vector<1x6x96xf32> to vector<6x96xf32>
    %cst_34 = arith.constant dense<0.000000e+00> : vector<40x96xf32>
    %31 = tpu.matmul %28, %30, %cst_34 {dimension_numbers = #tpu.dot_dimension_numbers<[1], [0], [0], [1], [0, 0, 1, 1], [], []>} : vector<40x6xf32>, vector<6x96xf32>, vector<40x96xf32> -> vector<40x96xf32>
    %32 = arith.addf %25, %31 : vector<40x96xf32>
    %c4 = arith.constant 4 : index
    %c0_35 = arith.constant 0 : index
    %c0_36 = arith.constant 0 : index
    %33 = vector.load %arg2[%c4, %c0_35, %c0_36] : memref<5x40x40xf32, #tpu.memory_space<vmem>>, vector<1x40x40xf32>
    %34 = vector.shape_cast %33 : vector<1x40x40xf32> to vector<40x40xf32>
    %cst_37 = arith.constant dense<0.000000e+00> : vector<40x6xf32>
    %35 = tpu.matmul %34, %2, %cst_37 {dimension_numbers = #tpu.dot_dimension_numbers<[1], [0], [0], [1], [0, 0, 1, 1], [], []>} : vector<40x40xf32>, vector<40x6xf32>, vector<40x6xf32> -> vector<40x6xf32>
    %c4_38 = arith.constant 4 : index
    %c0_39 = arith.constant 0 : index
    %c0_40 = arith.constant 0 : index
    %36 = vector.load %arg6[%c4_38, %c0_39, %c0_40] : memref<5x6x96xf32, #tpu.memory_space<vmem>>, vector<1x6x96xf32>
    %37 = vector.shape_cast %36 : vector<1x6x96xf32> to vector<6x96xf32>
    %cst_41 = arith.constant dense<0.000000e+00> : vector<40x96xf32>
    %38 = tpu.matmul %35, %37, %cst_41 {dimension_numbers = #tpu.dot_dimension_numbers<[1], [0], [0], [1], [0, 0, 1, 1], [], []>} : vector<40x6xf32>, vector<6x96xf32>, vector<40x96xf32> -> vector<40x96xf32>
    %39 = arith.addf %32, %38 : vector<40x96xf32>
    %40 = vector.broadcast %3 : vector<1x96xf32> to vector<40x96xf32>
    %41 = arith.addf %39, %40 : vector<40x96xf32>
    %cst_42 = arith.constant 0.000000e+00 : f32
    %42 = vector.broadcast %cst_42 : f32 to vector<40x96xf32>
    %43 = arith.maximumf %41, %42 : vector<40x96xf32>
    %c0_43 = arith.constant 0 : index
    %c0_44 = arith.constant 0 : index
    %c0_45 = arith.constant 0 : index
    %44 = vector.load %arg9[%c0_43, %c0_44, %c0_45] : memref<2x1x96xf32, #tpu.memory_space<vmem>>, vector<1x1x96xf32>
    %45 = vector.shape_cast %44 : vector<1x1x96xf32> to vector<1x96xf32>
    %cst_46 = arith.constant 0.000000e+00 : f32
    %46 = vector.broadcast %cst_46 : f32 to vector<40x96xf32>
    %c0_47 = arith.constant 0 : index
    %c0_48 = arith.constant 0 : index
    %c0_49 = arith.constant 0 : index
    %47 = vector.load %arg2[%c0_47, %c0_48, %c0_49] : memref<5x40x40xf32, #tpu.memory_space<vmem>>, vector<1x40x40xf32>
    %48 = vector.shape_cast %47 : vector<1x40x40xf32> to vector<40x40xf32>
    %cst_50 = arith.constant dense<0.000000e+00> : vector<40x96xf32>
    %49 = tpu.matmul %48, %43, %cst_50 {dimension_numbers = #tpu.dot_dimension_numbers<[1], [0], [0], [1], [0, 0, 1, 1], [], []>} : vector<40x40xf32>, vector<40x96xf32>, vector<40x96xf32> -> vector<40x96xf32>
    %c0_51 = arith.constant 0 : index
    %c0_52 = arith.constant 0 : index
    %c0_53 = arith.constant 0 : index
    %c0_54 = arith.constant 0 : index
    %50 = vector.load %arg8[%c0_51, %c0_52, %c0_53, %c0_54] : memref<2x5x96x96xf32, #tpu.memory_space<vmem>>, vector<1x1x96x96xf32>
    %51 = vector.shape_cast %50 : vector<1x1x96x96xf32> to vector<96x96xf32>
    %cst_55 = arith.constant dense<0.000000e+00> : vector<40x96xf32>
    %52 = tpu.matmul %49, %51, %cst_55 {dimension_numbers = #tpu.dot_dimension_numbers<[1], [0], [0], [1], [0, 0, 1, 1], [], []>} : vector<40x96xf32>, vector<96x96xf32>, vector<40x96xf32> -> vector<40x96xf32>
    %53 = arith.addf %46, %52 : vector<40x96xf32>
    %c1_56 = arith.constant 1 : index
    %c0_57 = arith.constant 0 : index
    %c0_58 = arith.constant 0 : index
    %54 = vector.load %arg2[%c1_56, %c0_57, %c0_58] : memref<5x40x40xf32, #tpu.memory_space<vmem>>, vector<1x40x40xf32>
    %55 = vector.shape_cast %54 : vector<1x40x40xf32> to vector<40x40xf32>
    %cst_59 = arith.constant dense<0.000000e+00> : vector<40x96xf32>
    %56 = tpu.matmul %55, %43, %cst_59 {dimension_numbers = #tpu.dot_dimension_numbers<[1], [0], [0], [1], [0, 0, 1, 1], [], []>} : vector<40x40xf32>, vector<40x96xf32>, vector<40x96xf32> -> vector<40x96xf32>
    %c0_60 = arith.constant 0 : index
    %c1_61 = arith.constant 1 : index
    %c0_62 = arith.constant 0 : index
    %c0_63 = arith.constant 0 : index
    %57 = vector.load %arg8[%c0_60, %c1_61, %c0_62, %c0_63] : memref<2x5x96x96xf32, #tpu.memory_space<vmem>>, vector<1x1x96x96xf32>
    %58 = vector.shape_cast %57 : vector<1x1x96x96xf32> to vector<96x96xf32>
    %cst_64 = arith.constant dense<0.000000e+00> : vector<40x96xf32>
    %59 = tpu.matmul %56, %58, %cst_64 {dimension_numbers = #tpu.dot_dimension_numbers<[1], [0], [0], [1], [0, 0, 1, 1], [], []>} : vector<40x96xf32>, vector<96x96xf32>, vector<40x96xf32> -> vector<40x96xf32>
    %60 = arith.addf %53, %59 : vector<40x96xf32>
    %c2_65 = arith.constant 2 : index
    %c0_66 = arith.constant 0 : index
    %c0_67 = arith.constant 0 : index
    %61 = vector.load %arg2[%c2_65, %c0_66, %c0_67] : memref<5x40x40xf32, #tpu.memory_space<vmem>>, vector<1x40x40xf32>
    %62 = vector.shape_cast %61 : vector<1x40x40xf32> to vector<40x40xf32>
    %cst_68 = arith.constant dense<0.000000e+00> : vector<40x96xf32>
    %63 = tpu.matmul %62, %43, %cst_68 {dimension_numbers = #tpu.dot_dimension_numbers<[1], [0], [0], [1], [0, 0, 1, 1], [], []>} : vector<40x40xf32>, vector<40x96xf32>, vector<40x96xf32> -> vector<40x96xf32>
    %c0_69 = arith.constant 0 : index
    %c2_70 = arith.constant 2 : index
    %c0_71 = arith.constant 0 : index
    %c0_72 = arith.constant 0 : index
    %64 = vector.load %arg8[%c0_69, %c2_70, %c0_71, %c0_72] : memref<2x5x96x96xf32, #tpu.memory_space<vmem>>, vector<1x1x96x96xf32>
    %65 = vector.shape_cast %64 : vector<1x1x96x96xf32> to vector<96x96xf32>
    %cst_73 = arith.constant dense<0.000000e+00> : vector<40x96xf32>
    %66 = tpu.matmul %63, %65, %cst_73 {dimension_numbers = #tpu.dot_dimension_numbers<[1], [0], [0], [1], [0, 0, 1, 1], [], []>} : vector<40x96xf32>, vector<96x96xf32>, vector<40x96xf32> -> vector<40x96xf32>
    %67 = arith.addf %60, %66 : vector<40x96xf32>
    %c3_74 = arith.constant 3 : index
    %c0_75 = arith.constant 0 : index
    %c0_76 = arith.constant 0 : index
    %68 = vector.load %arg2[%c3_74, %c0_75, %c0_76] : memref<5x40x40xf32, #tpu.memory_space<vmem>>, vector<1x40x40xf32>
    %69 = vector.shape_cast %68 : vector<1x40x40xf32> to vector<40x40xf32>
    %cst_77 = arith.constant dense<0.000000e+00> : vector<40x96xf32>
    %70 = tpu.matmul %69, %43, %cst_77 {dimension_numbers = #tpu.dot_dimension_numbers<[1], [0], [0], [1], [0, 0, 1, 1], [], []>} : vector<40x40xf32>, vector<40x96xf32>, vector<40x96xf32> -> vector<40x96xf32>
    %c0_78 = arith.constant 0 : index
    %c3_79 = arith.constant 3 : index
    %c0_80 = arith.constant 0 : index
    %c0_81 = arith.constant 0 : index
    %71 = vector.load %arg8[%c0_78, %c3_79, %c0_80, %c0_81] : memref<2x5x96x96xf32, #tpu.memory_space<vmem>>, vector<1x1x96x96xf32>
    %72 = vector.shape_cast %71 : vector<1x1x96x96xf32> to vector<96x96xf32>
    %cst_82 = arith.constant dense<0.000000e+00> : vector<40x96xf32>
    %73 = tpu.matmul %70, %72, %cst_82 {dimension_numbers = #tpu.dot_dimension_numbers<[1], [0], [0], [1], [0, 0, 1, 1], [], []>} : vector<40x96xf32>, vector<96x96xf32>, vector<40x96xf32> -> vector<40x96xf32>
    %74 = arith.addf %67, %73 : vector<40x96xf32>
    %c4_83 = arith.constant 4 : index
    %c0_84 = arith.constant 0 : index
    %c0_85 = arith.constant 0 : index
    %75 = vector.load %arg2[%c4_83, %c0_84, %c0_85] : memref<5x40x40xf32, #tpu.memory_space<vmem>>, vector<1x40x40xf32>
    %76 = vector.shape_cast %75 : vector<1x40x40xf32> to vector<40x40xf32>
    %cst_86 = arith.constant dense<0.000000e+00> : vector<40x96xf32>
    %77 = tpu.matmul %76, %43, %cst_86 {dimension_numbers = #tpu.dot_dimension_numbers<[1], [0], [0], [1], [0, 0, 1, 1], [], []>} : vector<40x40xf32>, vector<40x96xf32>, vector<40x96xf32> -> vector<40x96xf32>
    %c0_87 = arith.constant 0 : index
    %c4_88 = arith.constant 4 : index
    %c0_89 = arith.constant 0 : index
    %c0_90 = arith.constant 0 : index
    %78 = vector.load %arg8[%c0_87, %c4_88, %c0_89, %c0_90] : memref<2x5x96x96xf32, #tpu.memory_space<vmem>>, vector<1x1x96x96xf32>
    %79 = vector.shape_cast %78 : vector<1x1x96x96xf32> to vector<96x96xf32>
    %cst_91 = arith.constant dense<0.000000e+00> : vector<40x96xf32>
    %80 = tpu.matmul %77, %79, %cst_91 {dimension_numbers = #tpu.dot_dimension_numbers<[1], [0], [0], [1], [0, 0, 1, 1], [], []>} : vector<40x96xf32>, vector<96x96xf32>, vector<40x96xf32> -> vector<40x96xf32>
    %81 = arith.addf %74, %80 : vector<40x96xf32>
    %82 = vector.broadcast %45 : vector<1x96xf32> to vector<40x96xf32>
    %83 = arith.addf %81, %82 : vector<40x96xf32>
    %cst_92 = arith.constant 0.000000e+00 : f32
    %84 = vector.broadcast %cst_92 : f32 to vector<40x96xf32>
    %85 = arith.maximumf %83, %84 : vector<40x96xf32>
    %c1_93 = arith.constant 1 : index
    %c0_94 = arith.constant 0 : index
    %c0_95 = arith.constant 0 : index
    %86 = vector.load %arg9[%c1_93, %c0_94, %c0_95] : memref<2x1x96xf32, #tpu.memory_space<vmem>>, vector<1x1x96xf32>
    %87 = vector.shape_cast %86 : vector<1x1x96xf32> to vector<1x96xf32>
    %cst_96 = arith.constant 0.000000e+00 : f32
    %88 = vector.broadcast %cst_96 : f32 to vector<40x96xf32>
    %c0_97 = arith.constant 0 : index
    %c0_98 = arith.constant 0 : index
    %c0_99 = arith.constant 0 : index
    %89 = vector.load %arg2[%c0_97, %c0_98, %c0_99] : memref<5x40x40xf32, #tpu.memory_space<vmem>>, vector<1x40x40xf32>
    %90 = vector.shape_cast %89 : vector<1x40x40xf32> to vector<40x40xf32>
    %cst_100 = arith.constant dense<0.000000e+00> : vector<40x96xf32>
    %91 = tpu.matmul %90, %85, %cst_100 {dimension_numbers = #tpu.dot_dimension_numbers<[1], [0], [0], [1], [0, 0, 1, 1], [], []>} : vector<40x40xf32>, vector<40x96xf32>, vector<40x96xf32> -> vector<40x96xf32>
    %c1_101 = arith.constant 1 : index
    %c0_102 = arith.constant 0 : index
    %c0_103 = arith.constant 0 : index
    %c0_104 = arith.constant 0 : index
    %92 = vector.load %arg8[%c1_101, %c0_102, %c0_103, %c0_104] : memref<2x5x96x96xf32, #tpu.memory_space<vmem>>, vector<1x1x96x96xf32>
    %93 = vector.shape_cast %92 : vector<1x1x96x96xf32> to vector<96x96xf32>
    %cst_105 = arith.constant dense<0.000000e+00> : vector<40x96xf32>
    %94 = tpu.matmul %91, %93, %cst_105 {dimension_numbers = #tpu.dot_dimension_numbers<[1], [0], [0], [1], [0, 0, 1, 1], [], []>} : vector<40x96xf32>, vector<96x96xf32>, vector<40x96xf32> -> vector<40x96xf32>
    %95 = arith.addf %88, %94 : vector<40x96xf32>
    %c1_106 = arith.constant 1 : index
    %c0_107 = arith.constant 0 : index
    %c0_108 = arith.constant 0 : index
    %96 = vector.load %arg2[%c1_106, %c0_107, %c0_108] : memref<5x40x40xf32, #tpu.memory_space<vmem>>, vector<1x40x40xf32>
    %97 = vector.shape_cast %96 : vector<1x40x40xf32> to vector<40x40xf32>
    %cst_109 = arith.constant dense<0.000000e+00> : vector<40x96xf32>
    %98 = tpu.matmul %97, %85, %cst_109 {dimension_numbers = #tpu.dot_dimension_numbers<[1], [0], [0], [1], [0, 0, 1, 1], [], []>} : vector<40x40xf32>, vector<40x96xf32>, vector<40x96xf32> -> vector<40x96xf32>
    %c1_110 = arith.constant 1 : index
    %c1_111 = arith.constant 1 : index
    %c0_112 = arith.constant 0 : index
    %c0_113 = arith.constant 0 : index
    %99 = vector.load %arg8[%c1_110, %c1_111, %c0_112, %c0_113] : memref<2x5x96x96xf32, #tpu.memory_space<vmem>>, vector<1x1x96x96xf32>
    %100 = vector.shape_cast %99 : vector<1x1x96x96xf32> to vector<96x96xf32>
    %cst_114 = arith.constant dense<0.000000e+00> : vector<40x96xf32>
    %101 = tpu.matmul %98, %100, %cst_114 {dimension_numbers = #tpu.dot_dimension_numbers<[1], [0], [0], [1], [0, 0, 1, 1], [], []>} : vector<40x96xf32>, vector<96x96xf32>, vector<40x96xf32> -> vector<40x96xf32>
    %102 = arith.addf %95, %101 : vector<40x96xf32>
    %c2_115 = arith.constant 2 : index
    %c0_116 = arith.constant 0 : index
    %c0_117 = arith.constant 0 : index
    %103 = vector.load %arg2[%c2_115, %c0_116, %c0_117] : memref<5x40x40xf32, #tpu.memory_space<vmem>>, vector<1x40x40xf32>
    %104 = vector.shape_cast %103 : vector<1x40x40xf32> to vector<40x40xf32>
    %cst_118 = arith.constant dense<0.000000e+00> : vector<40x96xf32>
    %105 = tpu.matmul %104, %85, %cst_118 {dimension_numbers = #tpu.dot_dimension_numbers<[1], [0], [0], [1], [0, 0, 1, 1], [], []>} : vector<40x40xf32>, vector<40x96xf32>, vector<40x96xf32> -> vector<40x96xf32>
    %c1_119 = arith.constant 1 : index
    %c2_120 = arith.constant 2 : index
    %c0_121 = arith.constant 0 : index
    %c0_122 = arith.constant 0 : index
    %106 = vector.load %arg8[%c1_119, %c2_120, %c0_121, %c0_122] : memref<2x5x96x96xf32, #tpu.memory_space<vmem>>, vector<1x1x96x96xf32>
    %107 = vector.shape_cast %106 : vector<1x1x96x96xf32> to vector<96x96xf32>
    %cst_123 = arith.constant dense<0.000000e+00> : vector<40x96xf32>
    %108 = tpu.matmul %105, %107, %cst_123 {dimension_numbers = #tpu.dot_dimension_numbers<[1], [0], [0], [1], [0, 0, 1, 1], [], []>} : vector<40x96xf32>, vector<96x96xf32>, vector<40x96xf32> -> vector<40x96xf32>
    %109 = arith.addf %102, %108 : vector<40x96xf32>
    %c3_124 = arith.constant 3 : index
    %c0_125 = arith.constant 0 : index
    %c0_126 = arith.constant 0 : index
    %110 = vector.load %arg2[%c3_124, %c0_125, %c0_126] : memref<5x40x40xf32, #tpu.memory_space<vmem>>, vector<1x40x40xf32>
    %111 = vector.shape_cast %110 : vector<1x40x40xf32> to vector<40x40xf32>
    %cst_127 = arith.constant dense<0.000000e+00> : vector<40x96xf32>
    %112 = tpu.matmul %111, %85, %cst_127 {dimension_numbers = #tpu.dot_dimension_numbers<[1], [0], [0], [1], [0, 0, 1, 1], [], []>} : vector<40x40xf32>, vector<40x96xf32>, vector<40x96xf32> -> vector<40x96xf32>
    %c1_128 = arith.constant 1 : index
    %c3_129 = arith.constant 3 : index
    %c0_130 = arith.constant 0 : index
    %c0_131 = arith.constant 0 : index
    %113 = vector.load %arg8[%c1_128, %c3_129, %c0_130, %c0_131] : memref<2x5x96x96xf32, #tpu.memory_space<vmem>>, vector<1x1x96x96xf32>
    %114 = vector.shape_cast %113 : vector<1x1x96x96xf32> to vector<96x96xf32>
    %cst_132 = arith.constant dense<0.000000e+00> : vector<40x96xf32>
    %115 = tpu.matmul %112, %114, %cst_132 {dimension_numbers = #tpu.dot_dimension_numbers<[1], [0], [0], [1], [0, 0, 1, 1], [], []>} : vector<40x96xf32>, vector<96x96xf32>, vector<40x96xf32> -> vector<40x96xf32>
    %116 = arith.addf %109, %115 : vector<40x96xf32>
    %c4_133 = arith.constant 4 : index
    %c0_134 = arith.constant 0 : index
    %c0_135 = arith.constant 0 : index
    %117 = vector.load %arg2[%c4_133, %c0_134, %c0_135] : memref<5x40x40xf32, #tpu.memory_space<vmem>>, vector<1x40x40xf32>
    %118 = vector.shape_cast %117 : vector<1x40x40xf32> to vector<40x40xf32>
    %cst_136 = arith.constant dense<0.000000e+00> : vector<40x96xf32>
    %119 = tpu.matmul %118, %85, %cst_136 {dimension_numbers = #tpu.dot_dimension_numbers<[1], [0], [0], [1], [0, 0, 1, 1], [], []>} : vector<40x40xf32>, vector<40x96xf32>, vector<40x96xf32> -> vector<40x96xf32>
    %c1_137 = arith.constant 1 : index
    %c4_138 = arith.constant 4 : index
    %c0_139 = arith.constant 0 : index
    %c0_140 = arith.constant 0 : index
    %120 = vector.load %arg8[%c1_137, %c4_138, %c0_139, %c0_140] : memref<2x5x96x96xf32, #tpu.memory_space<vmem>>, vector<1x1x96x96xf32>
    %121 = vector.shape_cast %120 : vector<1x1x96x96xf32> to vector<96x96xf32>
    %cst_141 = arith.constant dense<0.000000e+00> : vector<40x96xf32>
    %122 = tpu.matmul %119, %121, %cst_141 {dimension_numbers = #tpu.dot_dimension_numbers<[1], [0], [0], [1], [0, 0, 1, 1], [], []>} : vector<40x96xf32>, vector<96x96xf32>, vector<40x96xf32> -> vector<40x96xf32>
    %123 = arith.addf %116, %122 : vector<40x96xf32>
    %124 = vector.broadcast %87 : vector<1x96xf32> to vector<40x96xf32>
    %125 = arith.addf %123, %124 : vector<40x96xf32>
    %126 = arith.addf %125, %43 : vector<40x96xf32>
    %cst_142 = arith.constant 0.000000e+00 : f32
    %127 = vector.broadcast %cst_142 : f32 to vector<40x96xf32>
    %128 = arith.maximumf %126, %127 : vector<40x96xf32>
    %c0_143 = arith.constant 0 : index
    %c0_144 = arith.constant 0 : index
    %129 = vector.load %arg11[%c0_143, %c0_144] : memref<1x32xf32, #tpu.memory_space<vmem>>, vector<1x32xf32>
    %cst_145 = arith.constant 0.000000e+00 : f32
    %130 = vector.broadcast %cst_145 : f32 to vector<40x32xf32>
    %c0_146 = arith.constant 0 : index
    %c0_147 = arith.constant 0 : index
    %c0_148 = arith.constant 0 : index
    %131 = vector.load %arg2[%c0_146, %c0_147, %c0_148] : memref<5x40x40xf32, #tpu.memory_space<vmem>>, vector<1x40x40xf32>
    %132 = vector.shape_cast %131 : vector<1x40x40xf32> to vector<40x40xf32>
    %cst_149 = arith.constant dense<0.000000e+00> : vector<40x96xf32>
    %133 = tpu.matmul %132, %128, %cst_149 {dimension_numbers = #tpu.dot_dimension_numbers<[1], [0], [0], [1], [0, 0, 1, 1], [], []>} : vector<40x40xf32>, vector<40x96xf32>, vector<40x96xf32> -> vector<40x96xf32>
    %c0_150 = arith.constant 0 : index
    %c0_151 = arith.constant 0 : index
    %c0_152 = arith.constant 0 : index
    %134 = vector.load %arg10[%c0_150, %c0_151, %c0_152] : memref<5x96x32xf32, #tpu.memory_space<vmem>>, vector<1x96x32xf32>
    %135 = vector.shape_cast %134 : vector<1x96x32xf32> to vector<96x32xf32>
    %cst_153 = arith.constant dense<0.000000e+00> : vector<40x32xf32>
    %136 = tpu.matmul %133, %135, %cst_153 {dimension_numbers = #tpu.dot_dimension_numbers<[1], [0], [0], [1], [0, 0, 1, 1], [], []>} : vector<40x96xf32>, vector<96x32xf32>, vector<40x32xf32> -> vector<40x32xf32>
    %137 = arith.addf %130, %136 : vector<40x32xf32>
    %c1_154 = arith.constant 1 : index
    %c0_155 = arith.constant 0 : index
    %c0_156 = arith.constant 0 : index
    %138 = vector.load %arg2[%c1_154, %c0_155, %c0_156] : memref<5x40x40xf32, #tpu.memory_space<vmem>>, vector<1x40x40xf32>
    %139 = vector.shape_cast %138 : vector<1x40x40xf32> to vector<40x40xf32>
    %cst_157 = arith.constant dense<0.000000e+00> : vector<40x96xf32>
    %140 = tpu.matmul %139, %128, %cst_157 {dimension_numbers = #tpu.dot_dimension_numbers<[1], [0], [0], [1], [0, 0, 1, 1], [], []>} : vector<40x40xf32>, vector<40x96xf32>, vector<40x96xf32> -> vector<40x96xf32>
    %c1_158 = arith.constant 1 : index
    %c0_159 = arith.constant 0 : index
    %c0_160 = arith.constant 0 : index
    %141 = vector.load %arg10[%c1_158, %c0_159, %c0_160] : memref<5x96x32xf32, #tpu.memory_space<vmem>>, vector<1x96x32xf32>
    %142 = vector.shape_cast %141 : vector<1x96x32xf32> to vector<96x32xf32>
    %cst_161 = arith.constant dense<0.000000e+00> : vector<40x32xf32>
    %143 = tpu.matmul %140, %142, %cst_161 {dimension_numbers = #tpu.dot_dimension_numbers<[1], [0], [0], [1], [0, 0, 1, 1], [], []>} : vector<40x96xf32>, vector<96x32xf32>, vector<40x32xf32> -> vector<40x32xf32>
    %144 = arith.addf %137, %143 : vector<40x32xf32>
    %c2_162 = arith.constant 2 : index
    %c0_163 = arith.constant 0 : index
    %c0_164 = arith.constant 0 : index
    %145 = vector.load %arg2[%c2_162, %c0_163, %c0_164] : memref<5x40x40xf32, #tpu.memory_space<vmem>>, vector<1x40x40xf32>
    %146 = vector.shape_cast %145 : vector<1x40x40xf32> to vector<40x40xf32>
    %cst_165 = arith.constant dense<0.000000e+00> : vector<40x96xf32>
    %147 = tpu.matmul %146, %128, %cst_165 {dimension_numbers = #tpu.dot_dimension_numbers<[1], [0], [0], [1], [0, 0, 1, 1], [], []>} : vector<40x40xf32>, vector<40x96xf32>, vector<40x96xf32> -> vector<40x96xf32>
    %c2_166 = arith.constant 2 : index
    %c0_167 = arith.constant 0 : index
    %c0_168 = arith.constant 0 : index
    %148 = vector.load %arg10[%c2_166, %c0_167, %c0_168] : memref<5x96x32xf32, #tpu.memory_space<vmem>>, vector<1x96x32xf32>
    %149 = vector.shape_cast %148 : vector<1x96x32xf32> to vector<96x32xf32>
    %cst_169 = arith.constant dense<0.000000e+00> : vector<40x32xf32>
    %150 = tpu.matmul %147, %149, %cst_169 {dimension_numbers = #tpu.dot_dimension_numbers<[1], [0], [0], [1], [0, 0, 1, 1], [], []>} : vector<40x96xf32>, vector<96x32xf32>, vector<40x32xf32> -> vector<40x32xf32>
    %151 = arith.addf %144, %150 : vector<40x32xf32>
    %c3_170 = arith.constant 3 : index
    %c0_171 = arith.constant 0 : index
    %c0_172 = arith.constant 0 : index
    %152 = vector.load %arg2[%c3_170, %c0_171, %c0_172] : memref<5x40x40xf32, #tpu.memory_space<vmem>>, vector<1x40x40xf32>
    %153 = vector.shape_cast %152 : vector<1x40x40xf32> to vector<40x40xf32>
    %cst_173 = arith.constant dense<0.000000e+00> : vector<40x96xf32>
    %154 = tpu.matmul %153, %128, %cst_173 {dimension_numbers = #tpu.dot_dimension_numbers<[1], [0], [0], [1], [0, 0, 1, 1], [], []>} : vector<40x40xf32>, vector<40x96xf32>, vector<40x96xf32> -> vector<40x96xf32>
    %c3_174 = arith.constant 3 : index
    %c0_175 = arith.constant 0 : index
    %c0_176 = arith.constant 0 : index
    %155 = vector.load %arg10[%c3_174, %c0_175, %c0_176] : memref<5x96x32xf32, #tpu.memory_space<vmem>>, vector<1x96x32xf32>
    %156 = vector.shape_cast %155 : vector<1x96x32xf32> to vector<96x32xf32>
    %cst_177 = arith.constant dense<0.000000e+00> : vector<40x32xf32>
    %157 = tpu.matmul %154, %156, %cst_177 {dimension_numbers = #tpu.dot_dimension_numbers<[1], [0], [0], [1], [0, 0, 1, 1], [], []>} : vector<40x96xf32>, vector<96x32xf32>, vector<40x32xf32> -> vector<40x32xf32>
    %158 = arith.addf %151, %157 : vector<40x32xf32>
    %c4_178 = arith.constant 4 : index
    %c0_179 = arith.constant 0 : index
    %c0_180 = arith.constant 0 : index
    %159 = vector.load %arg2[%c4_178, %c0_179, %c0_180] : memref<5x40x40xf32, #tpu.memory_space<vmem>>, vector<1x40x40xf32>
    %160 = vector.shape_cast %159 : vector<1x40x40xf32> to vector<40x40xf32>
    %cst_181 = arith.constant dense<0.000000e+00> : vector<40x96xf32>
    %161 = tpu.matmul %160, %128, %cst_181 {dimension_numbers = #tpu.dot_dimension_numbers<[1], [0], [0], [1], [0, 0, 1, 1], [], []>} : vector<40x40xf32>, vector<40x96xf32>, vector<40x96xf32> -> vector<40x96xf32>
    %c4_182 = arith.constant 4 : index
    %c0_183 = arith.constant 0 : index
    %c0_184 = arith.constant 0 : index
    %162 = vector.load %arg10[%c4_182, %c0_183, %c0_184] : memref<5x96x32xf32, #tpu.memory_space<vmem>>, vector<1x96x32xf32>
    %163 = vector.shape_cast %162 : vector<1x96x32xf32> to vector<96x32xf32>
    %cst_185 = arith.constant dense<0.000000e+00> : vector<40x32xf32>
    %164 = tpu.matmul %161, %163, %cst_185 {dimension_numbers = #tpu.dot_dimension_numbers<[1], [0], [0], [1], [0, 0, 1, 1], [], []>} : vector<40x96xf32>, vector<96x32xf32>, vector<40x32xf32> -> vector<40x32xf32>
    %165 = arith.addf %158, %164 : vector<40x32xf32>
    %166 = vector.broadcast %129 : vector<1x32xf32> to vector<40x32xf32>
    %167 = arith.addf %165, %166 : vector<40x32xf32>
    %cst_186 = arith.constant 0.000000e+00 : f32
    %168 = vector.broadcast %cst_186 : f32 to vector<40x32xf32>
    %169 = arith.maximumf %167, %168 : vector<40x32xf32>
    %c0_187 = arith.constant 0 : index
    %c0_188 = arith.constant 0 : index
    %c0_189 = arith.constant 0 : index
    %170 = vector.load %arg13[%c0_187, %c0_188, %c0_189] : memref<2x1x32xf32, #tpu.memory_space<vmem>>, vector<1x1x32xf32>
    %171 = vector.shape_cast %170 : vector<1x1x32xf32> to vector<1x32xf32>
    %cst_190 = arith.constant 0.000000e+00 : f32
    %172 = vector.broadcast %cst_190 : f32 to vector<40x32xf32>
    %c0_191 = arith.constant 0 : index
    %c0_192 = arith.constant 0 : index
    %c0_193 = arith.constant 0 : index
    %173 = vector.load %arg2[%c0_191, %c0_192, %c0_193] : memref<5x40x40xf32, #tpu.memory_space<vmem>>, vector<1x40x40xf32>
    %174 = vector.shape_cast %173 : vector<1x40x40xf32> to vector<40x40xf32>
    %cst_194 = arith.constant dense<0.000000e+00> : vector<40x32xf32>
    %175 = tpu.matmul %174, %169, %cst_194 {dimension_numbers = #tpu.dot_dimension_numbers<[1], [0], [0], [1], [0, 0, 1, 1], [], []>} : vector<40x40xf32>, vector<40x32xf32>, vector<40x32xf32> -> vector<40x32xf32>
    %c0_195 = arith.constant 0 : index
    %c0_196 = arith.constant 0 : index
    %c0_197 = arith.constant 0 : index
    %c0_198 = arith.constant 0 : index
    %176 = vector.load %arg12[%c0_195, %c0_196, %c0_197, %c0_198] : memref<2x5x32x32xf32, #tpu.memory_space<vmem>>, vector<1x1x32x32xf32>
    %177 = vector.shape_cast %176 : vector<1x1x32x32xf32> to vector<32x32xf32>
    %cst_199 = arith.constant dense<0.000000e+00> : vector<40x32xf32>
    %178 = tpu.matmul %175, %177, %cst_199 {dimension_numbers = #tpu.dot_dimension_numbers<[1], [0], [0], [1], [0, 0, 1, 1], [], []>} : vector<40x32xf32>, vector<32x32xf32>, vector<40x32xf32> -> vector<40x32xf32>
    %179 = arith.addf %172, %178 : vector<40x32xf32>
    %c1_200 = arith.constant 1 : index
    %c0_201 = arith.constant 0 : index
    %c0_202 = arith.constant 0 : index
    %180 = vector.load %arg2[%c1_200, %c0_201, %c0_202] : memref<5x40x40xf32, #tpu.memory_space<vmem>>, vector<1x40x40xf32>
    %181 = vector.shape_cast %180 : vector<1x40x40xf32> to vector<40x40xf32>
    %cst_203 = arith.constant dense<0.000000e+00> : vector<40x32xf32>
    %182 = tpu.matmul %181, %169, %cst_203 {dimension_numbers = #tpu.dot_dimension_numbers<[1], [0], [0], [1], [0, 0, 1, 1], [], []>} : vector<40x40xf32>, vector<40x32xf32>, vector<40x32xf32> -> vector<40x32xf32>
    %c0_204 = arith.constant 0 : index
    %c1_205 = arith.constant 1 : index
    %c0_206 = arith.constant 0 : index
    %c0_207 = arith.constant 0 : index
    %183 = vector.load %arg12[%c0_204, %c1_205, %c0_206, %c0_207] : memref<2x5x32x32xf32, #tpu.memory_space<vmem>>, vector<1x1x32x32xf32>
    %184 = vector.shape_cast %183 : vector<1x1x32x32xf32> to vector<32x32xf32>
    %cst_208 = arith.constant dense<0.000000e+00> : vector<40x32xf32>
    %185 = tpu.matmul %182, %184, %cst_208 {dimension_numbers = #tpu.dot_dimension_numbers<[1], [0], [0], [1], [0, 0, 1, 1], [], []>} : vector<40x32xf32>, vector<32x32xf32>, vector<40x32xf32> -> vector<40x32xf32>
    %186 = arith.addf %179, %185 : vector<40x32xf32>
    %c2_209 = arith.constant 2 : index
    %c0_210 = arith.constant 0 : index
    %c0_211 = arith.constant 0 : index
    %187 = vector.load %arg2[%c2_209, %c0_210, %c0_211] : memref<5x40x40xf32, #tpu.memory_space<vmem>>, vector<1x40x40xf32>
    %188 = vector.shape_cast %187 : vector<1x40x40xf32> to vector<40x40xf32>
    %cst_212 = arith.constant dense<0.000000e+00> : vector<40x32xf32>
    %189 = tpu.matmul %188, %169, %cst_212 {dimension_numbers = #tpu.dot_dimension_numbers<[1], [0], [0], [1], [0, 0, 1, 1], [], []>} : vector<40x40xf32>, vector<40x32xf32>, vector<40x32xf32> -> vector<40x32xf32>
    %c0_213 = arith.constant 0 : index
    %c2_214 = arith.constant 2 : index
    %c0_215 = arith.constant 0 : index
    %c0_216 = arith.constant 0 : index
    %190 = vector.load %arg12[%c0_213, %c2_214, %c0_215, %c0_216] : memref<2x5x32x32xf32, #tpu.memory_space<vmem>>, vector<1x1x32x32xf32>
    %191 = vector.shape_cast %190 : vector<1x1x32x32xf32> to vector<32x32xf32>
    %cst_217 = arith.constant dense<0.000000e+00> : vector<40x32xf32>
    %192 = tpu.matmul %189, %191, %cst_217 {dimension_numbers = #tpu.dot_dimension_numbers<[1], [0], [0], [1], [0, 0, 1, 1], [], []>} : vector<40x32xf32>, vector<32x32xf32>, vector<40x32xf32> -> vector<40x32xf32>
    %193 = arith.addf %186, %192 : vector<40x32xf32>
    %c3_218 = arith.constant 3 : index
    %c0_219 = arith.constant 0 : index
    %c0_220 = arith.constant 0 : index
    %194 = vector.load %arg2[%c3_218, %c0_219, %c0_220] : memref<5x40x40xf32, #tpu.memory_space<vmem>>, vector<1x40x40xf32>
    %195 = vector.shape_cast %194 : vector<1x40x40xf32> to vector<40x40xf32>
    %cst_221 = arith.constant dense<0.000000e+00> : vector<40x32xf32>
    %196 = tpu.matmul %195, %169, %cst_221 {dimension_numbers = #tpu.dot_dimension_numbers<[1], [0], [0], [1], [0, 0, 1, 1], [], []>} : vector<40x40xf32>, vector<40x32xf32>, vector<40x32xf32> -> vector<40x32xf32>
    %c0_222 = arith.constant 0 : index
    %c3_223 = arith.constant 3 : index
    %c0_224 = arith.constant 0 : index
    %c0_225 = arith.constant 0 : index
    %197 = vector.load %arg12[%c0_222, %c3_223, %c0_224, %c0_225] : memref<2x5x32x32xf32, #tpu.memory_space<vmem>>, vector<1x1x32x32xf32>
    %198 = vector.shape_cast %197 : vector<1x1x32x32xf32> to vector<32x32xf32>
    %cst_226 = arith.constant dense<0.000000e+00> : vector<40x32xf32>
    %199 = tpu.matmul %196, %198, %cst_226 {dimension_numbers = #tpu.dot_dimension_numbers<[1], [0], [0], [1], [0, 0, 1, 1], [], []>} : vector<40x32xf32>, vector<32x32xf32>, vector<40x32xf32> -> vector<40x32xf32>
    %200 = arith.addf %193, %199 : vector<40x32xf32>
    %c4_227 = arith.constant 4 : index
    %c0_228 = arith.constant 0 : index
    %c0_229 = arith.constant 0 : index
    %201 = vector.load %arg2[%c4_227, %c0_228, %c0_229] : memref<5x40x40xf32, #tpu.memory_space<vmem>>, vector<1x40x40xf32>
    %202 = vector.shape_cast %201 : vector<1x40x40xf32> to vector<40x40xf32>
    %cst_230 = arith.constant dense<0.000000e+00> : vector<40x32xf32>
    %203 = tpu.matmul %202, %169, %cst_230 {dimension_numbers = #tpu.dot_dimension_numbers<[1], [0], [0], [1], [0, 0, 1, 1], [], []>} : vector<40x40xf32>, vector<40x32xf32>, vector<40x32xf32> -> vector<40x32xf32>
    %c0_231 = arith.constant 0 : index
    %c4_232 = arith.constant 4 : index
    %c0_233 = arith.constant 0 : index
    %c0_234 = arith.constant 0 : index
    %204 = vector.load %arg12[%c0_231, %c4_232, %c0_233, %c0_234] : memref<2x5x32x32xf32, #tpu.memory_space<vmem>>, vector<1x1x32x32xf32>
    %205 = vector.shape_cast %204 : vector<1x1x32x32xf32> to vector<32x32xf32>
    %cst_235 = arith.constant dense<0.000000e+00> : vector<40x32xf32>
    %206 = tpu.matmul %203, %205, %cst_235 {dimension_numbers = #tpu.dot_dimension_numbers<[1], [0], [0], [1], [0, 0, 1, 1], [], []>} : vector<40x32xf32>, vector<32x32xf32>, vector<40x32xf32> -> vector<40x32xf32>
    %207 = arith.addf %200, %206 : vector<40x32xf32>
    %208 = vector.broadcast %171 : vector<1x32xf32> to vector<40x32xf32>
    %209 = arith.addf %207, %208 : vector<40x32xf32>
    %cst_236 = arith.constant 0.000000e+00 : f32
    %210 = vector.broadcast %cst_236 : f32 to vector<40x32xf32>
    %211 = arith.maximumf %209, %210 : vector<40x32xf32>
    %c1_237 = arith.constant 1 : index
    %c0_238 = arith.constant 0 : index
    %c0_239 = arith.constant 0 : index
    %212 = vector.load %arg13[%c1_237, %c0_238, %c0_239] : memref<2x1x32xf32, #tpu.memory_space<vmem>>, vector<1x1x32xf32>
    %213 = vector.shape_cast %212 : vector<1x1x32xf32> to vector<1x32xf32>
    %cst_240 = arith.constant 0.000000e+00 : f32
    %214 = vector.broadcast %cst_240 : f32 to vector<40x32xf32>
    %c0_241 = arith.constant 0 : index
    %c0_242 = arith.constant 0 : index
    %c0_243 = arith.constant 0 : index
    %215 = vector.load %arg2[%c0_241, %c0_242, %c0_243] : memref<5x40x40xf32, #tpu.memory_space<vmem>>, vector<1x40x40xf32>
    %216 = vector.shape_cast %215 : vector<1x40x40xf32> to vector<40x40xf32>
    %cst_244 = arith.constant dense<0.000000e+00> : vector<40x32xf32>
    %217 = tpu.matmul %216, %211, %cst_244 {dimension_numbers = #tpu.dot_dimension_numbers<[1], [0], [0], [1], [0, 0, 1, 1], [], []>} : vector<40x40xf32>, vector<40x32xf32>, vector<40x32xf32> -> vector<40x32xf32>
    %c1_245 = arith.constant 1 : index
    %c0_246 = arith.constant 0 : index
    %c0_247 = arith.constant 0 : index
    %c0_248 = arith.constant 0 : index
    %218 = vector.load %arg12[%c1_245, %c0_246, %c0_247, %c0_248] : memref<2x5x32x32xf32, #tpu.memory_space<vmem>>, vector<1x1x32x32xf32>
    %219 = vector.shape_cast %218 : vector<1x1x32x32xf32> to vector<32x32xf32>
    %cst_249 = arith.constant dense<0.000000e+00> : vector<40x32xf32>
    %220 = tpu.matmul %217, %219, %cst_249 {dimension_numbers = #tpu.dot_dimension_numbers<[1], [0], [0], [1], [0, 0, 1, 1], [], []>} : vector<40x32xf32>, vector<32x32xf32>, vector<40x32xf32> -> vector<40x32xf32>
    %221 = arith.addf %214, %220 : vector<40x32xf32>
    %c1_250 = arith.constant 1 : index
    %c0_251 = arith.constant 0 : index
    %c0_252 = arith.constant 0 : index
    %222 = vector.load %arg2[%c1_250, %c0_251, %c0_252] : memref<5x40x40xf32, #tpu.memory_space<vmem>>, vector<1x40x40xf32>
    %223 = vector.shape_cast %222 : vector<1x40x40xf32> to vector<40x40xf32>
    %cst_253 = arith.constant dense<0.000000e+00> : vector<40x32xf32>
    %224 = tpu.matmul %223, %211, %cst_253 {dimension_numbers = #tpu.dot_dimension_numbers<[1], [0], [0], [1], [0, 0, 1, 1], [], []>} : vector<40x40xf32>, vector<40x32xf32>, vector<40x32xf32> -> vector<40x32xf32>
    %c1_254 = arith.constant 1 : index
    %c1_255 = arith.constant 1 : index
    %c0_256 = arith.constant 0 : index
    %c0_257 = arith.constant 0 : index
    %225 = vector.load %arg12[%c1_254, %c1_255, %c0_256, %c0_257] : memref<2x5x32x32xf32, #tpu.memory_space<vmem>>, vector<1x1x32x32xf32>
    %226 = vector.shape_cast %225 : vector<1x1x32x32xf32> to vector<32x32xf32>
    %cst_258 = arith.constant dense<0.000000e+00> : vector<40x32xf32>
    %227 = tpu.matmul %224, %226, %cst_258 {dimension_numbers = #tpu.dot_dimension_numbers<[1], [0], [0], [1], [0, 0, 1, 1], [], []>} : vector<40x32xf32>, vector<32x32xf32>, vector<40x32xf32> -> vector<40x32xf32>
    %228 = arith.addf %221, %227 : vector<40x32xf32>
    %c2_259 = arith.constant 2 : index
    %c0_260 = arith.constant 0 : index
    %c0_261 = arith.constant 0 : index
    %229 = vector.load %arg2[%c2_259, %c0_260, %c0_261] : memref<5x40x40xf32, #tpu.memory_space<vmem>>, vector<1x40x40xf32>
    %230 = vector.shape_cast %229 : vector<1x40x40xf32> to vector<40x40xf32>
    %cst_262 = arith.constant dense<0.000000e+00> : vector<40x32xf32>
    %231 = tpu.matmul %230, %211, %cst_262 {dimension_numbers = #tpu.dot_dimension_numbers<[1], [0], [0], [1], [0, 0, 1, 1], [], []>} : vector<40x40xf32>, vector<40x32xf32>, vector<40x32xf32> -> vector<40x32xf32>
    %c1_263 = arith.constant 1 : index
    %c2_264 = arith.constant 2 : index
    %c0_265 = arith.constant 0 : index
    %c0_266 = arith.constant 0 : index
    %232 = vector.load %arg12[%c1_263, %c2_264, %c0_265, %c0_266] : memref<2x5x32x32xf32, #tpu.memory_space<vmem>>, vector<1x1x32x32xf32>
    %233 = vector.shape_cast %232 : vector<1x1x32x32xf32> to vector<32x32xf32>
    %cst_267 = arith.constant dense<0.000000e+00> : vector<40x32xf32>
    %234 = tpu.matmul %231, %233, %cst_267 {dimension_numbers = #tpu.dot_dimension_numbers<[1], [0], [0], [1], [0, 0, 1, 1], [], []>} : vector<40x32xf32>, vector<32x32xf32>, vector<40x32xf32> -> vector<40x32xf32>
    %235 = arith.addf %228, %234 : vector<40x32xf32>
    %c3_268 = arith.constant 3 : index
    %c0_269 = arith.constant 0 : index
    %c0_270 = arith.constant 0 : index
    %236 = vector.load %arg2[%c3_268, %c0_269, %c0_270] : memref<5x40x40xf32, #tpu.memory_space<vmem>>, vector<1x40x40xf32>
    %237 = vector.shape_cast %236 : vector<1x40x40xf32> to vector<40x40xf32>
    %cst_271 = arith.constant dense<0.000000e+00> : vector<40x32xf32>
    %238 = tpu.matmul %237, %211, %cst_271 {dimension_numbers = #tpu.dot_dimension_numbers<[1], [0], [0], [1], [0, 0, 1, 1], [], []>} : vector<40x40xf32>, vector<40x32xf32>, vector<40x32xf32> -> vector<40x32xf32>
    %c1_272 = arith.constant 1 : index
    %c3_273 = arith.constant 3 : index
    %c0_274 = arith.constant 0 : index
    %c0_275 = arith.constant 0 : index
    %239 = vector.load %arg12[%c1_272, %c3_273, %c0_274, %c0_275] : memref<2x5x32x32xf32, #tpu.memory_space<vmem>>, vector<1x1x32x32xf32>
    %240 = vector.shape_cast %239 : vector<1x1x32x32xf32> to vector<32x32xf32>
    %cst_276 = arith.constant dense<0.000000e+00> : vector<40x32xf32>
    %241 = tpu.matmul %238, %240, %cst_276 {dimension_numbers = #tpu.dot_dimension_numbers<[1], [0], [0], [1], [0, 0, 1, 1], [], []>} : vector<40x32xf32>, vector<32x32xf32>, vector<40x32xf32> -> vector<40x32xf32>
    %242 = arith.addf %235, %241 : vector<40x32xf32>
    %c4_277 = arith.constant 4 : index
    %c0_278 = arith.constant 0 : index
    %c0_279 = arith.constant 0 : index
    %243 = vector.load %arg2[%c4_277, %c0_278, %c0_279] : memref<5x40x40xf32, #tpu.memory_space<vmem>>, vector<1x40x40xf32>
    %244 = vector.shape_cast %243 : vector<1x40x40xf32> to vector<40x40xf32>
    %cst_280 = arith.constant dense<0.000000e+00> : vector<40x32xf32>
    %245 = tpu.matmul %244, %211, %cst_280 {dimension_numbers = #tpu.dot_dimension_numbers<[1], [0], [0], [1], [0, 0, 1, 1], [], []>} : vector<40x40xf32>, vector<40x32xf32>, vector<40x32xf32> -> vector<40x32xf32>
    %c1_281 = arith.constant 1 : index
    %c4_282 = arith.constant 4 : index
    %c0_283 = arith.constant 0 : index
    %c0_284 = arith.constant 0 : index
    %246 = vector.load %arg12[%c1_281, %c4_282, %c0_283, %c0_284] : memref<2x5x32x32xf32, #tpu.memory_space<vmem>>, vector<1x1x32x32xf32>
    %247 = vector.shape_cast %246 : vector<1x1x32x32xf32> to vector<32x32xf32>
    %cst_285 = arith.constant dense<0.000000e+00> : vector<40x32xf32>
    %248 = tpu.matmul %245, %247, %cst_285 {dimension_numbers = #tpu.dot_dimension_numbers<[1], [0], [0], [1], [0, 0, 1, 1], [], []>} : vector<40x32xf32>, vector<32x32xf32>, vector<40x32xf32> -> vector<40x32xf32>
    %249 = arith.addf %242, %248 : vector<40x32xf32>
    %250 = vector.broadcast %213 : vector<1x32xf32> to vector<40x32xf32>
    %251 = arith.addf %249, %250 : vector<40x32xf32>
    %252 = arith.addf %251, %169 : vector<40x32xf32>
    %cst_286 = arith.constant 0.000000e+00 : f32
    %253 = vector.broadcast %cst_286 : f32 to vector<40x32xf32>
    %254 = arith.maximumf %252, %253 : vector<40x32xf32>
    %c0_287 = arith.constant 0 : index
    %c0_288 = arith.constant 0 : index
    %255 = vector.load %arg15[%c0_287, %c0_288] : memref<1x16xf32, #tpu.memory_space<vmem>>, vector<1x16xf32>
    %cst_289 = arith.constant 0.000000e+00 : f32
    %256 = vector.broadcast %cst_289 : f32 to vector<40x16xf32>
    %c0_290 = arith.constant 0 : index
    %c0_291 = arith.constant 0 : index
    %c0_292 = arith.constant 0 : index
    %257 = vector.load %arg2[%c0_290, %c0_291, %c0_292] : memref<5x40x40xf32, #tpu.memory_space<vmem>>, vector<1x40x40xf32>
    %258 = vector.shape_cast %257 : vector<1x40x40xf32> to vector<40x40xf32>
    %cst_293 = arith.constant dense<0.000000e+00> : vector<40x32xf32>
    %259 = tpu.matmul %258, %254, %cst_293 {dimension_numbers = #tpu.dot_dimension_numbers<[1], [0], [0], [1], [0, 0, 1, 1], [], []>} : vector<40x40xf32>, vector<40x32xf32>, vector<40x32xf32> -> vector<40x32xf32>
    %c0_294 = arith.constant 0 : index
    %c0_295 = arith.constant 0 : index
    %c0_296 = arith.constant 0 : index
    %260 = vector.load %arg14[%c0_294, %c0_295, %c0_296] : memref<5x32x16xf32, #tpu.memory_space<vmem>>, vector<1x32x16xf32>
    %261 = vector.shape_cast %260 : vector<1x32x16xf32> to vector<32x16xf32>
    %cst_297 = arith.constant dense<0.000000e+00> : vector<40x16xf32>
    %262 = tpu.matmul %259, %261, %cst_297 {dimension_numbers = #tpu.dot_dimension_numbers<[1], [0], [0], [1], [0, 0, 1, 1], [], []>} : vector<40x32xf32>, vector<32x16xf32>, vector<40x16xf32> -> vector<40x16xf32>
    %263 = arith.addf %256, %262 : vector<40x16xf32>
    %c1_298 = arith.constant 1 : index
    %c0_299 = arith.constant 0 : index
    %c0_300 = arith.constant 0 : index
    %264 = vector.load %arg2[%c1_298, %c0_299, %c0_300] : memref<5x40x40xf32, #tpu.memory_space<vmem>>, vector<1x40x40xf32>
    %265 = vector.shape_cast %264 : vector<1x40x40xf32> to vector<40x40xf32>
    %cst_301 = arith.constant dense<0.000000e+00> : vector<40x32xf32>
    %266 = tpu.matmul %265, %254, %cst_301 {dimension_numbers = #tpu.dot_dimension_numbers<[1], [0], [0], [1], [0, 0, 1, 1], [], []>} : vector<40x40xf32>, vector<40x32xf32>, vector<40x32xf32> -> vector<40x32xf32>
    %c1_302 = arith.constant 1 : index
    %c0_303 = arith.constant 0 : index
    %c0_304 = arith.constant 0 : index
    %267 = vector.load %arg14[%c1_302, %c0_303, %c0_304] : memref<5x32x16xf32, #tpu.memory_space<vmem>>, vector<1x32x16xf32>
    %268 = vector.shape_cast %267 : vector<1x32x16xf32> to vector<32x16xf32>
    %cst_305 = arith.constant dense<0.000000e+00> : vector<40x16xf32>
    %269 = tpu.matmul %266, %268, %cst_305 {dimension_numbers = #tpu.dot_dimension_numbers<[1], [0], [0], [1], [0, 0, 1, 1], [], []>} : vector<40x32xf32>, vector<32x16xf32>, vector<40x16xf32> -> vector<40x16xf32>
    %270 = arith.addf %263, %269 : vector<40x16xf32>
    %c2_306 = arith.constant 2 : index
    %c0_307 = arith.constant 0 : index
    %c0_308 = arith.constant 0 : index
    %271 = vector.load %arg2[%c2_306, %c0_307, %c0_308] : memref<5x40x40xf32, #tpu.memory_space<vmem>>, vector<1x40x40xf32>
    %272 = vector.shape_cast %271 : vector<1x40x40xf32> to vector<40x40xf32>
    %cst_309 = arith.constant dense<0.000000e+00> : vector<40x32xf32>
    %273 = tpu.matmul %272, %254, %cst_309 {dimension_numbers = #tpu.dot_dimension_numbers<[1], [0], [0], [1], [0, 0, 1, 1], [], []>} : vector<40x40xf32>, vector<40x32xf32>, vector<40x32xf32> -> vector<40x32xf32>
    %c2_310 = arith.constant 2 : index
    %c0_311 = arith.constant 0 : index
    %c0_312 = arith.constant 0 : index
    %274 = vector.load %arg14[%c2_310, %c0_311, %c0_312] : memref<5x32x16xf32, #tpu.memory_space<vmem>>, vector<1x32x16xf32>
    %275 = vector.shape_cast %274 : vector<1x32x16xf32> to vector<32x16xf32>
    %cst_313 = arith.constant dense<0.000000e+00> : vector<40x16xf32>
    %276 = tpu.matmul %273, %275, %cst_313 {dimension_numbers = #tpu.dot_dimension_numbers<[1], [0], [0], [1], [0, 0, 1, 1], [], []>} : vector<40x32xf32>, vector<32x16xf32>, vector<40x16xf32> -> vector<40x16xf32>
    %277 = arith.addf %270, %276 : vector<40x16xf32>
    %c3_314 = arith.constant 3 : index
    %c0_315 = arith.constant 0 : index
    %c0_316 = arith.constant 0 : index
    %278 = vector.load %arg2[%c3_314, %c0_315, %c0_316] : memref<5x40x40xf32, #tpu.memory_space<vmem>>, vector<1x40x40xf32>
    %279 = vector.shape_cast %278 : vector<1x40x40xf32> to vector<40x40xf32>
    %cst_317 = arith.constant dense<0.000000e+00> : vector<40x32xf32>
    %280 = tpu.matmul %279, %254, %cst_317 {dimension_numbers = #tpu.dot_dimension_numbers<[1], [0], [0], [1], [0, 0, 1, 1], [], []>} : vector<40x40xf32>, vector<40x32xf32>, vector<40x32xf32> -> vector<40x32xf32>
    %c3_318 = arith.constant 3 : index
    %c0_319 = arith.constant 0 : index
    %c0_320 = arith.constant 0 : index
    %281 = vector.load %arg14[%c3_318, %c0_319, %c0_320] : memref<5x32x16xf32, #tpu.memory_space<vmem>>, vector<1x32x16xf32>
    %282 = vector.shape_cast %281 : vector<1x32x16xf32> to vector<32x16xf32>
    %cst_321 = arith.constant dense<0.000000e+00> : vector<40x16xf32>
    %283 = tpu.matmul %280, %282, %cst_321 {dimension_numbers = #tpu.dot_dimension_numbers<[1], [0], [0], [1], [0, 0, 1, 1], [], []>} : vector<40x32xf32>, vector<32x16xf32>, vector<40x16xf32> -> vector<40x16xf32>
    %284 = arith.addf %277, %283 : vector<40x16xf32>
    %c4_322 = arith.constant 4 : index
    %c0_323 = arith.constant 0 : index
    %c0_324 = arith.constant 0 : index
    %285 = vector.load %arg2[%c4_322, %c0_323, %c0_324] : memref<5x40x40xf32, #tpu.memory_space<vmem>>, vector<1x40x40xf32>
    %286 = vector.shape_cast %285 : vector<1x40x40xf32> to vector<40x40xf32>
    %cst_325 = arith.constant dense<0.000000e+00> : vector<40x32xf32>
    %287 = tpu.matmul %286, %254, %cst_325 {dimension_numbers = #tpu.dot_dimension_numbers<[1], [0], [0], [1], [0, 0, 1, 1], [], []>} : vector<40x40xf32>, vector<40x32xf32>, vector<40x32xf32> -> vector<40x32xf32>
    %c4_326 = arith.constant 4 : index
    %c0_327 = arith.constant 0 : index
    %c0_328 = arith.constant 0 : index
    %288 = vector.load %arg14[%c4_326, %c0_327, %c0_328] : memref<5x32x16xf32, #tpu.memory_space<vmem>>, vector<1x32x16xf32>
    %289 = vector.shape_cast %288 : vector<1x32x16xf32> to vector<32x16xf32>
    %cst_329 = arith.constant dense<0.000000e+00> : vector<40x16xf32>
    %290 = tpu.matmul %287, %289, %cst_329 {dimension_numbers = #tpu.dot_dimension_numbers<[1], [0], [0], [1], [0, 0, 1, 1], [], []>} : vector<40x32xf32>, vector<32x16xf32>, vector<40x16xf32> -> vector<40x16xf32>
    %291 = arith.addf %284, %290 : vector<40x16xf32>
    %292 = vector.broadcast %255 : vector<1x16xf32> to vector<40x16xf32>
    %293 = arith.addf %291, %292 : vector<40x16xf32>
    %cst_330 = arith.constant 0.000000e+00 : f32
    %294 = vector.broadcast %cst_330 : f32 to vector<40x16xf32>
    %295 = arith.maximumf %293, %294 : vector<40x16xf32>
    %c0_331 = arith.constant 0 : index
    %c0_332 = arith.constant 0 : index
    %296 = vector.load %arg3[%c0_331, %c0_332] : memref<32x40xf32, #tpu.memory_space<vmem>>, vector<32x40xf32>
    %cst_333 = arith.constant dense<0.000000e+00> : vector<32x16xf32>
    %297 = tpu.matmul %296, %295, %cst_333 {dimension_numbers = #tpu.dot_dimension_numbers<[1], [0], [0], [1], [0, 0, 1, 1], [], []>} : vector<32x40xf32>, vector<40x16xf32>, vector<32x16xf32> -> vector<32x16xf32>
    %c0_334 = arith.constant 0 : index
    %c0_335 = arith.constant 0 : index
    %c0_336 = arith.constant 0 : index
    %298 = vector.load %arg16[%c0_334, %c0_335, %c0_336] : memref<4x16x16xf32, #tpu.memory_space<vmem>>, vector<1x16x16xf32>
    %299 = vector.shape_cast %298 : vector<1x16x16xf32> to vector<16x16xf32>
    %cst_337 = arith.constant dense<0.000000e+00> : vector<32x16xf32>
    %300 = tpu.matmul %297, %299, %cst_337 {dimension_numbers = #tpu.dot_dimension_numbers<[1], [0], [0], [1], [0, 0, 1, 1], [], []>} : vector<32x16xf32>, vector<16x16xf32>, vector<32x16xf32> -> vector<32x16xf32>
    %c0_338 = arith.constant 0 : index
    %c0_339 = arith.constant 0 : index
    %c0_340 = arith.constant 0 : index
    %301 = vector.load %arg17[%c0_338, %c0_339, %c0_340] : memref<4x1x16xf32, #tpu.memory_space<vmem>>, vector<1x1x16xf32>
    %302 = vector.shape_cast %301 : vector<1x1x16xf32> to vector<1x16xf32>
    %303 = vector.broadcast %302 : vector<1x16xf32> to vector<32x16xf32>
    %304 = arith.addf %300, %303 : vector<32x16xf32>
    %c1_341 = arith.constant 1 : index
    %c0_342 = arith.constant 0 : index
    %c0_343 = arith.constant 0 : index
    %305 = vector.load %arg16[%c1_341, %c0_342, %c0_343] : memref<4x16x16xf32, #tpu.memory_space<vmem>>, vector<1x16x16xf32>
    %306 = vector.shape_cast %305 : vector<1x16x16xf32> to vector<16x16xf32>
    %cst_344 = arith.constant dense<0.000000e+00> : vector<32x16xf32>
    %307 = tpu.matmul %297, %306, %cst_344 {dimension_numbers = #tpu.dot_dimension_numbers<[1], [0], [0], [1], [0, 0, 1, 1], [], []>} : vector<32x16xf32>, vector<16x16xf32>, vector<32x16xf32> -> vector<32x16xf32>
    %c1_345 = arith.constant 1 : index
    %c0_346 = arith.constant 0 : index
    %c0_347 = arith.constant 0 : index
    %308 = vector.load %arg17[%c1_345, %c0_346, %c0_347] : memref<4x1x16xf32, #tpu.memory_space<vmem>>, vector<1x1x16xf32>
    %309 = vector.shape_cast %308 : vector<1x1x16xf32> to vector<1x16xf32>
    %310 = vector.broadcast %309 : vector<1x16xf32> to vector<32x16xf32>
    %311 = arith.addf %307, %310 : vector<32x16xf32>
    %c2_348 = arith.constant 2 : index
    %c0_349 = arith.constant 0 : index
    %c0_350 = arith.constant 0 : index
    %312 = vector.load %arg16[%c2_348, %c0_349, %c0_350] : memref<4x16x16xf32, #tpu.memory_space<vmem>>, vector<1x16x16xf32>
    %313 = vector.shape_cast %312 : vector<1x16x16xf32> to vector<16x16xf32>
    %cst_351 = arith.constant dense<0.000000e+00> : vector<32x16xf32>
    %314 = tpu.matmul %297, %313, %cst_351 {dimension_numbers = #tpu.dot_dimension_numbers<[1], [0], [0], [1], [0, 0, 1, 1], [], []>} : vector<32x16xf32>, vector<16x16xf32>, vector<32x16xf32> -> vector<32x16xf32>
    %c2_352 = arith.constant 2 : index
    %c0_353 = arith.constant 0 : index
    %c0_354 = arith.constant 0 : index
    %315 = vector.load %arg17[%c2_352, %c0_353, %c0_354] : memref<4x1x16xf32, #tpu.memory_space<vmem>>, vector<1x1x16xf32>
    %316 = vector.shape_cast %315 : vector<1x1x16xf32> to vector<1x16xf32>
    %317 = vector.broadcast %316 : vector<1x16xf32> to vector<32x16xf32>
    %318 = arith.addf %314, %317 : vector<32x16xf32>
    %cst_355 = arith.constant 5.000000e-01 : f32
    %319 = vector.broadcast %cst_355 : f32 to vector<32x16xf32>
    %320 = arith.mulf %304, %319 : vector<32x16xf32>
    %c0_356 = arith.constant 0 : index
    %c0_357 = arith.constant 0 : index
    %321 = vector.load %arg4[%c0_356, %c0_357] : memref<32x32xf32, #tpu.memory_space<vmem>>, vector<32x32xf32>
    %cst_358 = arith.constant 0.000000e+00 : f32
    %322 = vector.broadcast %cst_358 : f32 to vector<32x16xf32>
    %c0_359 = arith.constant 0 : index
    %c0_360 = arith.constant 0 : index
    %c0_361 = arith.constant 0 : index
    %323 = vector.load %arg5[%c0_359, %c0_360, %c0_361] : memref<4x1x16xf32, #tpu.memory_space<vmem>>, vector<1x1x16xf32>
    %324 = vector.shape_cast %323 : vector<1x1x16xf32> to vector<1x16xf32>
    %325 = vector.broadcast %324 : vector<1x16xf32> to vector<32x16xf32>
    %326 = arith.mulf %320, %325 : vector<32x16xf32>
    %cst_362 = arith.constant dense<0.000000e+00> : vector<32x32xf32>
    %327 = tpu.matmul %326, %311, %cst_362 {dimension_numbers = #tpu.dot_dimension_numbers<[1], [1], [0], [0], [0, 0, 1, 0], [], []>} : vector<32x16xf32>, vector<32x16xf32>, vector<32x32xf32> -> vector<32x32xf32>
    %328 = arith.addf %327, %321 : vector<32x32xf32>
    %cst_363 = arith.constant dense<0xFF800000> : vector<32xf32>
    %329 = vector.multi_reduction <maximumf>, %328, %cst_363 [1] : vector<32x32xf32> to vector<32xf32>
    %330 = vector.shape_cast %329 : vector<32xf32> to vector<32x1xf32>
    %331 = vector.broadcast %330 : vector<32x1xf32> to vector<32x32xf32>
    %332 = arith.subf %328, %331 : vector<32x32xf32>
    %333 = math.exp %332 : vector<32x32xf32>
    %cst_364 = arith.constant dense<0.000000e+00> : vector<32xf32>
    %334 = vector.multi_reduction <add>, %333, %cst_364 [1] : vector<32x32xf32> to vector<32xf32>
    %335 = vector.shape_cast %334 : vector<32xf32> to vector<32x1xf32>
    %336 = vector.broadcast %335 : vector<32x1xf32> to vector<32x32xf32>
    %337 = arith.divf %333, %336 : vector<32x32xf32>
    %338 = vector.broadcast %324 : vector<1x16xf32> to vector<32x16xf32>
    %339 = arith.mulf %318, %338 : vector<32x16xf32>
    %cst_365 = arith.constant dense<0.000000e+00> : vector<32x16xf32>
    %340 = tpu.matmul %337, %339, %cst_365 {dimension_numbers = #tpu.dot_dimension_numbers<[1], [0], [0], [1], [0, 0, 1, 1], [], []>} : vector<32x32xf32>, vector<32x16xf32>, vector<32x16xf32> -> vector<32x16xf32>
    %341 = arith.addf %322, %340 : vector<32x16xf32>
    %c1_366 = arith.constant 1 : index
    %c0_367 = arith.constant 0 : index
    %c0_368 = arith.constant 0 : index
    %342 = vector.load %arg5[%c1_366, %c0_367, %c0_368] : memref<4x1x16xf32, #tpu.memory_space<vmem>>, vector<1x1x16xf32>
    %343 = vector.shape_cast %342 : vector<1x1x16xf32> to vector<1x16xf32>
    %344 = vector.broadcast %343 : vector<1x16xf32> to vector<32x16xf32>
    %345 = arith.mulf %320, %344 : vector<32x16xf32>
    %cst_369 = arith.constant dense<0.000000e+00> : vector<32x32xf32>
    %346 = tpu.matmul %345, %311, %cst_369 {dimension_numbers = #tpu.dot_dimension_numbers<[1], [1], [0], [0], [0, 0, 1, 0], [], []>} : vector<32x16xf32>, vector<32x16xf32>, vector<32x32xf32> -> vector<32x32xf32>
    %347 = arith.addf %346, %321 : vector<32x32xf32>
    %cst_370 = arith.constant dense<0xFF800000> : vector<32xf32>
    %348 = vector.multi_reduction <maximumf>, %347, %cst_370 [1] : vector<32x32xf32> to vector<32xf32>
    %349 = vector.shape_cast %348 : vector<32xf32> to vector<32x1xf32>
    %350 = vector.broadcast %349 : vector<32x1xf32> to vector<32x32xf32>
    %351 = arith.subf %347, %350 : vector<32x32xf32>
    %352 = math.exp %351 : vector<32x32xf32>
    %cst_371 = arith.constant dense<0.000000e+00> : vector<32xf32>
    %353 = vector.multi_reduction <add>, %352, %cst_371 [1] : vector<32x32xf32> to vector<32xf32>
    %354 = vector.shape_cast %353 : vector<32xf32> to vector<32x1xf32>
    %355 = vector.broadcast %354 : vector<32x1xf32> to vector<32x32xf32>
    %356 = arith.divf %352, %355 : vector<32x32xf32>
    %357 = vector.broadcast %343 : vector<1x16xf32> to vector<32x16xf32>
    %358 = arith.mulf %318, %357 : vector<32x16xf32>
    %cst_372 = arith.constant dense<0.000000e+00> : vector<32x16xf32>
    %359 = tpu.matmul %356, %358, %cst_372 {dimension_numbers = #tpu.dot_dimension_numbers<[1], [0], [0], [1], [0, 0, 1, 1], [], []>} : vector<32x32xf32>, vector<32x16xf32>, vector<32x16xf32> -> vector<32x16xf32>
    %360 = arith.addf %341, %359 : vector<32x16xf32>
    %c2_373 = arith.constant 2 : index
    %c0_374 = arith.constant 0 : index
    %c0_375 = arith.constant 0 : index
    %361 = vector.load %arg5[%c2_373, %c0_374, %c0_375] : memref<4x1x16xf32, #tpu.memory_space<vmem>>, vector<1x1x16xf32>
    %362 = vector.shape_cast %361 : vector<1x1x16xf32> to vector<1x16xf32>
    %363 = vector.broadcast %362 : vector<1x16xf32> to vector<32x16xf32>
    %364 = arith.mulf %320, %363 : vector<32x16xf32>
    %cst_376 = arith.constant dense<0.000000e+00> : vector<32x32xf32>
    %365 = tpu.matmul %364, %311, %cst_376 {dimension_numbers = #tpu.dot_dimension_numbers<[1], [1], [0], [0], [0, 0, 1, 0], [], []>} : vector<32x16xf32>, vector<32x16xf32>, vector<32x32xf32> -> vector<32x32xf32>
    %366 = arith.addf %365, %321 : vector<32x32xf32>
    %cst_377 = arith.constant dense<0xFF800000> : vector<32xf32>
    %367 = vector.multi_reduction <maximumf>, %366, %cst_377 [1] : vector<32x32xf32> to vector<32xf32>
    %368 = vector.shape_cast %367 : vector<32xf32> to vector<32x1xf32>
    %369 = vector.broadcast %368 : vector<32x1xf32> to vector<32x32xf32>
    %370 = arith.subf %366, %369 : vector<32x32xf32>
    %371 = math.exp %370 : vector<32x32xf32>
    %cst_378 = arith.constant dense<0.000000e+00> : vector<32xf32>
    %372 = vector.multi_reduction <add>, %371, %cst_378 [1] : vector<32x32xf32> to vector<32xf32>
    %373 = vector.shape_cast %372 : vector<32xf32> to vector<32x1xf32>
    %374 = vector.broadcast %373 : vector<32x1xf32> to vector<32x32xf32>
    %375 = arith.divf %371, %374 : vector<32x32xf32>
    %376 = vector.broadcast %362 : vector<1x16xf32> to vector<32x16xf32>
    %377 = arith.mulf %318, %376 : vector<32x16xf32>
    %cst_379 = arith.constant dense<0.000000e+00> : vector<32x16xf32>
    %378 = tpu.matmul %375, %377, %cst_379 {dimension_numbers = #tpu.dot_dimension_numbers<[1], [0], [0], [1], [0, 0, 1, 1], [], []>} : vector<32x32xf32>, vector<32x16xf32>, vector<32x16xf32> -> vector<32x16xf32>
    %379 = arith.addf %360, %378 : vector<32x16xf32>
    %c3_380 = arith.constant 3 : index
    %c0_381 = arith.constant 0 : index
    %c0_382 = arith.constant 0 : index
    %380 = vector.load %arg5[%c3_380, %c0_381, %c0_382] : memref<4x1x16xf32, #tpu.memory_space<vmem>>, vector<1x1x16xf32>
    %381 = vector.shape_cast %380 : vector<1x1x16xf32> to vector<1x16xf32>
    %382 = vector.broadcast %381 : vector<1x16xf32> to vector<32x16xf32>
    %383 = arith.mulf %320, %382 : vector<32x16xf32>
    %cst_383 = arith.constant dense<0.000000e+00> : vector<32x32xf32>
    %384 = tpu.matmul %383, %311, %cst_383 {dimension_numbers = #tpu.dot_dimension_numbers<[1], [1], [0], [0], [0, 0, 1, 0], [], []>} : vector<32x16xf32>, vector<32x16xf32>, vector<32x32xf32> -> vector<32x32xf32>
    %385 = arith.addf %384, %321 : vector<32x32xf32>
    %cst_384 = arith.constant dense<0xFF800000> : vector<32xf32>
    %386 = vector.multi_reduction <maximumf>, %385, %cst_384 [1] : vector<32x32xf32> to vector<32xf32>
    %387 = vector.shape_cast %386 : vector<32xf32> to vector<32x1xf32>
    %388 = vector.broadcast %387 : vector<32x1xf32> to vector<32x32xf32>
    %389 = arith.subf %385, %388 : vector<32x32xf32>
    %390 = math.exp %389 : vector<32x32xf32>
    %cst_385 = arith.constant dense<0.000000e+00> : vector<32xf32>
    %391 = vector.multi_reduction <add>, %390, %cst_385 [1] : vector<32x32xf32> to vector<32xf32>
    %392 = vector.shape_cast %391 : vector<32xf32> to vector<32x1xf32>
    %393 = vector.broadcast %392 : vector<32x1xf32> to vector<32x32xf32>
    %394 = arith.divf %390, %393 : vector<32x32xf32>
    %395 = vector.broadcast %381 : vector<1x16xf32> to vector<32x16xf32>
    %396 = arith.mulf %318, %395 : vector<32x16xf32>
    %cst_386 = arith.constant dense<0.000000e+00> : vector<32x16xf32>
    %397 = tpu.matmul %394, %396, %cst_386 {dimension_numbers = #tpu.dot_dimension_numbers<[1], [0], [0], [1], [0, 0, 1, 1], [], []>} : vector<32x32xf32>, vector<32x16xf32>, vector<32x16xf32> -> vector<32x16xf32>
    %398 = arith.addf %379, %397 : vector<32x16xf32>
    %c3_387 = arith.constant 3 : index
    %c0_388 = arith.constant 0 : index
    %c0_389 = arith.constant 0 : index
    %399 = vector.load %arg16[%c3_387, %c0_388, %c0_389] : memref<4x16x16xf32, #tpu.memory_space<vmem>>, vector<1x16x16xf32>
    %400 = vector.shape_cast %399 : vector<1x16x16xf32> to vector<16x16xf32>
    %cst_390 = arith.constant dense<0.000000e+00> : vector<32x16xf32>
    %401 = tpu.matmul %398, %400, %cst_390 {dimension_numbers = #tpu.dot_dimension_numbers<[1], [0], [0], [1], [0, 0, 1, 1], [], []>} : vector<32x16xf32>, vector<16x16xf32>, vector<32x16xf32> -> vector<32x16xf32>
    %c3_391 = arith.constant 3 : index
    %c0_392 = arith.constant 0 : index
    %c0_393 = arith.constant 0 : index
    %402 = vector.load %arg17[%c3_391, %c0_392, %c0_393] : memref<4x1x16xf32, #tpu.memory_space<vmem>>, vector<1x1x16xf32>
    %403 = vector.shape_cast %402 : vector<1x1x16xf32> to vector<1x16xf32>
    %404 = vector.broadcast %403 : vector<1x16xf32> to vector<32x16xf32>
    %405 = arith.addf %401, %404 : vector<32x16xf32>
    %406 = arith.addf %398, %405 : vector<32x16xf32>
    %c0_394 = arith.constant 0 : index
    %c0_395 = arith.constant 0 : index
    %c0_396 = arith.constant 0 : index
    %407 = vector.load %arg22[%c0_394, %c0_395, %c0_396] : memref<4x1x16xf32, #tpu.memory_space<vmem>>, vector<1x1x16xf32>
    %408 = vector.shape_cast %407 : vector<1x1x16xf32> to vector<1x16xf32>
    %c1_397 = arith.constant 1 : index
    %c0_398 = arith.constant 0 : index
    %c0_399 = arith.constant 0 : index
    %409 = vector.load %arg22[%c1_397, %c0_398, %c0_399] : memref<4x1x16xf32, #tpu.memory_space<vmem>>, vector<1x1x16xf32>
    %410 = vector.shape_cast %409 : vector<1x1x16xf32> to vector<1x16xf32>
    %cst_400 = arith.constant dense<0.000000e+00> : vector<32xf32>
    %411 = vector.multi_reduction <add>, %406, %cst_400 [1] : vector<32x16xf32> to vector<32xf32>
    %412 = vector.shape_cast %411 : vector<32xf32> to vector<32x1xf32>
    %cst_401 = arith.constant 1.600000e+01 : f32
    %413 = vector.broadcast %cst_401 : f32 to vector<32x1xf32>
    %414 = arith.divf %412, %413 : vector<32x1xf32>
    %415 = vector.broadcast %414 : vector<32x1xf32> to vector<32x16xf32>
    %416 = arith.subf %406, %415 : vector<32x16xf32>
    %417 = arith.mulf %416, %416 : vector<32x16xf32>
    %cst_402 = arith.constant dense<0.000000e+00> : vector<32xf32>
    %418 = vector.multi_reduction <add>, %417, %cst_402 [1] : vector<32x16xf32> to vector<32xf32>
    %419 = vector.shape_cast %418 : vector<32xf32> to vector<32x1xf32>
    %cst_403 = arith.constant 1.600000e+01 : f32
    %420 = vector.broadcast %cst_403 : f32 to vector<32x1xf32>
    %421 = arith.divf %419, %420 : vector<32x1xf32>
    %cst_404 = arith.constant 9.99999996E-13 : f32
    %422 = vector.broadcast %cst_404 : f32 to vector<32x1xf32>
    %423 = arith.addf %421, %422 : vector<32x1xf32>
    %424 = math.rsqrt %423 : vector<32x1xf32>
    %425 = vector.broadcast %424 : vector<32x1xf32> to vector<32x16xf32>
    %426 = arith.mulf %416, %425 : vector<32x16xf32>
    %427 = vector.broadcast %408 : vector<1x16xf32> to vector<32x16xf32>
    %428 = arith.mulf %427, %426 : vector<32x16xf32>
    %429 = vector.broadcast %410 : vector<1x16xf32> to vector<32x16xf32>
    %430 = arith.addf %428, %429 : vector<32x16xf32>
    %c0_405 = arith.constant 0 : index
    %c0_406 = arith.constant 0 : index
    %431 = vector.load %arg18[%c0_405, %c0_406] : memref<16x32xf32, #tpu.memory_space<vmem>>, vector<16x32xf32>
    %cst_407 = arith.constant dense<0.000000e+00> : vector<32x32xf32>
    %432 = tpu.matmul %430, %431, %cst_407 {dimension_numbers = #tpu.dot_dimension_numbers<[1], [0], [0], [1], [0, 0, 1, 1], [], []>} : vector<32x16xf32>, vector<16x32xf32>, vector<32x32xf32> -> vector<32x32xf32>
    %c0_408 = arith.constant 0 : index
    %c0_409 = arith.constant 0 : index
    %433 = vector.load %arg19[%c0_408, %c0_409] : memref<1x32xf32, #tpu.memory_space<vmem>>, vector<1x32xf32>
    %434 = vector.broadcast %433 : vector<1x32xf32> to vector<32x32xf32>
    %435 = arith.addf %432, %434 : vector<32x32xf32>
    %cst_410 = arith.constant 5.000000e-01 : f32
    %436 = vector.broadcast %cst_410 : f32 to vector<32x32xf32>
    %437 = arith.mulf %436, %435 : vector<32x32xf32>
    %cst_411 = arith.constant 0.707106769 : f32
    %438 = vector.broadcast %cst_411 : f32 to vector<32x32xf32>
    %439 = arith.mulf %435, %438 : vector<32x32xf32>
    %cst_412 = arith.constant 0.000000e+00 : f32
    %440 = vector.broadcast %cst_412 : f32 to vector<32x32xf32>
    %441 = arith.cmpf oge, %439, %440 : vector<32x32xf32>
    %cst_413 = arith.constant 1.000000e+00 : f32
    %cst_414 = arith.constant -1.000000e+00 : f32
    %442 = vector.broadcast %cst_413 : f32 to vector<32x32xf32>
    %443 = vector.broadcast %cst_414 : f32 to vector<32x32xf32>
    %444 = arith.select %441, %442, %443 : vector<32x32xi1>, vector<32x32xf32>
    %445 = math.absf %439 : vector<32x32xf32>
    %cst_415 = arith.constant 0.327591091 : f32
    %446 = vector.broadcast %cst_415 : f32 to vector<32x32xf32>
    %447 = arith.mulf %446, %445 : vector<32x32xf32>
    %cst_416 = arith.constant 1.000000e+00 : f32
    %448 = vector.broadcast %cst_416 : f32 to vector<32x32xf32>
    %449 = arith.addf %448, %447 : vector<32x32xf32>
    %cst_417 = arith.constant 1.000000e+00 : f32
    %450 = vector.broadcast %cst_417 : f32 to vector<32x32xf32>
    %451 = arith.divf %450, %449 : vector<32x32xf32>
    %cst_418 = arith.constant 1.06140542 : f32
    %452 = vector.broadcast %cst_418 : f32 to vector<32x32xf32>
    %453 = arith.mulf %452, %451 : vector<32x32xf32>
    %cst_419 = arith.constant -1.45315206 : f32
    %454 = vector.broadcast %cst_419 : f32 to vector<32x32xf32>
    %455 = arith.addf %453, %454 : vector<32x32xf32>
    %456 = arith.mulf %455, %451 : vector<32x32xf32>
    %cst_420 = arith.constant 1.42141378 : f32
    %457 = vector.broadcast %cst_420 : f32 to vector<32x32xf32>
    %458 = arith.addf %456, %457 : vector<32x32xf32>
    %459 = arith.mulf %458, %451 : vector<32x32xf32>
    %cst_421 = arith.constant -0.284496725 : f32
    %460 = vector.broadcast %cst_421 : f32 to vector<32x32xf32>
    %461 = arith.addf %459, %460 : vector<32x32xf32>
    %462 = arith.mulf %461, %451 : vector<32x32xf32>
    %cst_422 = arith.constant 0.254829586 : f32
    %463 = vector.broadcast %cst_422 : f32 to vector<32x32xf32>
    %464 = arith.addf %462, %463 : vector<32x32xf32>
    %465 = arith.mulf %464, %451 : vector<32x32xf32>
    %cst_423 = arith.constant 0.000000e+00 : f32
    %466 = vector.broadcast %cst_423 : f32 to vector<32x32xf32>
    %467 = arith.subf %466, %445 : vector<32x32xf32>
    %468 = arith.mulf %467, %445 : vector<32x32xf32>
    %469 = math.exp %468 : vector<32x32xf32>
    %470 = arith.mulf %465, %469 : vector<32x32xf32>
    %cst_424 = arith.constant 1.000000e+00 : f32
    %471 = vector.broadcast %cst_424 : f32 to vector<32x32xf32>
    %472 = arith.subf %471, %470 : vector<32x32xf32>
    %473 = arith.mulf %444, %472 : vector<32x32xf32>
    %cst_425 = arith.constant 1.000000e+00 : f32
    %474 = vector.broadcast %cst_425 : f32 to vector<32x32xf32>
    %475 = arith.addf %474, %473 : vector<32x32xf32>
    %476 = arith.mulf %437, %475 : vector<32x32xf32>
    %c0_426 = arith.constant 0 : index
    %c0_427 = arith.constant 0 : index
    %477 = vector.load %arg20[%c0_426, %c0_427] : memref<32x16xf32, #tpu.memory_space<vmem>>, vector<32x16xf32>
    %cst_428 = arith.constant dense<0.000000e+00> : vector<32x16xf32>
    %478 = tpu.matmul %476, %477, %cst_428 {dimension_numbers = #tpu.dot_dimension_numbers<[1], [0], [0], [1], [0, 0, 1, 1], [], []>} : vector<32x32xf32>, vector<32x16xf32>, vector<32x16xf32> -> vector<32x16xf32>
    %c0_429 = arith.constant 0 : index
    %c0_430 = arith.constant 0 : index
    %479 = vector.load %arg21[%c0_429, %c0_430] : memref<1x16xf32, #tpu.memory_space<vmem>>, vector<1x16xf32>
    %480 = vector.broadcast %479 : vector<1x16xf32> to vector<32x16xf32>
    %481 = arith.addf %478, %480 : vector<32x16xf32>
    %482 = arith.addf %430, %481 : vector<32x16xf32>
    %c2_431 = arith.constant 2 : index
    %c0_432 = arith.constant 0 : index
    %c0_433 = arith.constant 0 : index
    %483 = vector.load %arg22[%c2_431, %c0_432, %c0_433] : memref<4x1x16xf32, #tpu.memory_space<vmem>>, vector<1x1x16xf32>
    %484 = vector.shape_cast %483 : vector<1x1x16xf32> to vector<1x16xf32>
    %c3_434 = arith.constant 3 : index
    %c0_435 = arith.constant 0 : index
    %c0_436 = arith.constant 0 : index
    %485 = vector.load %arg22[%c3_434, %c0_435, %c0_436] : memref<4x1x16xf32, #tpu.memory_space<vmem>>, vector<1x1x16xf32>
    %486 = vector.shape_cast %485 : vector<1x1x16xf32> to vector<1x16xf32>
    %cst_437 = arith.constant dense<0.000000e+00> : vector<32xf32>
    %487 = vector.multi_reduction <add>, %482, %cst_437 [1] : vector<32x16xf32> to vector<32xf32>
    %488 = vector.shape_cast %487 : vector<32xf32> to vector<32x1xf32>
    %cst_438 = arith.constant 1.600000e+01 : f32
    %489 = vector.broadcast %cst_438 : f32 to vector<32x1xf32>
    %490 = arith.divf %488, %489 : vector<32x1xf32>
    %491 = vector.broadcast %490 : vector<32x1xf32> to vector<32x16xf32>
    %492 = arith.subf %482, %491 : vector<32x16xf32>
    %493 = arith.mulf %492, %492 : vector<32x16xf32>
    %cst_439 = arith.constant dense<0.000000e+00> : vector<32xf32>
    %494 = vector.multi_reduction <add>, %493, %cst_439 [1] : vector<32x16xf32> to vector<32xf32>
    %495 = vector.shape_cast %494 : vector<32xf32> to vector<32x1xf32>
    %cst_440 = arith.constant 1.600000e+01 : f32
    %496 = vector.broadcast %cst_440 : f32 to vector<32x1xf32>
    %497 = arith.divf %495, %496 : vector<32x1xf32>
    %cst_441 = arith.constant 9.99999996E-13 : f32
    %498 = vector.broadcast %cst_441 : f32 to vector<32x1xf32>
    %499 = arith.addf %497, %498 : vector<32x1xf32>
    %500 = math.rsqrt %499 : vector<32x1xf32>
    %501 = vector.broadcast %500 : vector<32x1xf32> to vector<32x16xf32>
    %502 = arith.mulf %492, %501 : vector<32x16xf32>
    %503 = vector.broadcast %484 : vector<1x16xf32> to vector<32x16xf32>
    %504 = arith.mulf %503, %502 : vector<32x16xf32>
    %505 = vector.broadcast %486 : vector<1x16xf32> to vector<32x16xf32>
    %506 = arith.addf %504, %505 : vector<32x16xf32>
    %c0_442 = arith.constant 0 : index
    %c0_443 = arith.constant 0 : index
    %507 = vector.load %arg23[%c0_442, %c0_443] : memref<32x16xf32, #tpu.memory_space<vmem>>, vector<32x16xf32>
    tpu.vector_store %arg23[%c0_442, %c0_443], %506 {strides = array<i32>} : memref<32x16xf32, #tpu.memory_space<vmem>>, vector<32x16xf32>,
    return
  }
}

</mosaic_0001>

<bundles_post_ra>
// kernel: contrastsense_encoder_forward.1
= control target key start
LH: loop header
LB: loop body
LE: loop exit
PB: predicated region body
PF: predicated region fallthrough
CT: control target
= control target key end

     0   :  { %s8309_s0 = inlined_call_operand.vmem [shape: f32[32,6], index: 0, kind: input, shape index: {}]   ;;  %s8310_s1 = inlined_call_operand.vmem [shape: f32[40,32], index: 1, kind: input, shape index: {}]   ;;  %s8311_s2 = inlined_call_operand.vmem [shape: f32[5,40,40], index: 2, kind: input, shape index: {}]   ;;  %s8312_s3 = inlined_call_operand.vmem [shape: f32[32,40], index: 3, kind: input, shape index: {}]   ;;  %s8313_s4 = inlined_call_operand.vmem [shape: f32[32,32], index: 4, kind: input, shape index: {}]   ;;  %s8314_s5 = inlined_call_operand.vmem [shape: f32[4,1,16], index: 5, kind: input, shape index: {}]   ;;  %s8315_s6 = inlined_call_operand.vmem [shape: f32[5,6,96], index: 6, kind: input, shape index: {}]   ;;  %s8316_s7 = inlined_call_operand.vmem [shape: f32[1,96], index: 7, kind: input, shape index: {}]   ;;  %s8317_s8 = inlined_call_operand.hbm [shape: f32[2,5,96,96], index: 8, kind: input, shape index: {}]   ;;  %s8318_s9 = inlined_call_operand.vmem [shape: f32[2,1,96], index: 9, kind: input, shape index: {}]   ;;  %s8319_s10 = inlined_call_operand.vmem [shape: f32[5,96,32], index: 10, kind: input, shape index: {}]   ;;  %s8320_s11 = inlined_call_operand.hbm [shape: f32[1,32], index: 11, kind: input, shape index: {}]   ;;  %s8321_s12 = inlined_call_operand.vmem [shape: f32[2,5,32,32], index: 12, kind: input, shape index: {}]   ;;  %s8322_s13 = inlined_call_operand.hbm [shape: f32[2,1,32], index: 13, kind: input, shape index: {}]   ;;  %s8323_s14 = inlined_call_operand.vmem [shape: f32[5,32,16], index: 14, kind: input, shape index: {}]   ;;  %s8324_s15 = inlined_call_operand.hbm [shape: f32[1,16], index: 15, kind: input, shape index: {}]   ;;  %s8325_s16 = inlined_call_operand.vmem [shape: f32[4,16,16], index: 16, kind: input, shape index: {}]   ;;  %s8326_s17 = inlined_call_operand.hbm [shape: f32[4,1,16], index: 17, kind: input, shape index: {}]   ;;  %s8327_s18 = inlined_call_operand.hbm [shape: f32[16,32], index: 18, kind: input, shape index: {}]   ;;  %s8328_s19 = inlined_call_operand.hbm [shape: f32[1,32], index: 19, kind: input, shape index: {}]   ;;  %s8329_s20 = inlined_call_operand.vmem [shape: f32[32,16], index: 20, kind: input, shape index: {}]   ;;  %s8330_s21 = inlined_call_operand.hbm [shape: f32[1,16], index: 21, kind: input, shape index: {}]   ;;  %s8331_s22 = inlined_call_operand.hbm [shape: f32[4,1,16], index: 22, kind: input, shape index: {}]   ;;  %s8332_s23 = inlined_call_operand.hbm [shape: f32[32,16], index: 23, kind: output, shape index: {}]  }
   0x1   :  { %8347 = sst [smem:[#allocation27_spill]] %s8309_s0 }
   0x2   :  { %8348 = sst [smem:[#allocation28_spill]] %s8310_s1 }
   0x3   :  { %8349 = sst [smem:[#allocation29_spill]] %s8311_s2 }
   0x4   :  { %8350 = sst [smem:[#allocation30_spill]] %s8312_s3 }
   0x5   :  { %8351 = sst [smem:[#allocation31_spill]] %s8313_s4 }
   0x6   :  { %8352 = sst [smem:[#allocation32_spill]] %s8314_s5 }
   0x7   :  { %8353 = sst [smem:[#allocation33_spill]] %s8315_s6 }
   0x8   :  { %8354 = sst [smem:[#allocation34_spill]] %s8316_s7 }
   0x9   :  { %28 = vsyncpa [#allocation3], 0 }
   0xa   :  { %29 = vsyncpa [#allocation6], 0 }
   0xb   :  { %30 = vsyncpa [#allocation9], 0 }
   0xc   :  { %31 = vsyncpa [#allocation12], 0 }
   0xd   :  { %32 = vsyncpa [#allocation15], 0  ;;  %s72_s24 = sshll.u32 %s8320_s11, 4  ;;  %s73_s24 = int_to_ptr.hbm [resolvable:$true] %s72_s24 }
   0xe   :  { %33 = vsyncpa [#allocation4], 0  ;;  %s6171_s25 = smov [#allocation5]   ;;  %s100_s2 = sshll.u32 %s8324_s15, 4  ;;  %s101_s2 = int_to_ptr.hbm [resolvable:$true] %s100_s2 }
   0xf   :  { %s74_s5 = sshll.u32 %s6171_s25, 4  ;;  %s6172_s6 = smov [#allocation8]   ;;  %s75_s5 = int_to_ptr.vmem [resolvable:$true] %s74_s5 }
  0x10   :  { %77 = dma.hbm_to_vmem [thread:$0]  %s73_s24, 16, %s75_s5, [#allocation6]  }
  0x11   :  { %s102_s27 = sshll.u32 %s6172_s6, 4  ;;  %s125_s29 = sshll.u32 %s8327_s18, 4  ;;  %s103_s27 = int_to_ptr.vmem [resolvable:$true] %s102_s27  ;;  %s126_s29 = int_to_ptr.hbm [resolvable:$true] %s125_s29 }
  0x12   :  { %105 = dma.hbm_to_vmem [thread:$0]  %s101_s2, 16, %s103_s27, [#allocation9]  }
  0x13   :  { %s6173_s11 = smov [#allocation11]   ;;  %s152_s30 = sshll.u32 %s8330_s21, 4  ;;  %s153_s30 = int_to_ptr.hbm [resolvable:$true] %s152_s30 }
  0x14   :  { %s127_s3 = sshll.u32 %s6173_s11, 4  ;;  %s6174_s25 = smov 128   ;;  %s128_s3 = int_to_ptr.vmem [resolvable:$true] %s127_s3 }
  0x15   :  { %s6175_s15 = smov 8   ;;  %s6176_s24 = smov [#allocation14]  }
  0x16   :  { %133 = dma.hbm_to_vmem [thread:$0]  %s126_s29, 256, %s128_s3, [#allocation12], %s6174_s25, %s6174_s25, %s6175_s15  }
  0x17   :  { %s154_s5 = sshll.u32 %s6176_s24, 4  ;;  %s54_s18 = sshll.u32 %s8317_s8, 4  ;;  %s155_s5 = int_to_ptr.vmem [resolvable:$true] %s154_s5  ;;  %s55_s18 = int_to_ptr.hbm [resolvable:$true] %s54_s18 }
  0x18   :  { %157 = dma.hbm_to_vmem [thread:$0]  %s153_s30, 16, %s155_s5, [#allocation15]  }
  0x19   :  { %s84_s21 = sshll.u32 %s8322_s13, 4  ;;  %s6177_s27 = smov [#allocation2]   ;;  %s85_s21 = int_to_ptr.hbm [resolvable:$true] %s84_s21 }
  0x1a   :  { %s56_s7 = sshll.u32 %s6177_s27, 4  ;;  %s6178_s28 = smov [#allocation7]   ;;  %s57_s7 = int_to_ptr.vmem [resolvable:$true] %s56_s7 }
  0x1b   :  { %62 = dma.hbm_to_vmem [thread:$0]  %s55_s18, 15360, %s57_s7, [#allocation3], %s6174_s25, %s6174_s25, %s6175_s15  }
  0x1c   :  { %s86_s29 = sshll.u32 %s6178_s28, 4  ;;  %s6179_s11 = smov 16   ;;  %s87_s29 = int_to_ptr.vmem [resolvable:$true] %s86_s29 }
  0x1d   :  { %s6180_s8 = smov 1   ;;  %s112_s4 = sshll.u32 %s8326_s17, 4  ;;  %s113_s4 = int_to_ptr.hbm [resolvable:$true] %s112_s4 }
  0x1e   :  { %92 = dma.hbm_to_vmem [thread:$0]  %s85_s21, 32, %s87_s29, [#allocation6], %s6179_s11, %s6179_s11, %s6180_s8  }
  0x1f   :  { %s6181_s13 = smov [#allocation10]   ;;  %s139_s1 = sshll.u32 %s8328_s19, 4  ;;  %s140_s1 = int_to_ptr.hbm [resolvable:$true] %s139_s1 }
  0x20   :  { %s114_s30 = sshll.u32 %s6181_s13, 4  ;;  %s6182_s26 = smov [#allocation13]   ;;  %s115_s30 = int_to_ptr.vmem [resolvable:$true] %s114_s30 }
  0x21   :  { %120 = dma.hbm_to_vmem [thread:$0]  %s113_s4, 64, %s115_s30, [#allocation9], %s6179_s11, %s6179_s11, %s6180_s8  }
  0x22   :  { %s141_s18 = sshll.u32 %s6182_s26, 4  ;;  %s162_s21 = sshll.u32 %s8331_s22, 4  ;;  %s142_s18 = int_to_ptr.vmem [resolvable:$true] %s141_s18  ;;  %s163_s21 = int_to_ptr.hbm [resolvable:$true] %s162_s21 }
  0x23   :  { %144 = dma.hbm_to_vmem [thread:$0]  %s140_s1, 16, %s142_s18, [#allocation12]  }
  0x24   :  { %s6183_s17 = smov [#allocation16]  }
  0x25   :  { %s164_s27 = sshll.u32 %s6183_s17, 4  ;;  %s165_s27 = int_to_ptr.vmem [resolvable:$true] %s164_s27 }
  0x26   :  { %170 = dma.hbm_to_vmem [thread:$0]  %s163_s21, 64, %s165_s27, [#allocation15], %s6179_s11, %s6179_s11, %s6180_s8  }
  0x27   :  { %6159 = dma.done.wait [#allocation3], 15360  }
  0x28   :  { %6160 = vsyncadd [#allocation3], 4294951936 }
  0x29   :  { %6161 = dma.done.wait [#allocation6], 48  }
  0x2a   :  { %6162 = vsyncadd [#allocation6], 4294967248 }
  0x2b   :  { %6163 = dma.done.wait [#allocation9], 80  }
  0x2c   :  { %6164 = vsyncadd [#allocation9], 4294967216 }
  0x2d   :  { %6165 = dma.done.wait [#allocation12], 272  }
  0x2e   :  { %6166 = vsyncadd [#allocation12], 4294967024 }
  0x2f   :  { %6167 = dma.done.wait [#allocation15], 80  }
  0x30   :  { %6168 = vsyncadd [#allocation15], 4294967216  ;;  %s8355_s22 = sld [smem:[#allocation27_spill]]  ;;  %vm216_vm0 = vcmask 261120   ;;  %vm270_vm1 = vcmask 326656   ;;  %vm390_vm2 = vcmask 1045504  }
  0x31   :  { %s8356_s30 = sld [smem:[#allocation28_spill]]  ;;  %vm374_vm3 = vcmask 48128   ;;  %vm909_vm4 = vcmask 785408   ;;  %vm3693_vm5 = vcmask 130048  }
  0x32   :  { %s8357_s19 = sld [smem:[#allocation29_spill]] }
  0x33   :  { %s8360_s4 = sld [smem:[#allocation33_spill]] }
  0x34   :  { %s8361_s17 = sld [smem:[#allocation34_spill]] }
  0x35   :  { %s8370_s3 = sld [smem:[#allocation30_spill]] }
  0x36   :  { %v215_v0 = vld [vmem:[%s8355_s22 + $0x18] sm:$0xff]  ;;  %v214_v1 = vld [vmem:[%s8355_s22 + $0x10] sm:$0xff]  ;;  %v213_v2 = vld [vmem:[%s8355_s22 + $0x8] sm:$0xff]  ;;  %s8371_s7 = sld [smem:[#allocation32_spill]] }
  0x37   :  { %244 = vmatpush.msra.mxu0 %v215_v0  ;;  %v212_v3 = vld [vmem:[%s8355_s22] sm:$0xff]  ;;  %v208_v5 = vld [vmem:[%s8356_s30 + $0x8] sm:$0xff]  ;;  %v209_v6 = vld [vmem:[%s8356_s30 + $0x10] sm:$0xff] }
  0x38   :  { %v207_v4 = vld [vmem:[%s8356_s30] sm:$0xff]  ;;  %v210_v7 = vld [vmem:[%s8356_s30 + $0x18] sm:$0xff]  ;;  %v6375_v14 = vld [vmem:[%s8357_s19 + $0x28] sm:$0xff] }
  0x39   :  { %245 = vmatpush.msra.mxu0 %v214_v1  ;;  %v211_v8 = vld [vmem:[%s8356_s30 + $0x20] sm:$0xff]  ;;  %v6387_v16 = vld [vmem:[%s8357_s19 + $0x50] sm:$0xff]  ;;  %v6401_v18 = vld [vmem:[%s8357_s19 + $0x8] sm:$0xff] }
  0x3a   :  { %v6382_v15 = vld [vmem:[%s8357_s19] sm:$0xff]  ;;  %v6396_v17 = vld [vmem:[%s8357_s19 + $0x30] sm:$0xff]  ;;  %v6406_v19 = vld [vmem:[%s8357_s19 + $0x58] sm:$0xff] }
  0x3b   :  { %246 = vmatpush.msra.mxu0 %v213_v2  ;;  %v6417_v20 = vld [vmem:[%s8357_s19 + $0x38] sm:$0xff]  ;;  %v6422_v21 = vld [vmem:[%s8357_s19 + $0x10] sm:$0xff]  ;;  %v6427_v22 = vld [vmem:[%s8357_s19 + $0x60] sm:$0xff] }
  0x3c   :  { %v6438_v23 = vld [vmem:[%s8357_s19 + $0x40] sm:$0xff]  ;;  %v6443_v24 = vld [vmem:[%s8357_s19 + $0x18] sm:$0xff]  ;;  %v6448_v25 = vld [vmem:[%s8357_s19 + $0x68] sm:$0xff] }
  0x3d   :  { %247 = vmatpush.msra.mxu0 %v212_v3  ;;  %v6459_v26 = vld [vmem:[%s8357_s19 + $0x48] sm:$0xff]  ;;  %v6464_v27 = vld [vmem:[%s8357_s19 + $0x20] sm:$0xff]  ;;  %v6469_v28 = vld [vmem:[%s8357_s19 + $0x70] sm:$0xff] }
  0x3e   :  { %5158 = vmatmul.msk.f32.vlgmr.msra.gmra.mxu0 %vm216_vm0, %v207_v4  ;;  %v6480_v29 = vld [vmem:[%s8357_s19 + $0x78] sm:$0xff]  ;;  %v6485_v30 = vld [vmem:[%s8357_s19 + $0xa0] sm:$0xff]  ;;  %v6499_v32 = vld [vmem:[%s8357_s19 + $0xa8] sm:$0xff] }
  0x3f   :  { %8358 = vst [vmem:[#allocation24_spill] sm:$0xff] %v6485_v30  ;;  %v6494_v31 = vld [vmem:[%s8357_s19 + $0x80] sm:$0xff]  ;;  %v6508_v33 = vld [vmem:[%s8357_s19 + $0x88] sm:$0xff]  ;;  %v6513_v34 = vld [vmem:[%s8357_s19 + $0xb0] sm:$0xff] }
  0x40   :  { %8359 = vst [vmem:[#allocation25_spill] sm:$0xff] %v6499_v32  ;;  %v6522_v35 = vld [vmem:[%s8357_s19 + $0x90] sm:$0xff]  ;;  %v6527_v36 = vld [vmem:[%s8357_s19 + $0xb8] sm:$0xff]  ;;  %v6541_v38 = vld [vmem:[%s8357_s19 + $0xc0] sm:$0xff] }
  0x41   :  { %v6536_v37 = vld [vmem:[%s8357_s19 + $0x98] sm:$0xff]  ;;  %v5178_v39 = vld [vmem:[%s8360_s4 + $0x8] sm:$0x3f]  ;;  %v318_v41 = vld [vmem:[%s8360_s4] sm:$0x3f] }
  0x42   :  { %5728 = vmatpush.msk.msra.mxu3 %vm390_vm2, %v5178_v39  ;;  %v5201_v44 = vld [vmem:[%s8360_s4 + $0x10] sm:$0x3f]  ;;  %v5218_v52 = vld [vmem:[%s8360_s4 + $0x18] sm:$0x3f]  ;;  %v5235_v55 = vld [vmem:[%s8360_s4 + $0x20] sm:$0x3f] }
  0x44   :  { %5185 = vmatpush.msk.msrb.mxu3 %vm390_vm2, %v318_v41 }
  0x46   :  { %5159 = vmatmul.msk.f32.gmra.mxu0 %vm216_vm0, %v208_v5 }
  0x4e   :  { %5160 = vmatmul.msk.f32.gmra.mxu0 %vm216_vm0, %v209_v6 }
  0x56   :  { %5161 = vmatmul.msk.f32.gmra.mxu0 %vm216_vm0, %v210_v7 }
  0x5e   :  { %5162 = vmatmul.msk.f32.gmra.mxu0 %vm216_vm0, %v211_v8 }
  0xbb   :  { %v249_v9 = vpop.f32.mrf.mxu0 }
  0xc3   :  { %v252_v10 = vpop.f32.mrf.mxu0 }
  0xcb   :  { %v255_v11 = vpop.f32.mrf.mxu0 }
  0xd3   :  { %v258_v12 = vpop.f32.mrf.mxu0 }
  0xdb   :  { %v261_v13 = vpop.f32.mrf.mxu0 }
  0xdc   :  { %297 = vmatpush.msra.mxu1 %v261_v13  ;;  %351 = vmatpush.msra.mxu2 %v261_v13 }
  0xdd   :  { %508 = vmatpush.msrb.mxu0 %v261_v13 }
  0xde   :  { %298 = vmatpush.msra.mxu1 %v258_v12  ;;  %352 = vmatpush.msra.mxu2 %v258_v12 }
  0xdf   :  { %509 = vmatpush.msrb.mxu0 %v258_v12 }
  0xe0   :  { %299 = vmatpush.msra.mxu1 %v255_v11  ;;  %353 = vmatpush.msra.mxu2 %v255_v11 }
  0xe1   :  { %510 = vmatpush.msrb.mxu0 %v255_v11 }
  0xe2   :  { %300 = vmatpush.msra.mxu1 %v252_v10  ;;  %354 = vmatpush.msra.mxu2 %v252_v10 }
  0xe3   :  { %511 = vmatpush.msrb.mxu0 %v252_v10 }
  0xe4   :  { %301 = vmatpush.msra.mxu1 %v249_v9  ;;  %355 = vmatpush.msra.mxu2 %v249_v9 }
  0xe5   :  { %512 = vmatpush.msrb.mxu0 %v249_v9  ;;  %5173 = vmatmul.msk.f32.vlgmr.msra.gmra.mxu2 %vm270_vm1, %v6375_v14 }
  0xe6   :  { %618 = vmatpush.msrb.mxu2 %v261_v13  ;;  %5163 = vmatmul.msk.f32.vlgmr.msra.gmra.mxu1 %vm270_vm1, %v6382_v15 }
  0xe7   :  { %728 = vmatpush.msra.mxu0 %v261_v13  ;;  %5179 = vmatpush.msk.msrb.mxu1 %vm390_vm2, %v5178_v39 }
  0xe8   :  { %5196 = vmatmul.msk.f32.vlgmr.msrb.gmra.mxu0 %vm270_vm1, %v6387_v16  ;;  %619 = vmatpush.msrb.mxu2 %v258_v12 }
  0xe9   :  { %729 = vmatpush.msra.mxu0 %v258_v12  ;;  %5202 = vmatpush.msk.msra.mxu1 %vm390_vm2, %v5201_v44  ;;  %v908_v44 = vld [vmem:[#allocation2 + $0xb8] sm:$0xff] }
  0xea   :  { %620 = vmatpush.msrb.mxu2 %v255_v11 }
  0xeb   :  { %730 = vmatpush.msra.mxu0 %v255_v11 }
  0xec   :  { %621 = vmatpush.msrb.mxu2 %v252_v10 }
  0xed   :  { %731 = vmatpush.msra.mxu0 %v252_v10  ;;  %5174 = vmatmul.msk.f32.gmra.mxu2 %vm270_vm1, %v6396_v17 }
  0xee   :  { %622 = vmatpush.msrb.mxu2 %v249_v9  ;;  %5164 = vmatmul.msk.f32.gmra.mxu1 %vm270_vm1, %v6401_v18 }
  0xef   :  { %732 = vmatpush.msra.mxu0 %v249_v9 }
  0xf0   :  { %5197 = vmatmul.msk.f32.gmra.mxu0 %vm270_vm1, %v6406_v19 }
  0xf1   :  { %929 = vmatpush.msrb.mxu0 %v908_v44 }
  0xf5   :  { %5175 = vmatmul.msk.f32.gmra.mxu2 %vm270_vm1, %v6417_v20 }
  0xf6   :  { %5165 = vmatmul.msk.f32.gmra.mxu1 %vm270_vm1, %v6422_v21 }
  0xf8   :  { %5198 = vmatmul.msk.f32.gmra.mxu0 %vm270_vm1, %v6427_v22 }
  0xfd   :  { %5176 = vmatmul.msk.f32.gmra.mxu2 %vm270_vm1, %v6438_v23 }
  0xfe   :  { %5166 = vmatmul.msk.f32.gmra.mxu1 %vm270_vm1, %v6443_v24 }
 0x100   :  { %5199 = vmatmul.msk.f32.gmra.mxu0 %vm270_vm1, %v6448_v25 }
 0x105   :  { %5177 = vmatmul.msk.f32.gmra.mxu2 %vm270_vm1, %v6459_v26 }
 0x106   :  { %5167 = vmatmul.msk.f32.gmra.mxu1 %vm270_vm1, %v6464_v27 }
 0x108   :  { %5200 = vmatmul.msk.f32.gmra.mxu0 %vm270_vm1, %v6469_v28 }
 0x10d   :  { %5213 = vmatmul.msk.f32.vlgmr.msrb.gmra.mxu2 %vm270_vm1, %v6480_v29 }
 0x110   :  { %5230 = vmatmul.msk.f32.vlgmr.msra.gmra.mxu0 %vm270_vm1, %v6485_v30 }
 0x115   :  { %5214 = vmatmul.msk.f32.gmra.mxu2 %vm270_vm1, %v6494_v31 }
 0x118   :  { %5231 = vmatmul.msk.f32.gmra.mxu0 %vm270_vm1, %v6499_v32 }
 0x11d   :  { %5215 = vmatmul.msk.f32.gmra.mxu2 %vm270_vm1, %v6508_v33 }
 0x120   :  { %5232 = vmatmul.msk.f32.gmra.mxu0 %vm270_vm1, %v6513_v34 }
 0x125   :  { %5216 = vmatmul.msk.f32.gmra.mxu2 %vm270_vm1, %v6522_v35 }
 0x128   :  { %5233 = vmatmul.msk.f32.gmra.mxu0 %vm270_vm1, %v6527_v36 }
 0x12d   :  { %5217 = vmatmul.msk.f32.gmra.mxu2 %vm270_vm1, %v6536_v37 }
 0x130   :  { %5234 = vmatmul.msk.f32.gmra.mxu0 %vm270_vm1, %v6541_v38 }
 0x163   :  { %v303_v49 = vpop.f32.mrf.mxu1 }
 0x165   :  { %v514_v43 = vpop.f32.mrf.mxu0 }
 0x168   :  { %v357_v40 = vpop.f32.mrf.mxu2 }
 0x169   :  { %5180 = vmatmul.msk.f32.vlgmr.msrb.gmra.mxu1 %vm374_vm3, %v357_v40 }
 0x16a   :  { %5236 = vmatpush.msk.msrb.mxu1 %vm390_vm2, %v5235_v55 }
 0x16b   :  { %v306_v53 = vpop.f32.mrf.mxu1 }
 0x16d   :  { %v517_v46 = vpop.f32.mrf.mxu0 }
 0x170   :  { %v360_v42 = vpop.f32.mrf.mxu2 }
 0x171   :  { %5181 = vmatmul.msk.f32.vlgmr.msra.gmra.mxu3 %vm374_vm3, %v360_v42  ;;  %5203 = vmatmul.msk.f32.vlgmr.msra.gmra.mxu1 %vm374_vm3, %v514_v43 }
 0x172   :  { %5219 = vmatpush.msk.msra.mxu3 %vm390_vm2, %v5218_v52  ;;  %v902_v52 = vld [vmem:[#allocation2 + $0x88] sm:$0xff] }
 0x173   :  { %v309_v57 = vpop.f32.mrf.mxu1 }
 0x175   :  { %v520_v48 = vpop.f32.mrf.mxu0 }
 0x178   :  { %v363_v45 = vpop.f32.mrf.mxu2 }
 0x179   :  { %5182 = vmatmul.msk.f32.gmra.mxu3 %vm374_vm3, %v363_v45  ;;  %5204 = vmatmul.msk.f32.gmra.mxu1 %vm374_vm3, %v517_v46  ;;  %v907_v45 = vld [vmem:[#allocation2 + $0xb0] sm:$0xff]  ;;  %v906_v46 = vld [vmem:[#allocation2 + $0xa8] sm:$0xff] }
 0x17a   :  { %930 = vmatpush.msrb.mxu0 %v907_v45 }
 0x17b   :  { %v312_v59 = vpop.f32.mrf.mxu1 }
 0x17c   :  { %931 = vmatpush.msrb.mxu0 %v906_v46 }
 0x17d   :  { %v523_v51 = vpop.f32.mrf.mxu0 }
 0x180   :  { %v366_v47 = vpop.f32.mrf.mxu2 }
 0x181   :  { %5183 = vmatmul.msk.f32.gmra.mxu3 %vm374_vm3, %v366_v47  ;;  %5205 = vmatmul.msk.f32.gmra.mxu1 %vm374_vm3, %v520_v48 }
 0x183   :  { %v315_v61 = vpop.f32.mrf.mxu1 }
 0x185   :  { %v526_v54 = vpop.f32.mrf.mxu0 }
 0x188   :  { %v369_v50 = vpop.f32.mrf.mxu2 }
 0x189   :  { %5184 = vmatmul.msk.f32.gmra.mxu3 %vm374_vm3, %v369_v50  ;;  %5206 = vmatmul.msk.f32.gmra.mxu1 %vm374_vm3, %v523_v51  ;;  %v904_v50 = vld [vmem:[#allocation2 + $0x98] sm:$0xff]  ;;  %v903_v51 = vld [vmem:[#allocation2 + $0x90] sm:$0xff] }
 0x18d   :  { %v734_v56 = vpop.f32.mrf.mxu0 }
 0x190   :  { %v624_v62 = vpop.f32.mrf.mxu2 }
 0x191   :  { %5186 = vmatmul.msk.f32.vlgmr.msrb.gmra.mxu3 %vm374_vm3, %v303_v49  ;;  %5207 = vmatmul.msk.f32.gmra.mxu1 %vm374_vm3, %v526_v54  ;;  %v905_v49 = vld [vmem:[#allocation2 + $0xa0] sm:$0xff] }
 0x192   :  { %932 = vmatpush.msrb.mxu0 %v905_v49  ;;  %v901_v54 = vld [vmem:[#allocation2 + $0x80] sm:$0xff] }
 0x194   :  { %933 = vmatpush.msrb.mxu0 %v904_v50 }
 0x195   :  { %v737_v58 = vpop.f32.mrf.mxu0 }
 0x196   :  { %934 = vmatpush.msrb.mxu0 %v903_v51 }
 0x198   :  { %v627_v0 = vpop.f32.mrf.mxu2  ;;  %935 = vmatpush.msrb.mxu0 %v902_v52 }
 0x199   :  { %5187 = vmatmul.msk.f32.gmra.mxu3 %vm374_vm3, %v306_v53  ;;  %5237 = vmatmul.msk.f32.vlgmr.msrb.gmra.mxu1 %vm374_vm3, %v734_v56  ;;  %v900_v56 = vld [vmem:[#allocation2 + $0x78] sm:$0xff] }
 0x19a   :  { %936 = vmatpush.msrb.mxu0 %v901_v54 }
 0x19c   :  { %937 = vmatpush.msrb.mxu0 %v900_v56 }
 0x19d   :  { %v740_v60 = vpop.f32.mrf.mxu0 }
 0x1a0   :  { %v630_v2 = vpop.f32.mrf.mxu2 }
 0x1a1   :  { %5188 = vmatmul.msk.f32.gmra.mxu3 %vm374_vm3, %v309_v57  ;;  %5238 = vmatmul.msk.f32.gmra.mxu1 %vm374_vm3, %v737_v58  ;;  %v899_v57 = vld [vmem:[#allocation2 + $0x70] sm:$0xff]  ;;  %v898_v58 = vld [vmem:[#allocation2 + $0x68] sm:$0xff] }
 0x1a2   :  { %938 = vmatpush.msrb.mxu0 %v899_v57 }
 0x1a4   :  { %939 = vmatpush.msrb.mxu0 %v898_v58 }
 0x1a5   :  { %v743_v63 = vpop.f32.mrf.mxu0 }
 0x1a8   :  { %v633_v3 = vpop.f32.mrf.mxu2 }
 0x1a9   :  { %5189 = vmatmul.msk.f32.gmra.mxu3 %vm374_vm3, %v312_v59  ;;  %5239 = vmatmul.msk.f32.gmra.mxu1 %vm374_vm3, %v740_v60  ;;  %v897_v59 = vld [vmem:[#allocation2 + $0x60] sm:$0xff] }
 0x1aa   :  { %940 = vmatpush.msrb.mxu0 %v897_v59 }
 0x1ad   :  { %v746_v1 = vpop.f32.mrf.mxu0 }
 0x1b0   :  { %v636_v4 = vpop.f32.mrf.mxu2 }
 0x1b1   :  { %5190 = vmatmul.msk.f32.gmra.mxu3 %vm374_vm3, %v315_v61  ;;  %5240 = vmatmul.msk.f32.gmra.mxu1 %vm374_vm3, %v743_v63 }
 0x1b9   :  { %5220 = vmatmul.msk.f32.vlgmr.msra.gmra.mxu3 %vm374_vm3, %v624_v62  ;;  %5241 = vmatmul.msk.f32.gmra.mxu1 %vm374_vm3, %v746_v1 }
 0x1c1   :  { %5221 = vmatmul.msk.f32.gmra.mxu3 %vm374_vm3, %v627_v0 }
 0x1c9   :  { %5222 = vmatmul.msk.f32.gmra.mxu3 %vm374_vm3, %v630_v2 }
 0x1d1   :  { %5223 = vmatmul.msk.f32.gmra.mxu3 %vm374_vm3, %v633_v3 }
 0x1d9   :  { %5224 = vmatmul.msk.f32.gmra.mxu3 %vm374_vm3, %v636_v4 }
 0x1e6   :  { %v411_v6 = vpop.f32.mrf.mxu1 }
 0x1ee   :  { %v566_v8 = vpop.f32.mrf.mxu1 }
 0x1f4   :  { %v414_v5 = vpop.f32.mrf.mxu3 }
 0x1f6   :  { %v569_v11 = vpop.f32.mrf.mxu1 }
 0x1fc   :  { %v417_v7 = vpop.f32.mrf.mxu3 }
 0x1fe   :  { %v572_v13 = vpop.f32.mrf.mxu1 }
 0x204   :  { %v420_v9 = vpop.f32.mrf.mxu3 }
 0x206   :  { %v575_v40 = vpop.f32.mrf.mxu1 }
 0x20c   :  { %v423_v10 = vpop.f32.mrf.mxu3 }
 0x20e   :  { %v578_v42 = vpop.f32.mrf.mxu1 }
 0x214   :  { %v461_v12 = vpop.f32.mrf.mxu3 }
 0x215   :  { %v462_v45 = vadd.f32 %v461_v12, %v411_v6 }
 0x216   :  { %v786_v48 = vpop.f32.mrf.mxu1 }
 0x217   :  { %v581_v57 = vadd.f32 %v566_v8, %v462_v45 }
 0x21c   :  { %v464_v39 = vpop.f32.mrf.mxu3 }
 0x21d   :  { %v465_v3 = vadd.f32 %v464_v39, %v414_v5 }
 0x21e   :  { %v789_v55 = vpop.f32.mrf.mxu1 }
 0x21f   :  { %v582_v50 = vadd.f32 %v569_v11, %v465_v3  ;;  %v1044_v3 = vld [vmem:[#allocation2 + $0xf8] sm:$0xff] }
 0x224   :  { %v467_v41 = vpop.f32.mrf.mxu3 }
 0x225   :  { %v468_v2 = vadd.f32 %v467_v41, %v417_v7  ;;  %v5750_v7 = vld [vmem:[%s8361_s17] ss:$0 sm:$0xff] }
 0x226   :  { %v792_v61 = vpop.f32.mrf.mxu1 }
 0x227   :  { %v583_v46 = vadd.f32 %v572_v13, %v468_v2  ;;  %v1046_v2 = vld [vmem:[#allocation2 + $0x108] sm:$0xff] }
 0x22c   :  { %v470_v43 = vpop.f32.mrf.mxu3 }
 0x22d   :  { %v471_v0 = vadd.f32 %v470_v43, %v420_v9  ;;  %v863_v43 = vld [vmem:[#allocation2 + $0x58] sm:$0xff] }
 0x22e   :  { %v795_v63 = vpop.f32.mrf.mxu1  ;;  %976 = vmatpush.msra.mxu1 %v863_v43  ;;  %v1143_v43 = vld [vmem:[#allocation2 + $0x168] sm:$0xff] }
 0x22f   :  { %v584_v4 = vadd.f32 %v575_v40, %v471_v0  ;;  %v853_v0 = vld [vmem:[#allocation2 + $0x8] sm:$0xff] }
 0x234   :  { %v473_v47 = vpop.f32.mrf.mxu3 }
 0x235   :  { %v474_v44 = vadd.f32 %v473_v47, %v423_v10  ;;  %v862_v47 = vld [vmem:[#allocation2 + $0x50] sm:$0xff] }
 0x236   :  { %v798_v56 = vpop.f32.mrf.mxu1  ;;  %977 = vmatpush.msra.mxu1 %v862_v47  ;;  %v1142_v47 = vld [vmem:[#allocation2 + $0x160] sm:$0xff] }
 0x237   :  { %v585_v51 = vadd.f32 %v578_v42, %v474_v44  ;;  %v1042_v44 = vld [vmem:[#allocation2 + $0xe8] sm:$0xff] }
 0x23c   :  { %v676_v53 = vpop.f32.mrf.mxu3 }
 0x23d   :  { %v691_v30 = vadd.f32 %v676_v53, %v581_v57  ;;  %v860_v53 = vld [vmem:[#allocation2 + $0x40] sm:$0xff] }
 0x23e   :  { %v1037_v57 = vld [vmem:[#allocation2 + $0xc0] sm:$0xff] }
 0x23f   :  { %v801_v13 = vadd.f32 %v786_v48, %v691_v30  ;;  %v861_v48 = vld [vmem:[#allocation2 + $0x48] sm:$0xff] }
 0x240   :  { %978 = vmatpush.msra.mxu1 %v861_v48  ;;  %v1140_v48 = vld [vmem:[#allocation2 + $0x150] sm:$0xff] }
 0x241   :  { %v809_v8 = vadd.f32 %v5750_v7, %v801_v13 }
 0x242   :  { %979 = vmatpush.msra.mxu1 %v860_v53  ;;  %v1139_v53 = vld [vmem:[#allocation2 + $0x148] sm:$0xff] }
 0x244   :  { %v679_v60 = vpop.f32.mrf.mxu3 }
 0x245   :  { %v692_v58 = vadd.f32 %v679_v60, %v582_v50  ;;  %v858_v60 = vld [vmem:[#allocation2 + $0x30] sm:$0xff]  ;;  %v1040_v50 = vld [vmem:[#allocation2 + $0xd8] sm:$0xff] }
 0x247   :  { %v802_v10 = vadd.f32 %v789_v55, %v692_v58  ;;  %v859_v55 = vld [vmem:[#allocation2 + $0x38] sm:$0xff] }
 0x248   :  { %980 = vmatpush.msra.mxu1 %v859_v55  ;;  %v1138_v55 = vld [vmem:[#allocation2 + $0x140] sm:$0xff] }
 0x249   :  { %v810_v40 = vadd.f32 %v5750_v7, %v802_v10 }
 0x24a   :  { %981 = vmatpush.msra.mxu1 %v858_v60  ;;  %v1137_v60 = vld [vmem:[#allocation2 + $0x138] sm:$0xff] }
 0x24b   :  { %v6608_v30 = vmax.f32 %v810_v40, 0.0 }
 0x24c   :  { %v682_v62 = vpop.f32.mrf.mxu3 }
 0x24d   :  { %v693_v52 = vadd.f32 %v682_v62, %v583_v46  ;;  %v856_v62 = vld [vmem:[#allocation2 + $0x20] sm:$0xff] }
 0x24f   :  { %v803_v5 = vadd.f32 %v792_v61, %v693_v52  ;;  %v857_v61 = vld [vmem:[#allocation2 + $0x28] sm:$0xff] }
 0x250   :  { %982 = vmatpush.msra.mxu1 %v857_v61  ;;  %v1038_v52 = vld [vmem:[#allocation2 + $0xc8] sm:$0xff]  ;;  %v1136_v61 = vld [vmem:[#allocation2 + $0x130] sm:$0xff] }
 0x251   :  { %v811_v11 = vadd.f32 %v5750_v7, %v803_v5 }
 0x252   :  { %983 = vmatpush.msra.mxu1 %v856_v62  ;;  %v1135_v62 = vld [vmem:[#allocation2 + $0x128] sm:$0xff] }
 0x253   :  { %v6603_v42 = vmax.f32 %v811_v11, 0.0 }
 0x254   :  { %v685_v1 = vpop.f32.mrf.mxu3 }
 0x255   :  { %v694_v49 = vadd.f32 %v685_v1, %v584_v4  ;;  %v1047_v1 = vld [vmem:[#allocation2 + $0x110] sm:$0xff] }
 0x256   :  { %v1043_v4 = vld [vmem:[#allocation2 + $0xf0] sm:$0xff] }
 0x257   :  { %v804_v59 = vadd.f32 %v795_v63, %v694_v49  ;;  %v855_v63 = vld [vmem:[#allocation2 + $0x18] sm:$0xff]  ;;  %v1041_v49 = vld [vmem:[#allocation2 + $0xe0] sm:$0xff] }
 0x258   :  { %984 = vmatpush.msra.mxu1 %v855_v63 }
 0x259   :  { %v812_v6 = vadd.f32 %v5750_v7, %v804_v59 }
 0x25b   :  { %v6598_v41 = vmax.f32 %v812_v6, 0.0 }
 0x25c   :  { %v688_v54 = vpop.f32.mrf.mxu3 }
 0x25d   :  { %v695_v32 = vadd.f32 %v688_v54, %v585_v51  ;;  %v1039_v51 = vld [vmem:[#allocation2 + $0xd0] sm:$0xff] }
 0x25f   :  { %v805_v9 = vadd.f32 %v798_v56, %v695_v32  ;;  %v6613_v32 = vmax.f32 %v809_v8, 0.0  ;;  %v1145_v8 = vld [vmem:[#allocation2 + $0x178] sm:$0xff] }
 0x261   :  { %v813_v12 = vadd.f32 %v5750_v7, %v805_v9 }
 0x263   :  { %v6596_v39 = vmax.f32 %v813_v12, 0.0 }
 0x265   :  { %831 = vmatpush.msra.mxu2 %v6596_v39  ;;  %875 = vmatpush.msrb.mxu3 %v6596_v39 }
 0x266   :  { %1112 = vmatpush.msra.mxu0 %v6596_v39 }
 0x267   :  { %832 = vmatpush.msra.mxu2 %v6598_v41  ;;  %876 = vmatpush.msrb.mxu3 %v6598_v41 }
 0x268   :  { %1113 = vmatpush.msra.mxu0 %v6598_v41 }
 0x269   :  { %833 = vmatpush.msra.mxu2 %v6603_v42  ;;  %877 = vmatpush.msrb.mxu3 %v6603_v42 }
 0x26a   :  { %1114 = vmatpush.msra.mxu0 %v6603_v42 }
 0x26b   :  { %834 = vmatpush.msra.mxu2 %v6608_v30  ;;  %878 = vmatpush.msrb.mxu3 %v6608_v30 }
 0x26c   :  { %1115 = vmatpush.msra.mxu0 %v6608_v30 }
 0x26d   :  { %835 = vmatpush.msra.mxu2 %v6613_v32  ;;  %879 = vmatpush.msrb.mxu3 %v6613_v32 }
 0x26e   :  { %1116 = vmatpush.msra.mxu0 %v6613_v32  ;;  %5242 = vmatmul.msk.f32.vlgmr.msra.gmra.mxu2 %vm270_vm1, %v6382_v15 }
 0x26f   :  { %5247 = vmatmul.msk.f32.vlgmr.msrb.gmra.mxu3 %vm270_vm1, %v6375_v14  ;;  %1015 = vmatpush.msrb.mxu2 %v6596_v39 }
 0x271   :  { %1016 = vmatpush.msrb.mxu2 %v6598_v41 }
 0x273   :  { %1017 = vmatpush.msrb.mxu2 %v6603_v42 }
 0x275   :  { %1018 = vmatpush.msrb.mxu2 %v6608_v30 }
 0x276   :  { %5243 = vmatmul.msk.f32.gmra.mxu2 %vm270_vm1, %v6401_v18 }
 0x277   :  { %5248 = vmatmul.msk.f32.gmra.mxu3 %vm270_vm1, %v6396_v17  ;;  %1019 = vmatpush.msrb.mxu2 %v6613_v32 }
 0x279   :  { %5729 = vmatpush.msra.mxu2 %v6596_v39 }
 0x27b   :  { %5730 = vmatpush.msra.mxu2 %v6598_v41 }
 0x27d   :  { %5731 = vmatpush.msra.mxu2 %v6603_v42 }
 0x27e   :  { %5244 = vmatmul.msk.f32.gmra.mxu2 %vm270_vm1, %v6422_v21 }
 0x27f   :  { %5732 = vmatpush.msra.mxu2 %v6608_v30  ;;  %5249 = vmatmul.msk.f32.gmra.mxu3 %vm270_vm1, %v6417_v20 }
 0x281   :  { %5733 = vmatpush.msra.mxu2 %v6613_v32 }
 0x286   :  { %5245 = vmatmul.msk.f32.gmra.mxu2 %vm270_vm1, %v6443_v24 }
 0x287   :  { %5250 = vmatmul.msk.f32.gmra.mxu3 %vm270_vm1, %v6438_v23 }
 0x28e   :  { %5246 = vmatmul.msk.f32.gmra.mxu2 %vm270_vm1, %v6464_v27 }
 0x28f   :  { %5251 = vmatmul.msk.f32.gmra.mxu3 %vm270_vm1, %v6459_v26 }
 0x296   :  { %5262 = vmatmul.msk.f32.vlgmr.msrb.gmra.mxu2 %vm270_vm1, %v6387_v16  ;;  %v854_v16 = vld [vmem:[#allocation2 + $0x10] sm:$0xff] }
 0x297   :  { %985 = vmatpush.msra.mxu1 %v854_v16  ;;  %v1134_v16 = vld [vmem:[#allocation2 + $0x120] sm:$0xff] }
 0x299   :  { %986 = vmatpush.msra.mxu1 %v853_v0 }
 0x29e   :  { %5263 = vmatmul.msk.f32.gmra.mxu2 %vm270_vm1, %v6406_v19  ;;  %v852_v19 = vld [vmem:[#allocation2] sm:$0xff] }
 0x29f   :  { %987 = vmatpush.msra.mxu1 %v852_v19 }
 0x2a1   :  { %1165 = vmatpush.msrb.mxu1 %v1145_v8 }
 0x2a6   :  { %5264 = vmatmul.msk.f32.gmra.mxu2 %vm270_vm1, %v6427_v22  ;;  %v1048_v22 = vld [vmem:[#allocation2 + $0x118] sm:$0xff] }
 0x2a7   :  { %1068 = vmatpush.msra.mxu3 %v1048_v22  ;;  %v1242_v22 = vld [vmem:[#allocation2 + $0x1d8] sm:$0xff] }
 0x2a9   :  { %1069 = vmatpush.msra.mxu3 %v1047_v1  ;;  %v1241_v1 = vld [vmem:[#allocation2 + $0x1d0] sm:$0xff] }
 0x2ab   :  { %1070 = vmatpush.msra.mxu3 %v1046_v2  ;;  %v1240_v2 = vld [vmem:[#allocation2 + $0x1c8] sm:$0xff] }
 0x2ae   :  { %5265 = vmatmul.msk.f32.gmra.mxu2 %vm270_vm1, %v6448_v25  ;;  %v1045_v25 = vld [vmem:[#allocation2 + $0x100] sm:$0xff] }
 0x2af   :  { %1071 = vmatpush.msra.mxu3 %v1045_v25 }
 0x2b1   :  { %1072 = vmatpush.msra.mxu3 %v1044_v3  ;;  %v1239_v3 = vld [vmem:[#allocation2 + $0x1c0] sm:$0xff] }
 0x2b3   :  { %1073 = vmatpush.msra.mxu3 %v1043_v4  ;;  %v1238_v4 = vld [vmem:[#allocation2 + $0x1b8] sm:$0xff] }
 0x2b5   :  { %1074 = vmatpush.msra.mxu3 %v1042_v44  ;;  %v1237_v44 = vld [vmem:[#allocation2 + $0x1b0] sm:$0xff] }
 0x2b6   :  { %5266 = vmatmul.msk.f32.gmra.mxu2 %vm270_vm1, %v6469_v28 }
 0x2b7   :  { %1075 = vmatpush.msra.mxu3 %v1041_v49  ;;  %v1235_v49 = vld [vmem:[#allocation2 + $0x1a0] sm:$0xff] }
 0x2b9   :  { %1076 = vmatpush.msra.mxu3 %v1040_v50  ;;  %v1234_v50 = vld [vmem:[#allocation2 + $0x198] sm:$0xff] }
 0x2bb   :  { %1077 = vmatpush.msra.mxu3 %v1039_v51  ;;  %v1233_v51 = vld [vmem:[#allocation2 + $0x190] sm:$0xff] }
 0x2bd   :  { %1078 = vmatpush.msra.mxu3 %v1038_v52  ;;  %v1232_v52 = vld [vmem:[#allocation2 + $0x188] sm:$0xff] }
 0x2be   :  { %5284 = vmatmul.msk.f32.vlgmr.msra.gmra.mxu2 %vm270_vm1, %v6513_v34 }
 0x2bf   :  { %1079 = vmatpush.msra.mxu3 %v1037_v57 }
 0x2c1   :  { %1262 = vmatpush.msrb.mxu3 %v1242_v22  ;;  %v1394_v22 = vld [vmem:[#allocation2 + $0x270] sm:$0xff] }
 0x2c3   :  { %1263 = vmatpush.msrb.mxu3 %v1241_v1  ;;  %v1393_v1 = vld [vmem:[#allocation2 + $0x268] sm:$0xff] }
 0x2c5   :  { %1264 = vmatpush.msrb.mxu3 %v1240_v2  ;;  %v1392_v2 = vld [vmem:[#allocation2 + $0x260] sm:$0xff] }
 0x2c6   :  { %5285 = vmatmul.msk.f32.gmra.mxu2 %vm270_vm1, %v6527_v36 }
 0x2c7   :  { %1265 = vmatpush.msrb.mxu3 %v1239_v3 }
 0x2c9   :  { %1266 = vmatpush.msrb.mxu3 %v1238_v4 }
 0x2cb   :  { %1267 = vmatpush.msrb.mxu3 %v1237_v44  ;;  %v1391_v44 = vld [vmem:[#allocation2 + $0x258] sm:$0xff] }
 0x2ce   :  { %5286 = vmatmul.msk.f32.gmra.mxu2 %vm270_vm1, %v6541_v38 }
 0x2f1   :  { %v837_v45 = vpop.f32.mrf.mxu2 }
 0x2f2   :  { %v881_v46 = vpop.f32.mrf.mxu3  ;;  %5257 = vmatmul.msk.f32.vlgmr.msra.gmra.mxu1 %vm909_vm4, %v837_v45  ;;  %v1236_v45 = vld [vmem:[#allocation2 + $0x1a8] sm:$0xff] }
 0x2f3   :  { %5252 = vmatmul.msk.f32.vlgmr.msrb.gmra.mxu0 %vm909_vm4, %v881_v46  ;;  %1268 = vmatpush.msrb.mxu3 %v1236_v45  ;;  %v1390_v45 = vld [vmem:[#allocation2 + $0x250] sm:$0xff] }
 0x2f4   :  { %1209 = vmatpush.msrb.mxu0 %v6596_v39 }
 0x2f5   :  { %1269 = vmatpush.msrb.mxu3 %v1235_v49  ;;  %v1388_v49 = vld [vmem:[#allocation2 + $0x240] sm:$0xff] }
 0x2f6   :  { %1210 = vmatpush.msrb.mxu0 %v6598_v41 }
 0x2f7   :  { %1270 = vmatpush.msrb.mxu3 %v1234_v50 }
 0x2f8   :  { %1211 = vmatpush.msrb.mxu0 %v6603_v42 }
 0x2f9   :  { %v840_v54 = vpop.f32.mrf.mxu2  ;;  %1271 = vmatpush.msrb.mxu3 %v1233_v51 }
 0x2fa   :  { %1212 = vmatpush.msrb.mxu0 %v6608_v30  ;;  %v884_v56 = vpop.f32.mrf.mxu3  ;;  %5258 = vmatmul.msk.f32.gmra.mxu1 %vm909_vm4, %v840_v54 }
 0x2fb   :  { %5253 = vmatmul.msk.f32.gmra.mxu0 %vm909_vm4, %v884_v56  ;;  %1272 = vmatpush.msrb.mxu3 %v1232_v52  ;;  %v1231_v56 = vld [vmem:[#allocation2 + $0x180] sm:$0xff] }
 0x2fc   :  { %1213 = vmatpush.msrb.mxu0 %v6613_v32 }
 0x2fd   :  { %1273 = vmatpush.msrb.mxu3 %v1231_v56 }
 0x301   :  { %v843_v58 = vpop.f32.mrf.mxu2 }
 0x302   :  { %v887_v59 = vpop.f32.mrf.mxu3  ;;  %5259 = vmatmul.msk.f32.gmra.mxu1 %vm909_vm4, %v843_v58 }
 0x303   :  { %5254 = vmatmul.msk.f32.gmra.mxu0 %vm909_vm4, %v887_v59 }
 0x309   :  { %v846_v7 = vpop.f32.mrf.mxu2 }
 0x30a   :  { %v890_v5 = vpop.f32.mrf.mxu3  ;;  %5260 = vmatmul.msk.f32.gmra.mxu1 %vm909_vm4, %v846_v7 }
 0x30b   :  { %5255 = vmatmul.msk.f32.gmra.mxu0 %vm909_vm4, %v890_v5 }
 0x311   :  { %v849_v9 = vpop.f32.mrf.mxu2 }
 0x312   :  { %v893_v10 = vpop.f32.mrf.mxu3  ;;  %5261 = vmatmul.msk.f32.gmra.mxu1 %vm909_vm4, %v849_v9 }
 0x313   :  { %5256 = vmatmul.msk.f32.gmra.mxu0 %vm909_vm4, %v893_v10 }
 0x319   :  { %v1021_v6 = vpop.f32.mrf.mxu2 }
 0x31a   :  { %5267 = vmatmul.msk.f32.vlgmr.msra.gmra.mxu3 %vm909_vm4, %v1021_v6 }
 0x31b   :  { %5272 = vmatmul.msk.f32.vlgmr.msra.gmra.mxu0 %vm270_vm1, %v6480_v29  ;;  %v8362_v29 = vld [vmem:[#allocation24_spill] sm:$0xff] }
 0x321   :  { %v1024_v12 = vpop.f32.mrf.mxu2 }
 0x322   :  { %5268 = vmatmul.msk.f32.gmra.mxu3 %vm909_vm4, %v1024_v12 }
 0x323   :  { %5273 = vmatmul.msk.f32.gmra.mxu0 %vm270_vm1, %v6494_v31  ;;  %v8363_v31 = vld [vmem:[#allocation25_spill] sm:$0xff] }
 0x329   :  { %v1027_v13 = vpop.f32.mrf.mxu2 }
 0x32a   :  { %5269 = vmatmul.msk.f32.gmra.mxu3 %vm909_vm4, %v1027_v13 }
 0x32b   :  { %5274 = vmatmul.msk.f32.gmra.mxu0 %vm270_vm1, %v6508_v33  ;;  %v1144_v33 = vld [vmem:[#allocation2 + $0x170] sm:$0xff] }
 0x32c   :  { %1166 = vmatpush.msrb.mxu1 %v1144_v33 }
 0x32e   :  { %1167 = vmatpush.msrb.mxu1 %v1143_v43 }
 0x330   :  { %1168 = vmatpush.msrb.mxu1 %v1142_v47 }
 0x331   :  { %v1030_v11 = vpop.f32.mrf.mxu2 }
 0x332   :  { %5270 = vmatmul.msk.f32.gmra.mxu3 %vm909_vm4, %v1030_v11 }
 0x333   :  { %5275 = vmatmul.msk.f32.gmra.mxu0 %vm270_vm1, %v6522_v35  ;;  %v1141_v35 = vld [vmem:[#allocation2 + $0x158] sm:$0xff] }
 0x334   :  { %1169 = vmatpush.msrb.mxu1 %v1141_v35 }
 0x336   :  { %1170 = vmatpush.msrb.mxu1 %v1140_v48  ;;  %v1399_v48 = vld [vmem:[#allocation2 + $0x298] sm:$0xff] }
 0x337   :  { %1419 = vmatpush.msrb.mxu2 %v1399_v48 }
 0x338   :  { %1171 = vmatpush.msrb.mxu1 %v1139_v53  ;;  %v1398_v53 = vld [vmem:[#allocation2 + $0x290] sm:$0xff] }
 0x339   :  { %v1033_v40 = vpop.f32.mrf.mxu2  ;;  %1420 = vmatpush.msrb.mxu2 %v1398_v53 }
 0x33a   :  { %5271 = vmatmul.msk.f32.gmra.mxu3 %vm909_vm4, %v1033_v40  ;;  %1172 = vmatpush.msrb.mxu1 %v1138_v55 }
 0x33b   :  { %5276 = vmatmul.msk.f32.gmra.mxu0 %vm270_vm1, %v6536_v37 }
 0x33c   :  { %1173 = vmatpush.msrb.mxu1 %v1137_v60  ;;  %v1397_v60 = vld [vmem:[#allocation2 + $0x288] sm:$0xff] }
 0x33d   :  { %1421 = vmatpush.msrb.mxu2 %v1397_v60 }
 0x33e   :  { %1174 = vmatpush.msrb.mxu1 %v1136_v61  ;;  %v1396_v61 = vld [vmem:[#allocation2 + $0x280] sm:$0xff] }
 0x33f   :  { %1422 = vmatpush.msrb.mxu2 %v1396_v61 }
 0x340   :  { %1175 = vmatpush.msrb.mxu1 %v1135_v62 }
 0x341   :  { %v1221_v9 = vpop.f32.mrf.mxu2 }
 0x342   :  { %1176 = vmatpush.msrb.mxu1 %v1134_v16  ;;  %v1395_v16 = vld [vmem:[#allocation2 + $0x278] sm:$0xff] }
 0x343   :  { %5282 = vmatmul.msk.f32.vlgmr.msrb.gmra.mxu0 %vm270_vm1, %v8362_v29  ;;  %1423 = vmatpush.msrb.mxu2 %v1395_v16 }
 0x345   :  { %1424 = vmatpush.msrb.mxu2 %v1394_v22 }
 0x347   :  { %1425 = vmatpush.msrb.mxu2 %v1393_v1 }
 0x349   :  { %v1224_v10 = vpop.f32.mrf.mxu2  ;;  %1426 = vmatpush.msrb.mxu2 %v1392_v2 }
 0x34b   :  { %5283 = vmatmul.msk.f32.gmra.mxu0 %vm270_vm1, %v8363_v31  ;;  %1427 = vmatpush.msrb.mxu2 %v1391_v44  ;;  %v6766_v44 = vld [vmem:[%s8357_s19 + $0x60] sm:$0xff] }
 0x34d   :  { %1428 = vmatpush.msrb.mxu2 %v1390_v45  ;;  %v1345_v45 = vld [vmem:[#allocation2 + $0x1f0] sm:$0xff] }
 0x351   :  { %v1227_v6 = vpop.f32.mrf.mxu2 }
 0x36f   :  { %v989_v12 = vpop.f32.mrf.mxu1 }
 0x370   :  { %v6701_v37 = vpop.f32.mrf.mxu0 }
 0x371   :  { %v990_v53 = vadd.f32 %v989_v12, %v6701_v37 }
 0x377   :  { %v992_v13 = vpop.f32.mrf.mxu1 }
 0x378   :  { %v6703_v63 = vpop.f32.mrf.mxu0 }
 0x37f   :  { %v995_v40 = vpop.f32.mrf.mxu1 }
 0x380   :  { %v6705_v0 = vpop.f32.mrf.mxu0 }
 0x387   :  { %v998_v33 = vpop.f32.mrf.mxu1 }
 0x388   :  { %v6707_v19 = vpop.f32.mrf.mxu0 }
 0x38f   :  { %v1001_v47 = vpop.f32.mrf.mxu1 }
 0x390   :  { %v6709_v25 = vpop.f32.mrf.mxu0 }
 0x398   :  { %v1118_v46 = vpop.f32.mrf.mxu0 }
 0x399   :  { %5277 = vmatmul.msk.f32.vlgmr.msrb.gmra.mxu1 %vm909_vm4, %v1118_v46  ;;  %v1389_v46 = vld [vmem:[#allocation2 + $0x248] sm:$0xff] }
 0x39a   :  { %1429 = vmatpush.msrb.mxu2 %v1389_v46  ;;  %v1344_v46 = vld [vmem:[#allocation2 + $0x1e8] sm:$0xff] }
 0x39c   :  { %1430 = vmatpush.msrb.mxu2 %v1388_v49  ;;  %v6773_v49 = vld [vmem:[%s8357_s19 + $0x68] sm:$0xff] }
 0x39d   :  { %v1081_v11 = vpop.f32.mrf.mxu3 }
 0x39e   :  { %v1096_v2 = vadd.f32 %v1081_v11, %v990_v53 }
 0x3a0   :  { %v1121_v54 = vpop.f32.mrf.mxu0 }
 0x3a1   :  { %5278 = vmatmul.msk.f32.gmra.mxu1 %vm909_vm4, %v1121_v54 }
 0x3a5   :  { %v1084_v8 = vpop.f32.mrf.mxu3 }
 0x3a8   :  { %v1124_v57 = vpop.f32.mrf.mxu0 }
 0x3a9   :  { %5279 = vmatmul.msk.f32.gmra.mxu1 %vm909_vm4, %v1124_v57  ;;  %v999_v57 = vadd.f32 %v998_v33, %v6707_v19 }
 0x3ad   :  { %v1087_v43 = vpop.f32.mrf.mxu3 }
 0x3b0   :  { %v1127_v58 = vpop.f32.mrf.mxu0 }
 0x3b1   :  { %5280 = vmatmul.msk.f32.gmra.mxu1 %vm909_vm4, %v1127_v58  ;;  %v996_v58 = vadd.f32 %v995_v40, %v6705_v0  ;;  %v5751_v0 = vld [vmem:[%s8318_s9] ss:$0 sm:$0xff] }
 0x3b5   :  { %v1090_v35 = vpop.f32.mrf.mxu3 }
 0x3b8   :  { %v1130_v59 = vpop.f32.mrf.mxu0 }
 0x3b9   :  { %5281 = vmatmul.msk.f32.gmra.mxu1 %vm909_vm4, %v1130_v59  ;;  %v1002_v59 = vadd.f32 %v1001_v47, %v6709_v25 }
 0x3bd   :  { %v1093_v62 = vpop.f32.mrf.mxu3 }
 0x3c0   :  { %v1215_v7 = vpop.f32.mrf.mxu0 }
 0x3c1   :  { %5287 = vmatmul.msk.f32.vlgmr.msrb.gmra.mxu3 %vm909_vm4, %v1215_v7  ;;  %v1099_v7 = vadd.f32 %v1090_v35, %v999_v57  ;;  %v1531_v57 = vld [vmem:[#allocation2 + $0x2c0] sm:$0xff] }
 0x3c8   :  { %v1218_v5 = vpop.f32.mrf.mxu0 }
 0x3c9   :  { %5288 = vmatmul.msk.f32.gmra.mxu3 %vm909_vm4, %v1218_v5 }
 0x3d1   :  { %5289 = vmatmul.msk.f32.gmra.mxu3 %vm909_vm4, %v1221_v9  ;;  %v993_v9 = vadd.f32 %v992_v13, %v6703_v63 }
 0x3d3   :  { %v1097_v60 = vadd.f32 %v1084_v8, %v993_v9 }
 0x3d9   :  { %5290 = vmatmul.msk.f32.gmra.mxu3 %vm909_vm4, %v1224_v10  ;;  %v1098_v10 = vadd.f32 %v1087_v43, %v996_v58  ;;  %v1530_v58 = vld [vmem:[#allocation2 + $0x2b8] sm:$0xff] }
 0x3e1   :  { %5291 = vmatmul.msk.f32.gmra.mxu3 %vm909_vm4, %v1227_v6  ;;  %v1100_v6 = vadd.f32 %v1093_v62, %v1002_v59  ;;  %v1528_v59 = vld [vmem:[#allocation2 + $0x2a8] sm:$0xff] }
 0x416   :  { %v1178_v55 = vpop.f32.mrf.mxu1 }
 0x417   :  { %v1193_v33 = vadd.f32 %v1178_v55, %v1096_v2  ;;  %v6811_v2 = vld [vmem:[%s8357_s19 + $0x80] sm:$0xff] }
 0x41e   :  { %v1181_v3 = vpop.f32.mrf.mxu1 }
 0x41f   :  { %v1194_v19 = vadd.f32 %v1181_v3, %v1097_v60 }
 0x426   :  { %v1184_v50 = vpop.f32.mrf.mxu1 }
 0x427   :  { %v1195_v61 = vadd.f32 %v1184_v50, %v1098_v10  ;;  %v1343_v50 = vld [vmem:[#allocation2 + $0x1e0] sm:$0xff] }
 0x42e   :  { %v1187_v54 = vpop.f32.mrf.mxu1 }
 0x42f   :  { %v1196_v48 = vadd.f32 %v1187_v54, %v1099_v7  ;;  %v1536_v54 = vld [vmem:[#allocation2 + $0x2e8] sm:$0xff] }
 0x436   :  { %v1190_v5 = vpop.f32.mrf.mxu1 }
 0x437   :  { %v1197_v16 = vadd.f32 %v1190_v5, %v1100_v6  ;;  %v1527_v5 = vld [vmem:[#allocation2 + $0x2a0] sm:$0xff] }
 0x444   :  { %v1275_v4 = vpop.f32.mrf.mxu3 }
 0x445   :  { %v1290_v47 = vadd.f32 %v1275_v4, %v1193_v33  ;;  %v1346_v4 = vld [vmem:[#allocation2 + $0x1f8] sm:$0xff] }
 0x447   :  { %v1298_v11 = vadd.f32 %v5751_v0, %v1290_v47  ;;  %v1633_v47 = vld [vmem:[#allocation2 + $0x348] sm:$0xff] }
 0x449   :  { %v1303_v55 = vmax.f32 %v1298_v11, 0.0  ;;  %v1731_v11 = vld [vmem:[#allocation2 + $0x3b0] sm:$0xff] }
 0x44c   :  { %v1278_v51 = vpop.f32.mrf.mxu3 }
 0x44d   :  { %v1291_v63 = vadd.f32 %v1278_v51, %v1194_v19  ;;  %v1538_v51 = vld [vmem:[#allocation2 + $0x2f8] sm:$0xff] }
 0x44f   :  { %v1299_v12 = vadd.f32 %v5751_v0, %v1291_v63  ;;  %v6835_v63 = vld [vmem:[%s8357_s19 + $0x98] sm:$0xff] }
 0x451   :  { %v1304_v3 = vmax.f32 %v1299_v12, 0.0  ;;  %v1732_v12 = vld [vmem:[#allocation2 + $0x3b8] sm:$0xff] }
 0x454   :  { %v1281_v52 = vpop.f32.mrf.mxu3 }
 0x455   :  { %v1292_v25 = vadd.f32 %v1281_v52, %v1195_v61  ;;  %v1537_v52 = vld [vmem:[#allocation2 + $0x2f0] sm:$0xff] }
 0x457   :  { %v1300_v35 = vadd.f32 %v5751_v0, %v1292_v25 }
 0x459   :  { %v1305_v62 = vmax.f32 %v1300_v35, 0.0  ;;  %v1632_v35 = vld [vmem:[#allocation2 + $0x340] sm:$0xff] }
 0x45c   :  { %v1284_v56 = vpop.f32.mrf.mxu3 }
 0x45d   :  { %v1293_v22 = vadd.f32 %v1284_v56, %v1196_v48  ;;  %v1532_v56 = vld [vmem:[#allocation2 + $0x2c8] sm:$0xff] }
 0x45f   :  { %v1301_v13 = vadd.f32 %v5751_v0, %v1293_v22  ;;  %v6803_v22 = vld [vmem:[%s8357_s19 + $0x78] sm:$0xff] }
 0x461   :  { %v1306_v8 = vmax.f32 %v1301_v13, 0.0  ;;  %v1635_v13 = vld [vmem:[#allocation2 + $0x358] sm:$0xff] }
 0x464   :  { %v1287_v1 = vpop.f32.mrf.mxu3 }
 0x465   :  { %v1294_v40 = vadd.f32 %v1287_v1, %v1197_v16 }
 0x467   :  { %v1302_v43 = vadd.f32 %v5751_v0, %v1294_v40  ;;  %v6819_v0 = vld [vmem:[%s8357_s19 + $0x88] sm:$0xff]  ;;  %v6827_v40 = vld [vmem:[%s8357_s19 + $0x90] sm:$0xff] }
 0x469   :  { %v1307_v37 = vmax.f32 %v1302_v43, 0.0  ;;  %v1634_v43 = vld [vmem:[#allocation2 + $0x350] sm:$0xff] }
 0x46b   :  { %1321 = vmatpush.msra.mxu0 %v1307_v37  ;;  %1366 = vmatpush.msra.mxu1 %v1307_v37 }
 0x46c   :  { %1602 = vmatpush.msra.mxu2 %v1307_v37 }
 0x46d   :  { %1322 = vmatpush.msra.mxu0 %v1306_v8  ;;  %1367 = vmatpush.msra.mxu1 %v1306_v8 }
 0x46e   :  { %1603 = vmatpush.msra.mxu2 %v1306_v8 }
 0x46f   :  { %1323 = vmatpush.msra.mxu0 %v1305_v62  ;;  %1368 = vmatpush.msra.mxu1 %v1305_v62 }
 0x470   :  { %1604 = vmatpush.msra.mxu2 %v1305_v62 }
 0x471   :  { %1324 = vmatpush.msra.mxu0 %v1304_v3  ;;  %1369 = vmatpush.msra.mxu1 %v1304_v3 }
 0x472   :  { %1605 = vmatpush.msra.mxu2 %v1304_v3 }
 0x473   :  { %1325 = vmatpush.msra.mxu0 %v1303_v55  ;;  %1370 = vmatpush.msra.mxu1 %v1303_v55 }
 0x474   :  { %1606 = vmatpush.msra.mxu2 %v1303_v55  ;;  %5293 = vmatmul.msk.f32.vlgmr.msra.gmra.mxu0 %vm270_vm1, %v6382_v15  ;;  %v1354_v15 = vld [vmem:[#allocation2 + $0x238] sm:$0xff] }
 0x475   :  { %5298 = vmatmul.msk.f32.vlgmr.msra.gmra.mxu1 %vm270_vm1, %v6375_v14  ;;  %1505 = vmatpush.msrb.mxu0 %v1307_v37  ;;  %v6752_v14 = vld [vmem:[%s8357_s19 + $0x50] sm:$0xff] }
 0x476   :  { %1466 = vmatpush.msra.mxu3 %v1354_v15  ;;  %1558 = vmatpush.msrb.mxu1 %v1538_v51  ;;  %v1729_v15 = vld [vmem:[#allocation2 + $0x3a0] sm:$0xff]  ;;  %v1723_v51 = vld [vmem:[#allocation2 + $0x370] sm:$0xff] }
 0x477   :  { %1506 = vmatpush.msrb.mxu0 %v1306_v8 }
 0x478   :  { %1559 = vmatpush.msrb.mxu1 %v1537_v52  ;;  %v1722_v52 = vld [vmem:[#allocation2 + $0x368] sm:$0xff] }
 0x479   :  { %1507 = vmatpush.msrb.mxu0 %v1305_v62 }
 0x47a   :  { %1560 = vmatpush.msrb.mxu1 %v1536_v54  ;;  %v1721_v54 = vld [vmem:[#allocation2 + $0x360] sm:$0xff] }
 0x47b   :  { %1508 = vmatpush.msrb.mxu0 %v1304_v3 }
 0x47c   :  { %5294 = vmatmul.msk.f32.gmra.mxu0 %vm270_vm1, %v6401_v18  ;;  %v1352_v18 = vld [vmem:[#allocation2 + $0x228] sm:$0xff] }
 0x47d   :  { %5299 = vmatmul.msk.f32.gmra.mxu1 %vm270_vm1, %v6396_v17  ;;  %1509 = vmatpush.msrb.mxu0 %v1303_v55  ;;  %v1353_v17 = vld [vmem:[#allocation2 + $0x230] sm:$0xff] }
 0x47e   :  { %1467 = vmatpush.msra.mxu3 %v1353_v17 }
 0x47f   :  { %1699 = vmatpush.msra.mxu0 %v1307_v37  ;;  %v1631_v37 = vld [vmem:[#allocation2 + $0x338] sm:$0xff] }
 0x480   :  { %1468 = vmatpush.msra.mxu3 %v1352_v18  ;;  %v1627_v18 = vld [vmem:[#allocation2 + $0x318] sm:$0xff] }
 0x481   :  { %1700 = vmatpush.msra.mxu0 %v1306_v8  ;;  %v1630_v8 = vld [vmem:[#allocation2 + $0x330] sm:$0xff] }
 0x483   :  { %1701 = vmatpush.msra.mxu0 %v1305_v62  ;;  %v1629_v62 = vld [vmem:[#allocation2 + $0x328] sm:$0xff] }
 0x484   :  { %5295 = vmatmul.msk.f32.gmra.mxu0 %vm270_vm1, %v6422_v21  ;;  %v1350_v21 = vld [vmem:[#allocation2 + $0x218] sm:$0xff] }
 0x485   :  { %1702 = vmatpush.msra.mxu0 %v1304_v3  ;;  %5300 = vmatmul.msk.f32.gmra.mxu1 %vm270_vm1, %v6417_v20  ;;  %v1351_v20 = vld [vmem:[#allocation2 + $0x220] sm:$0xff]  ;;  %v1730_v3 = vld [vmem:[#allocation2 + $0x3a8] sm:$0xff] }
 0x486   :  { %1469 = vmatpush.msra.mxu3 %v1351_v20  ;;  %v1728_v20 = vld [vmem:[#allocation2 + $0x398] sm:$0xff] }
 0x487   :  { %1703 = vmatpush.msra.mxu0 %v1303_v55  ;;  %v1628_v55 = vld [vmem:[#allocation2 + $0x320] sm:$0xff] }
 0x488   :  { %1470 = vmatpush.msra.mxu3 %v1350_v21  ;;  %v1626_v21 = vld [vmem:[#allocation2 + $0x310] sm:$0xff] }
 0x48c   :  { %5296 = vmatmul.msk.f32.gmra.mxu0 %vm270_vm1, %v6443_v24  ;;  %v1349_v24 = vld [vmem:[#allocation2 + $0x210] sm:$0xff] }
 0x48d   :  { %5301 = vmatmul.msk.f32.gmra.mxu1 %vm270_vm1, %v6438_v23  ;;  %v6759_v23 = vld [vmem:[%s8357_s19 + $0x58] sm:$0xff]  ;;  %1471 = vmatpush.msra.mxu3 %v1349_v24  ;;  %v1727_v24 = vld [vmem:[#allocation2 + $0x390] sm:$0xff] }
 0x494   :  { %5297 = vmatmul.msk.f32.gmra.mxu0 %vm270_vm1, %v6464_v27  ;;  %v1347_v27 = vld [vmem:[#allocation2 + $0x200] sm:$0xff] }
 0x495   :  { %5302 = vmatmul.msk.f32.gmra.mxu1 %vm270_vm1, %v6459_v26  ;;  %v1348_v26 = vld [vmem:[#allocation2 + $0x208] sm:$0xff] }
 0x496   :  { %1472 = vmatpush.msra.mxu3 %v1348_v26  ;;  %v1625_v26 = vld [vmem:[#allocation2 + $0x308] sm:$0xff] }
 0x498   :  { %1473 = vmatpush.msra.mxu3 %v1347_v27  ;;  %v1726_v27 = vld [vmem:[#allocation2 + $0x388] sm:$0xff] }
 0x49a   :  { %1474 = vmatpush.msra.mxu3 %v1346_v4  ;;  %v1624_v4 = vld [vmem:[#allocation2 + $0x300] sm:$0xff] }
 0x49c   :  { %5313 = vmatmul.msk.f32.vlgmr.msrb.gmra.mxu0 %vm270_vm1, %v6752_v14  ;;  %1475 = vmatpush.msra.mxu3 %v1345_v45  ;;  %v1725_v45 = vld [vmem:[#allocation2 + $0x380] sm:$0xff] }
 0x49e   :  { %1476 = vmatpush.msra.mxu3 %v1344_v46 }
 0x4a0   :  { %1477 = vmatpush.msra.mxu3 %v1343_v50  ;;  %v1724_v50 = vld [vmem:[#allocation2 + $0x378] sm:$0xff] }
 0x4a2   :  { %1655 = vmatpush.msrb.mxu3 %v1635_v13  ;;  %v5362_v13 = vld [vmem:[%s8319_s10 + $0xa8] sm:$0xff] }
 0x4a4   :  { %5314 = vmatmul.msk.f32.gmra.mxu0 %vm270_vm1, %v6759_v23  ;;  %1656 = vmatpush.msrb.mxu3 %v1634_v43 }
 0x4a6   :  { %1657 = vmatpush.msrb.mxu3 %v1633_v47 }
 0x4a8   :  { %1658 = vmatpush.msrb.mxu3 %v1632_v35  ;;  %v5361_v35 = vld [vmem:[%s8319_s10 + $0xa0] sm:$0xff] }
 0x4aa   :  { %1659 = vmatpush.msrb.mxu3 %v1631_v37  ;;  %v5360_v37 = vld [vmem:[%s8319_s10 + $0x98] sm:$0xff] }
 0x4ac   :  { %5315 = vmatmul.msk.f32.gmra.mxu0 %vm270_vm1, %v6766_v44  ;;  %1660 = vmatpush.msrb.mxu3 %v1630_v8  ;;  %v5358_v8 = vld [vmem:[%s8319_s10 + $0x88] sm:$0xff] }
 0x4ae   :  { %1661 = vmatpush.msrb.mxu3 %v1629_v62  ;;  %v5357_v62 = vld [vmem:[%s8319_s10 + $0x80] sm:$0xff] }
 0x4b0   :  { %1662 = vmatpush.msrb.mxu3 %v1628_v55  ;;  %v5356_v55 = vld [vmem:[%s8319_s10 + $0x78] sm:$0xff] }
 0x4b2   :  { %1663 = vmatpush.msrb.mxu3 %v1627_v18  ;;  %v5354_v18 = vld [vmem:[%s8319_s10 + $0x68] sm:$0xff] }
 0x4b4   :  { %5316 = vmatmul.msk.f32.gmra.mxu0 %vm270_vm1, %v6773_v49  ;;  %1664 = vmatpush.msrb.mxu3 %v1626_v21  ;;  %v5353_v21 = vld [vmem:[%s8319_s10 + $0x60] sm:$0xff] }
 0x4b6   :  { %1665 = vmatpush.msrb.mxu3 %v1625_v26 }
 0x4b8   :  { %1666 = vmatpush.msrb.mxu3 %v1624_v4 }
 0x4bc   :  { %5317 = vmatmul.msk.f32.gmra.mxu0 %vm270_vm1, %v6469_v28  ;;  %v1535_v28 = vld [vmem:[#allocation2 + $0x2e0] sm:$0xff] }
 0x4bd   :  { %1561 = vmatpush.msrb.mxu1 %v1535_v28 }
 0x4c4   :  { %5333 = vmatmul.msk.f32.vlgmr.msra.gmra.mxu0 %vm270_vm1, %v8362_v29  ;;  %v1534_v29 = vld [vmem:[#allocation2 + $0x2d8] sm:$0xff] }
 0x4c5   :  { %1562 = vmatpush.msrb.mxu1 %v1534_v29 }
 0x4cc   :  { %5334 = vmatmul.msk.f32.gmra.mxu0 %vm270_vm1, %v8363_v31  ;;  %v1533_v31 = vld [vmem:[#allocation2 + $0x2d0] sm:$0xff] }
 0x4cd   :  { %1563 = vmatpush.msrb.mxu1 %v1533_v31 }
 0x4cf   :  { %1564 = vmatpush.msrb.mxu1 %v1532_v56 }
 0x4d1   :  { %1565 = vmatpush.msrb.mxu1 %v1531_v57 }
 0x4d3   :  { %1566 = vmatpush.msrb.mxu1 %v1530_v58 }
 0x4d4   :  { %5335 = vmatmul.msk.f32.gmra.mxu0 %vm270_vm1, %v6513_v34 }
 0x4dc   :  { %5336 = vmatmul.msk.f32.gmra.mxu0 %vm270_vm1, %v6527_v36 }
 0x4e4   :  { %5337 = vmatmul.msk.f32.gmra.mxu0 %vm270_vm1, %v6541_v38  ;;  %v1529_v38 = vld [vmem:[#allocation2 + $0x2b0] sm:$0xff] }
 0x4e5   :  { %1567 = vmatpush.msrb.mxu1 %v1529_v38 }
 0x4e7   :  { %1568 = vmatpush.msrb.mxu1 %v1528_v59 }
 0x4e9   :  { %1569 = vmatpush.msrb.mxu1 %v1527_v5 }
 0x4eb   :  { %1752 = vmatpush.msra.mxu1 %v1732_v12  ;;  %v5359_v12 = vld [vmem:[%s8319_s10 + $0x90] sm:$0xff] }
 0x4ed   :  { %1753 = vmatpush.msra.mxu1 %v1731_v11 }
 0x4ef   :  { %1754 = vmatpush.msra.mxu1 %v1730_v3 }
 0x4f1   :  { %v1327_v34 = vpop.f32.mrf.mxu0  ;;  %1755 = vmatpush.msra.mxu1 %v1729_v15  ;;  %v5355_v15 = vld [vmem:[%s8319_s10 + $0x70] sm:$0xff] }
 0x4f2   :  { %v1372_v36 = vpop.f32.mrf.mxu1  ;;  %5308 = vmatmul.msk.f32.vlgmr.msra.gmra.mxu3 %vm909_vm4, %v1327_v34 }
 0x4f3   :  { %5303 = vmatmul.msk.f32.vlgmr.msrb.gmra.mxu2 %vm909_vm4, %v1372_v36  ;;  %1756 = vmatpush.msra.mxu1 %v1728_v20 }
 0x4f5   :  { %1757 = vmatpush.msra.mxu1 %v1727_v24 }
 0x4f7   :  { %1758 = vmatpush.msra.mxu1 %v1726_v27 }
 0x4f9   :  { %v1330_v7 = vpop.f32.mrf.mxu0  ;;  %1759 = vmatpush.msra.mxu1 %v1725_v45 }
 0x4fa   :  { %v1375_v9 = vpop.f32.mrf.mxu1  ;;  %5309 = vmatmul.msk.f32.gmra.mxu3 %vm909_vm4, %v1330_v7 }
 0x4fb   :  { %5304 = vmatmul.msk.f32.gmra.mxu2 %vm909_vm4, %v1375_v9  ;;  %1760 = vmatpush.msra.mxu1 %v1724_v50 }
 0x4fd   :  { %1761 = vmatpush.msra.mxu1 %v1723_v51 }
 0x4ff   :  { %1762 = vmatpush.msra.mxu1 %v1722_v52 }
 0x501   :  { %v1333_v10 = vpop.f32.mrf.mxu0  ;;  %1763 = vmatpush.msra.mxu1 %v1721_v54 }
 0x502   :  { %v1378_v6 = vpop.f32.mrf.mxu1  ;;  %5310 = vmatmul.msk.f32.gmra.mxu3 %vm909_vm4, %v1333_v10 }
 0x503   :  { %5305 = vmatmul.msk.f32.gmra.mxu2 %vm909_vm4, %v1378_v6 }
 0x509   :  { %v1336_v48 = vpop.f32.mrf.mxu0 }
 0x50a   :  { %v1381_v53 = vpop.f32.mrf.mxu1  ;;  %5311 = vmatmul.msk.f32.gmra.mxu3 %vm909_vm4, %v1336_v48 }
 0x50b   :  { %5306 = vmatmul.msk.f32.gmra.mxu2 %vm909_vm4, %v1381_v53 }
 0x511   :  { %v1339_v60 = vpop.f32.mrf.mxu0 }
 0x512   :  { %v1384_v61 = vpop.f32.mrf.mxu1  ;;  %5312 = vmatmul.msk.f32.gmra.mxu3 %vm909_vm4, %v1339_v60 }
 0x513   :  { %5307 = vmatmul.msk.f32.gmra.mxu2 %vm909_vm4, %v1384_v61 }
 0x519   :  { %v1511_v16 = vpop.f32.mrf.mxu0 }
 0x51a   :  { %5318 = vmatmul.msk.f32.vlgmr.msrb.gmra.mxu1 %vm909_vm4, %v1511_v16 }
 0x51b   :  { %5323 = vmatmul.msk.f32.vlgmr.msra.gmra.mxu2 %vm270_vm1, %v6803_v22 }
 0x521   :  { %v1514_v1 = vpop.f32.mrf.mxu0 }
 0x522   :  { %5319 = vmatmul.msk.f32.gmra.mxu1 %vm909_vm4, %v1514_v1 }
 0x523   :  { %5324 = vmatmul.msk.f32.gmra.mxu2 %vm270_vm1, %v6811_v2 }
 0x529   :  { %v1517_v19 = vpop.f32.mrf.mxu0 }
 0x52a   :  { %5320 = vmatmul.msk.f32.gmra.mxu1 %vm909_vm4, %v1517_v19 }
 0x52b   :  { %5325 = vmatmul.msk.f32.gmra.mxu2 %vm270_vm1, %v6819_v0 }
 0x531   :  { %v1520_v25 = vpop.f32.mrf.mxu0 }
 0x532   :  { %5321 = vmatmul.msk.f32.gmra.mxu1 %vm909_vm4, %v1520_v25  ;;  %v5364_v25 = vld [vmem:[%s8319_s10 + $0xb8] sm:$0xff] }
 0x533   :  { %5326 = vmatmul.msk.f32.gmra.mxu2 %vm270_vm1, %v6827_v40  ;;  %1912 = vmatpush.msrb.mxu0 %v5364_v25 }
 0x539   :  { %v1523_v33 = vpop.f32.mrf.mxu0 }
 0x53a   :  { %5322 = vmatmul.msk.f32.gmra.mxu1 %vm909_vm4, %v1523_v33  ;;  %v5363_v33 = vld [vmem:[%s8319_s10 + $0xb0] sm:$0xff] }
 0x53b   :  { %5327 = vmatmul.msk.f32.gmra.mxu2 %vm270_vm1, %v6835_v63  ;;  %1913 = vmatpush.msrb.mxu0 %v5363_v33 }
 0x53d   :  { %1914 = vmatpush.msrb.mxu0 %v5362_v13 }
 0x53f   :  { %1915 = vmatpush.msrb.mxu0 %v5361_v35 }
 0x541   :  { %v1705_v29 = vpop.f32.mrf.mxu0  ;;  %1916 = vmatpush.msrb.mxu0 %v5360_v37 }
 0x542   :  { %5338 = vmatmul.msk.f32.vlgmr.msra.gmra.mxu1 %vm909_vm4, %v1705_v29 }
 0x543   :  { %1917 = vmatpush.msrb.mxu0 %v5359_v12 }
 0x545   :  { %1918 = vmatpush.msrb.mxu0 %v5358_v8  ;;  %v6936_v8 = vld [vmem:[%s8357_s19 + $0x10] sm:$0xff] }
 0x547   :  { %1919 = vmatpush.msrb.mxu0 %v5357_v62  ;;  %v6950_v62 = vld [vmem:[%s8357_s19 + $0x18] sm:$0xff] }
 0x549   :  { %v1708_v56 = vpop.f32.mrf.mxu0  ;;  %1920 = vmatpush.msrb.mxu0 %v5356_v55  ;;  %v6964_v55 = vld [vmem:[%s8357_s19 + $0x20] sm:$0xff] }
 0x54a   :  { %5339 = vmatmul.msk.f32.gmra.mxu1 %vm909_vm4, %v1708_v56 }
 0x54b   :  { %1921 = vmatpush.msrb.mxu0 %v5355_v15  ;;  %v6971_v15 = vld [vmem:[%s8357_s19 + $0x48] sm:$0xff] }
 0x54d   :  { %1922 = vmatpush.msrb.mxu0 %v5354_v18  ;;  %v1847_v18 = vld [vmem:[%s8319_s10 + $0x58] sm:$0xff] }
 0x54e   :  { %1959 = vmatpush.msrb.mxu1 %v1847_v18  ;;  %v5412_v18 = vld [vmem:[%s8319_s10 + $0x170] sm:$0xff] }
 0x54f   :  { %1923 = vmatpush.msrb.mxu0 %v5353_v21  ;;  %v1845_v21 = vld [vmem:[%s8319_s10 + $0x48] sm:$0xff] }
 0x551   :  { %v1711_v57 = vpop.f32.mrf.mxu0 }
 0x552   :  { %5340 = vmatmul.msk.f32.gmra.mxu1 %vm909_vm4, %v1711_v57 }
 0x559   :  { %v1714_v58 = vpop.f32.mrf.mxu0 }
 0x55a   :  { %5341 = vmatmul.msk.f32.gmra.mxu1 %vm909_vm4, %v1714_v58 }
 0x561   :  { %v1717_v59 = vpop.f32.mrf.mxu0 }
 0x562   :  { %5342 = vmatmul.msk.f32.gmra.mxu1 %vm909_vm4, %v1717_v59 }
 0x575   :  { %v1479_v6 = vpop.f32.mrf.mxu3 }
 0x576   :  { %v6839_v17 = vpop.f32.mrf.mxu2 }
 0x577   :  { %v1480_v56 = vadd.f32 %v1479_v6, %v6839_v17 }
 0x57d   :  { %v1482_v53 = vpop.f32.mrf.mxu3 }
 0x57e   :  { %v6841_v46 = vpop.f32.mrf.mxu2 }
 0x57f   :  { %v1483_v52 = vadd.f32 %v1482_v53, %v6841_v46 }
 0x585   :  { %v1485_v61 = vpop.f32.mrf.mxu3 }
 0x586   :  { %v6843_v28 = vpop.f32.mrf.mxu2 }
 0x587   :  { %v1486_v50 = vadd.f32 %v1485_v61, %v6843_v28  ;;  %v5752_v28 = vld [vmem:[%s8318_s9 + $0x1] ss:$0 sm:$0xff]  ;;  %s5141_s9 = sshll.u32 %s8332_s23, 4  ;;  %s5142_s9 = int_to_ptr.hbm [resolvable:$true] %s5141_s9 }
 0x58d   :  { %v1488_v1 = vpop.f32.mrf.mxu3 }
 0x58e   :  { %v1441_v31 = vpop.f32.mrf.mxu2 }
 0x58f   :  { %v1489_v4 = vadd.f32 %v1488_v1, %v1441_v31 }
 0x595   :  { %v1491_v43 = vpop.f32.mrf.mxu3 }
 0x596   :  { %v6847_v34 = vpop.f32.mrf.mxu2 }
 0x597   :  { %v1571_v10 = vpop.f32.mrf.mxu1  ;;  %v1492_v57 = vadd.f32 %v1491_v43, %v6847_v34 }
 0x59e   :  { %v1608_v36 = vpop.f32.mrf.mxu2 }
 0x59f   :  { %5328 = vmatmul.msk.f32.vlgmr.msrb.gmra.mxu3 %vm909_vm4, %v1608_v36  ;;  %v1574_v48 = vpop.f32.mrf.mxu1 }
 0x5a0   :  { %v1587_v36 = vadd.f32 %v1574_v48, %v1483_v52  ;;  %v7040_v52 = vld [vmem:[%s8357_s19 + $0xb0] sm:$0xff] }
 0x5a6   :  { %v1611_v38 = vpop.f32.mrf.mxu2 }
 0x5a7   :  { %5329 = vmatmul.msk.f32.gmra.mxu3 %vm909_vm4, %v1611_v38  ;;  %v1577_v60 = vpop.f32.mrf.mxu1  ;;  %v1586_v38 = vadd.f32 %v1571_v10, %v1480_v56  ;;  %v7057_v56 = vld [vmem:[%s8357_s19 + $0xc0] sm:$0xff] }
 0x5a8   :  { %v1588_v54 = vadd.f32 %v1577_v60, %v1486_v50  ;;  %v1837_v50 = vld [vmem:[%s8319_s10 + $0x8] sm:$0xff] }
 0x5ae   :  { %v1614_v7 = vpop.f32.mrf.mxu2 }
 0x5af   :  { %5330 = vmatmul.msk.f32.gmra.mxu3 %vm909_vm4, %v1614_v7  ;;  %v1580_v16 = vpop.f32.mrf.mxu1 }
 0x5b0   :  { %v1589_v51 = vadd.f32 %v1580_v16, %v1489_v4  ;;  %v1840_v4 = vld [vmem:[%s8319_s10 + $0x20] sm:$0xff] }
 0x5b6   :  { %v1617_v5 = vpop.f32.mrf.mxu2 }
 0x5b7   :  { %5331 = vmatmul.msk.f32.gmra.mxu3 %vm909_vm4, %v1617_v5  ;;  %v1583_v19 = vpop.f32.mrf.mxu1 }
 0x5b8   :  { %v1590_v59 = vadd.f32 %v1583_v19, %v1492_v57  ;;  %v5391_v57 = vld [vmem:[%s8319_s10 + $0x118] sm:$0xff] }
 0x5be   :  { %v1620_v9 = vpop.f32.mrf.mxu2 }
 0x5bf   :  { %5332 = vmatmul.msk.f32.gmra.mxu3 %vm909_vm4, %v1620_v9  ;;  %v1765_v47 = vpop.f32.mrf.mxu1 }
 0x5c7   :  { %v1768_v3 = vpop.f32.mrf.mxu1 }
 0x5cf   :  { %v1771_v24 = vpop.f32.mrf.mxu1 }
 0x5d7   :  { %v1774_v27 = vpop.f32.mrf.mxu1 }
 0x5df   :  { %v1777_v31 = vpop.f32.mrf.mxu1 }
 0x622   :  { %v1668_v11 = vpop.f32.mrf.mxu3 }
 0x623   :  { %v1683_v1 = vadd.f32 %v1668_v11, %v1586_v38  ;;  %v6943_v11 = vld [vmem:[%s8357_s19 + $0x38] sm:$0xff]  ;;  %v5388_v38 = vld [vmem:[%s8319_s10 + $0x100] sm:$0xff] }
 0x625   :  { %v1780_v6 = vadd.f32 %v1765_v47, %v1683_v1 }
 0x627   :  { %v1788_v25 = vadd.f32 %v5752_v28, %v1780_v6 }
 0x629   :  { %v1793_v37 = vadd.f32 %v1788_v25, %v6613_v32  ;;  %v6929_v32 = vld [vmem:[%s8357_s19 + $0x30] sm:$0xff] }
 0x62a   :  { %v1671_v20 = vpop.f32.mrf.mxu3 }
 0x62b   :  { %v1684_v7 = vadd.f32 %v1671_v20, %v1587_v36  ;;  %v1846_v20 = vld [vmem:[%s8319_s10 + $0x50] sm:$0xff] }
 0x62c   :  { %1960 = vmatpush.msrb.mxu1 %v1846_v20  ;;  %v5390_v36 = vld [vmem:[%s8319_s10 + $0x110] sm:$0xff]  ;;  %v5432_v20 = vld [vmem:[%s8319_s10 + $0x1c0] sm:$0xff] }
 0x62d   :  { %v1781_v60 = vadd.f32 %v1768_v3, %v1684_v7  ;;  %v6957_v3 = vld [vmem:[%s8357_s19 + $0x40] sm:$0xff]  ;;  %v5386_v7 = vld [vmem:[%s8319_s10 + $0xf0] sm:$0xff] }
 0x62e   :  { %1961 = vmatpush.msrb.mxu1 %v1845_v21  ;;  %v5411_v21 = vld [vmem:[%s8319_s10 + $0x168] sm:$0xff] }
 0x62f   :  { %v1789_v16 = vadd.f32 %v5752_v28, %v1781_v60 }
 0x631   :  { %v1794_v43 = vadd.f32 %v1789_v16, %v6608_v30  ;;  %v6922_v30 = vld [vmem:[%s8357_s19 + $0x8] sm:$0xff] }
 0x632   :  { %v1674_v26 = vpop.f32.mrf.mxu3 }
 0x633   :  { %v1685_v58 = vadd.f32 %v1674_v26, %v1588_v54  ;;  %v1799_v12 = vmax.f32 %v1794_v43, 0.0  ;;  %v1842_v26 = vld [vmem:[%s8319_s10 + $0x30] sm:$0xff]  ;;  %v1836_v54 = vld [vmem:[%s8319_s10] sm:$0xff] }
 0x635   :  { %v1782_v46 = vadd.f32 %v1771_v24, %v1685_v58  ;;  %v1844_v24 = vld [vmem:[%s8319_s10 + $0x40] sm:$0xff]  ;;  %v5389_v58 = vld [vmem:[%s8319_s10 + $0x108] sm:$0xff] }
 0x636   :  { %1962 = vmatpush.msrb.mxu1 %v1844_v24  ;;  %v5431_v24 = vld [vmem:[%s8319_s10 + $0x1b8] sm:$0xff] }
 0x637   :  { %v1790_v34 = vadd.f32 %v5752_v28, %v1782_v46  ;;  %v5382_v46 = vld [vmem:[%s8319_s10 + $0xd0] sm:$0xff] }
 0x639   :  { %v1795_v33 = vadd.f32 %v1790_v34, %v6603_v42  ;;  %v6915_v42 = vld [vmem:[%s8357_s19 + $0x28] sm:$0xff] }
 0x63a   :  { %v1677_v45 = vpop.f32.mrf.mxu3 }
 0x63b   :  { %v1686_v29 = vadd.f32 %v1677_v45, %v1589_v51  ;;  %v1800_v47 = vmax.f32 %v1795_v33, 0.0  ;;  %v1839_v45 = vld [vmem:[%s8319_s10 + $0x18] sm:$0xff]  ;;  %v7019_v51 = vld [vmem:[%s8357_s19 + $0x70] sm:$0xff] }
 0x63d   :  { %v1783_v5 = vadd.f32 %v1774_v27, %v1686_v29  ;;  %v1841_v27 = vld [vmem:[%s8319_s10 + $0x28] sm:$0xff]  ;;  %v7050_v29 = vld [vmem:[%s8357_s19 + $0xb8] sm:$0xff] }
 0x63f   :  { %v1791_v61 = vadd.f32 %v5752_v28, %v1783_v5  ;;  %v5385_v5 = vld [vmem:[%s8319_s10 + $0xe8] sm:$0xff] }
 0x641   :  { %v1796_v10 = vadd.f32 %v1791_v61, %v6598_v41  ;;  %v6908_v41 = vld [vmem:[%s8357_s19] sm:$0xff] }
 0x642   :  { %v1680_v9 = vpop.f32.mrf.mxu3  ;;  %v5380_v61 = vld [vmem:[%s8319_s10 + $0xc0] sm:$0xff] }
 0x643   :  { %v1687_v53 = vadd.f32 %v1680_v9, %v1590_v59  ;;  %v1801_v35 = vmax.f32 %v1796_v10, 0.0  ;;  %v5387_v59 = vld [vmem:[%s8319_s10 + $0xf8] sm:$0xff] }
 0x645   :  { %v1784_v17 = vadd.f32 %v1777_v31, %v1687_v53  ;;  %v5384_v31 = vld [vmem:[%s8319_s10 + $0xe0] sm:$0xff]  ;;  %v5381_v53 = vld [vmem:[%s8319_s10 + $0xc8] sm:$0xff] }
 0x647   :  { %v1792_v48 = vadd.f32 %v5752_v28, %v1784_v17  ;;  %v5383_v28 = vld [vmem:[%s8319_s10 + $0xd8] sm:$0xff] }
 0x649   :  { %v1797_v19 = vadd.f32 %v1792_v48, %v6596_v39  ;;  %v1798_v39 = vmax.f32 %v1793_v37, 0.0  ;;  %v5435_v37 = vld [vmem:[%s8319_s10 + $0x1d8] sm:$0xff] }
 0x64b   :  { %v1802_v13 = vmax.f32 %v1797_v19, 0.0 }
 0x64d   :  { %1815 = vmatpush.msrb.mxu2 %v1802_v13  ;;  %1859 = vmatpush.msra.mxu3 %v1802_v13 }
 0x64e   :  { %2095 = vmatpush.msra.mxu0 %v1802_v13 }
 0x64f   :  { %1816 = vmatpush.msrb.mxu2 %v1801_v35  ;;  %1860 = vmatpush.msra.mxu3 %v1801_v35 }
 0x650   :  { %2096 = vmatpush.msra.mxu0 %v1801_v35 }
 0x651   :  { %1817 = vmatpush.msrb.mxu2 %v1800_v47  ;;  %1861 = vmatpush.msra.mxu3 %v1800_v47 }
 0x652   :  { %2097 = vmatpush.msra.mxu0 %v1800_v47 }
 0x653   :  { %1818 = vmatpush.msrb.mxu2 %v1799_v12  ;;  %1862 = vmatpush.msra.mxu3 %v1799_v12 }
 0x654   :  { %2098 = vmatpush.msra.mxu0 %v1799_v12 }
 0x655   :  { %1819 = vmatpush.msrb.mxu2 %v1798_v39  ;;  %1863 = vmatpush.msra.mxu3 %v1798_v39 }
 0x656   :  { %2099 = vmatpush.msra.mxu0 %v1798_v39  ;;  %5343 = vmatmul.msk.f32.vlgmr.msrb.gmra.mxu2 %vm270_vm1, %v6908_v41 }
 0x657   :  { %5348 = vmatmul.msk.f32.vlgmr.msra.gmra.mxu3 %vm270_vm1, %v6915_v42  ;;  %1998 = vmatpush.msra.mxu2 %v1802_v13 }
 0x658   :  { %2051 = vmatpush.msrb.mxu3 %v5391_v57  ;;  %v5406_v57 = vld [vmem:[%s8319_s10 + $0x140] sm:$0xff] }
 0x659   :  { %1999 = vmatpush.msra.mxu2 %v1801_v35 }
 0x65a   :  { %2052 = vmatpush.msrb.mxu3 %v5390_v36  ;;  %v5426_v36 = vld [vmem:[%s8319_s10 + $0x190] sm:$0xff] }
 0x65b   :  { %2000 = vmatpush.msra.mxu2 %v1800_v47 }
 0x65c   :  { %2053 = vmatpush.msrb.mxu3 %v5389_v58 }
 0x65d   :  { %2001 = vmatpush.msra.mxu2 %v1799_v12 }
 0x65e   :  { %5344 = vmatmul.msk.f32.gmra.mxu2 %vm270_vm1, %v6922_v30  ;;  %2054 = vmatpush.msrb.mxu3 %v5388_v38  ;;  %v5405_v38 = vld [vmem:[%s8319_s10 + $0x138] sm:$0xff] }
 0x65f   :  { %5349 = vmatmul.msk.f32.gmra.mxu3 %vm270_vm1, %v6929_v32  ;;  %2002 = vmatpush.msra.mxu2 %v1798_v39 }
 0x660   :  { %2055 = vmatpush.msrb.mxu3 %v5387_v59  ;;  %v5425_v59 = vld [vmem:[%s8319_s10 + $0x188] sm:$0xff] }
 0x661   :  { %2192 = vmatpush.msrb.mxu2 %v1802_v13 }
 0x662   :  { %2056 = vmatpush.msrb.mxu3 %v5386_v7  ;;  %v5404_v7 = vld [vmem:[%s8319_s10 + $0x130] sm:$0xff] }
 0x663   :  { %2193 = vmatpush.msrb.mxu2 %v1801_v35 }
 0x664   :  { %2057 = vmatpush.msrb.mxu3 %v5385_v5 }
 0x665   :  { %2194 = vmatpush.msrb.mxu2 %v1800_v47  ;;  %v5434_v47 = vld [vmem:[%s8319_s10 + $0x1d0] sm:$0xff] }
 0x666   :  { %5345 = vmatmul.msk.f32.gmra.mxu2 %vm270_vm1, %v6936_v8  ;;  %2058 = vmatpush.msrb.mxu3 %v5384_v31  ;;  %v5403_v31 = vld [vmem:[%s8319_s10 + $0x128] sm:$0xff] }
 0x667   :  { %2195 = vmatpush.msrb.mxu2 %v1799_v12  ;;  %5350 = vmatmul.msk.f32.gmra.mxu3 %vm270_vm1, %v6943_v11  ;;  %v5413_v12 = vld [vmem:[%s8319_s10 + $0x178] sm:$0xff] }
 0x668   :  { %2059 = vmatpush.msrb.mxu3 %v5383_v28 }
 0x669   :  { %2196 = vmatpush.msrb.mxu2 %v1798_v39  ;;  %v5433_v39 = vld [vmem:[%s8319_s10 + $0x1c8] sm:$0xff] }
 0x66a   :  { %2060 = vmatpush.msrb.mxu3 %v5382_v46 }
 0x66c   :  { %2061 = vmatpush.msrb.mxu3 %v5381_v53 }
 0x66e   :  { %5346 = vmatmul.msk.f32.gmra.mxu2 %vm270_vm1, %v6950_v62  ;;  %2062 = vmatpush.msrb.mxu3 %v5380_v61 }
 0x66f   :  { %5351 = vmatmul.msk.f32.gmra.mxu3 %vm270_vm1, %v6957_v3 }
 0x670   :  { %2245 = vmatpush.msra.mxu3 %v5435_v37 }
 0x672   :  { %2246 = vmatpush.msra.mxu3 %v5434_v47 }
 0x674   :  { %2247 = vmatpush.msra.mxu3 %v5433_v39 }
 0x676   :  { %5347 = vmatmul.msk.f32.gmra.mxu2 %vm270_vm1, %v6964_v55  ;;  %2248 = vmatpush.msra.mxu3 %v5432_v20 }
 0x677   :  { %5352 = vmatmul.msk.f32.gmra.mxu3 %vm270_vm1, %v6971_v15 }
 0x678   :  { %2249 = vmatpush.msra.mxu3 %v5431_v24 }
 0x67e   :  { %5375 = vmatmul.msk.f32.vlgmr.msra.gmra.mxu2 %vm270_vm1, %v6752_v14  ;;  %v1843_v14 = vld [vmem:[%s8319_s10 + $0x38] sm:$0xff] }
 0x67f   :  { %1963 = vmatpush.msrb.mxu1 %v1843_v14  ;;  %v5410_v14 = vld [vmem:[%s8319_s10 + $0x160] sm:$0xff] }
 0x681   :  { %1964 = vmatpush.msrb.mxu1 %v1842_v26  ;;  %v5430_v26 = vld [vmem:[%s8319_s10 + $0x1b0] sm:$0xff] }
 0x682   :  { %2250 = vmatpush.msra.mxu3 %v5430_v26 }
 0x683   :  { %1965 = vmatpush.msrb.mxu1 %v1841_v27  ;;  %v5409_v27 = vld [vmem:[%s8319_s10 + $0x158] sm:$0xff] }
 0x685   :  { %1966 = vmatpush.msrb.mxu1 %v1840_v4  ;;  %v5429_v4 = vld [vmem:[%s8319_s10 + $0x1a8] sm:$0xff] }
 0x686   :  { %5376 = vmatmul.msk.f32.gmra.mxu2 %vm270_vm1, %v6759_v23  ;;  %v1838_v23 = vld [vmem:[%s8319_s10 + $0x10] sm:$0xff]  ;;  %2251 = vmatpush.msra.mxu3 %v5429_v4  ;;  %v5452_v4 = vld [vmem:[%s8321_s12 + $0x28] sm:$0xff] }
 0x687   :  { %1967 = vmatpush.msrb.mxu1 %v1839_v45  ;;  %v5408_v45 = vld [vmem:[%s8319_s10 + $0x150] sm:$0xff] }
 0x689   :  { %1968 = vmatpush.msrb.mxu1 %v1838_v23  ;;  %v5428_v23 = vld [vmem:[%s8319_s10 + $0x1a0] sm:$0xff] }
 0x68a   :  { %2252 = vmatpush.msra.mxu3 %v5428_v23 }
 0x68b   :  { %1969 = vmatpush.msrb.mxu1 %v1837_v50  ;;  %v5407_v50 = vld [vmem:[%s8319_s10 + $0x148] sm:$0xff] }
 0x68d   :  { %1970 = vmatpush.msrb.mxu1 %v1836_v54  ;;  %v5427_v54 = vld [vmem:[%s8319_s10 + $0x198] sm:$0xff] }
 0x68e   :  { %5377 = vmatmul.msk.f32.gmra.mxu2 %vm270_vm1, %v6766_v44  ;;  %v7026_v44 = vld [vmem:[%s8357_s19 + $0xa0] sm:$0xff]  ;;  %2253 = vmatpush.msra.mxu3 %v5427_v54 }
 0x68f   :  { %2148 = vmatpush.msra.mxu1 %v5413_v12 }
 0x690   :  { %2254 = vmatpush.msra.mxu3 %v5426_v36 }
 0x691   :  { %2149 = vmatpush.msra.mxu1 %v5412_v18 }
 0x692   :  { %2255 = vmatpush.msra.mxu3 %v5425_v59 }
 0x693   :  { %2150 = vmatpush.msra.mxu1 %v5411_v21 }
 0x695   :  { %2151 = vmatpush.msra.mxu1 %v5410_v14  ;;  %v5454_v14 = vld [vmem:[%s8321_s12 + $0x38] sm:$0xff] }
 0x696   :  { %5378 = vmatmul.msk.f32.gmra.mxu2 %vm270_vm1, %v6773_v49  ;;  %v7033_v49 = vld [vmem:[%s8357_s19 + $0xa8] sm:$0xff] }
 0x697   :  { %2152 = vmatpush.msra.mxu1 %v5409_v27  ;;  %2392 = vmatpush.msra.mxu2 %v5454_v14  ;;  %v5453_v27 = vld [vmem:[%s8321_s12 + $0x30] sm:$0xff] }
 0x699   :  { %2153 = vmatpush.msra.mxu1 %v5408_v45  ;;  %2393 = vmatpush.msra.mxu2 %v5453_v27  ;;  %v5451_v45 = vld [vmem:[%s8321_s12 + $0x20] sm:$0xff] }
 0x69b   :  { %2154 = vmatpush.msra.mxu1 %v5407_v50  ;;  %2394 = vmatpush.msra.mxu2 %v5452_v4  ;;  %v5753_v4 = vld [vmem:[#allocation5] ss:$0 sm:$0xff] }
 0x69d   :  { %2155 = vmatpush.msra.mxu1 %v5406_v57  ;;  %2395 = vmatpush.msra.mxu2 %v5451_v45  ;;  %v7293_v45 = vld [vmem:[%s8357_s19 + $0x58] sm:$0xff] }
 0x69e   :  { %5379 = vmatmul.msk.f32.gmra.mxu2 %vm270_vm1, %v7019_v51 }
 0x69f   :  { %2156 = vmatpush.msra.mxu1 %v5405_v38 }
 0x6a1   :  { %2157 = vmatpush.msra.mxu1 %v5404_v7 }
 0x6a3   :  { %2158 = vmatpush.msra.mxu1 %v5403_v31 }
 0x6a6   :  { %5419 = vmatmul.msk.f32.vlgmr.msrb.gmra.mxu2 %vm270_vm1, %v7026_v44 }
 0x6ae   :  { %5420 = vmatmul.msk.f32.gmra.mxu2 %vm270_vm1, %v7033_v49 }
 0x6b6   :  { %5421 = vmatmul.msk.f32.gmra.mxu2 %vm270_vm1, %v7040_v52 }
 0x6be   :  { %5422 = vmatmul.msk.f32.gmra.mxu2 %vm270_vm1, %v7050_v29 }
 0x6c6   :  { %5423 = vmatmul.msk.f32.gmra.mxu2 %vm270_vm1, %v7057_v56 }
 0x6d9   :  { %v1821_v9 = vpop.f32.mrf.mxu2 }
 0x6da   :  { %v1865_v1 = vpop.f32.mrf.mxu3  ;;  %5370 = vmatmul.msk.f32.vlgmr.msrb.gmra.mxu1 %vm909_vm4, %v1821_v9  ;;  %v5424_v9 = vld [vmem:[%s8319_s10 + $0x180] sm:$0xff] }
 0x6db   :  { %5365 = vmatmul.msk.f32.vlgmr.msrb.gmra.mxu0 %vm909_vm4, %v1865_v1  ;;  %2256 = vmatpush.msra.mxu3 %v5424_v9  ;;  %v5402_v1 = vld [vmem:[%s8319_s10 + $0x120] sm:$0xff] }
 0x6dc   :  { %2159 = vmatpush.msra.mxu1 %v5402_v1 }
 0x6e1   :  { %v1824_v60 = vpop.f32.mrf.mxu2 }
 0x6e2   :  { %v1868_v17 = vpop.f32.mrf.mxu3  ;;  %5371 = vmatmul.msk.f32.gmra.mxu1 %vm909_vm4, %v1824_v60 }
 0x6e3   :  { %5366 = vmatmul.msk.f32.gmra.mxu0 %vm909_vm4, %v1868_v17 }
 0x6e9   :  { %v1827_v6 = vpop.f32.mrf.mxu2 }
 0x6ea   :  { %v1871_v34 = vpop.f32.mrf.mxu3  ;;  %5372 = vmatmul.msk.f32.gmra.mxu1 %vm909_vm4, %v1827_v6 }
 0x6eb   :  { %5367 = vmatmul.msk.f32.gmra.mxu0 %vm909_vm4, %v1871_v34 }
 0x6f1   :  { %v1830_v48 = vpop.f32.mrf.mxu2 }
 0x6f2   :  { %v1874_v16 = vpop.f32.mrf.mxu3  ;;  %5373 = vmatmul.msk.f32.gmra.mxu1 %vm909_vm4, %v1830_v48 }
 0x6f3   :  { %5368 = vmatmul.msk.f32.gmra.mxu0 %vm909_vm4, %v1874_v16 }
 0x6f9   :  { %v1833_v10 = vpop.f32.mrf.mxu2 }
 0x6fa   :  { %v1877_v19 = vpop.f32.mrf.mxu3  ;;  %5374 = vmatmul.msk.f32.gmra.mxu1 %vm909_vm4, %v1833_v10 }
 0x6fb   :  { %5369 = vmatmul.msk.f32.gmra.mxu0 %vm909_vm4, %v1877_v19 }
 0x701   :  { %v2004_v25 = vpop.f32.mrf.mxu2 }
 0x702   :  { %5392 = vmatmul.msk.f32.vlgmr.msrb.gmra.mxu3 %vm909_vm4, %v2004_v25 }
 0x703   :  { %5397 = vmatmul.msk.f32.vlgmr.msra.gmra.mxu0 %vm270_vm1, %v6803_v22 }
 0x709   :  { %v2007_v33 = vpop.f32.mrf.mxu2 }
 0x70a   :  { %5393 = vmatmul.msk.f32.gmra.mxu3 %vm909_vm4, %v2007_v33 }
 0x70b   :  { %5398 = vmatmul.msk.f32.gmra.mxu0 %vm270_vm1, %v6811_v2 }
 0x711   :  { %v2010_v13 = vpop.f32.mrf.mxu2 }
 0x712   :  { %5394 = vmatmul.msk.f32.gmra.mxu3 %vm909_vm4, %v2010_v13 }
 0x713   :  { %5399 = vmatmul.msk.f32.gmra.mxu0 %vm270_vm1, %v6819_v0 }
 0x719   :  { %v2013_v43 = vpop.f32.mrf.mxu2 }
 0x71a   :  { %5395 = vmatmul.msk.f32.gmra.mxu3 %vm909_vm4, %v2013_v43 }
 0x71b   :  { %5400 = vmatmul.msk.f32.gmra.mxu0 %vm270_vm1, %v6827_v40 }
 0x721   :  { %v2016_v35 = vpop.f32.mrf.mxu2 }
 0x722   :  { %5396 = vmatmul.msk.f32.gmra.mxu3 %vm909_vm4, %v2016_v35 }
 0x723   :  { %5401 = vmatmul.msk.f32.gmra.mxu0 %vm270_vm1, %v6835_v63 }
 0x729   :  { %v2198_v5 = vpop.f32.mrf.mxu2 }
 0x72a   :  { %5436 = vmatmul.msk.f32.vlgmr.msra.gmra.mxu3 %vm909_vm4, %v2198_v5 }
 0x731   :  { %v2201_v46 = vpop.f32.mrf.mxu2 }
 0x732   :  { %5437 = vmatmul.msk.f32.gmra.mxu3 %vm909_vm4, %v2201_v46 }
 0x739   :  { %v2204_v60 = vpop.f32.mrf.mxu2 }
 0x73a   :  { %5438 = vmatmul.msk.f32.gmra.mxu3 %vm909_vm4, %v2204_v60 }
 0x741   :  { %v2207_v17 = vpop.f32.mrf.mxu2 }
 0x742   :  { %5439 = vmatmul.msk.f32.gmra.mxu3 %vm909_vm4, %v2207_v17 }
 0x749   :  { %v2210_v34 = vpop.f32.mrf.mxu2 }
 0x74a   :  { %5440 = vmatmul.msk.f32.gmra.mxu3 %vm909_vm4, %v2210_v34 }
 0x757   :  { %v1972_v13 = vpop.f32.mrf.mxu1 }
 0x758   :  { %v7176_v58 = vpop.f32.mrf.mxu0 }
 0x759   :  { %v1973_v46 = vadd.f32 %v1972_v13, %v7176_v58 }
 0x75f   :  { %v1975_v35 = vpop.f32.mrf.mxu1 }
 0x760   :  { %v1928_v28 = vpop.f32.mrf.mxu0 }
 0x761   :  { %v1976_v5 = vadd.f32 %v1975_v35, %v1928_v28 }
 0x767   :  { %v1978_v47 = vpop.f32.mrf.mxu1 }
 0x768   :  { %v1931_v53 = vpop.f32.mrf.mxu0 }
 0x769   :  { %v1979_v59 = vadd.f32 %v1978_v47, %v1931_v53 }
 0x76f   :  { %v1981_v39 = vpop.f32.mrf.mxu1 }
 0x770   :  { %v1934_v61 = vpop.f32.mrf.mxu0 }
 0x771   :  { %v1982_v38 = vadd.f32 %v1981_v39, %v1934_v61 }
 0x777   :  { %v1984_v20 = vpop.f32.mrf.mxu1 }
 0x778   :  { %v1937_v6 = vpop.f32.mrf.mxu0 }
 0x779   :  { %v1985_v9 = vadd.f32 %v1984_v20, %v1937_v6  ;;  %v7277_v20 = vld [vmem:[%s8357_s19 + $0x50] sm:$0xff] }
 0x780   :  { %v2101_v48 = vpop.f32.mrf.mxu0 }
 0x781   :  { %5414 = vmatmul.msk.f32.vlgmr.msra.gmra.mxu1 %vm909_vm4, %v2101_v48 }
 0x785   :  { %v2064_v33 = vpop.f32.mrf.mxu3 }
 0x788   :  { %v2104_v16 = vpop.f32.mrf.mxu0 }
 0x789   :  { %5415 = vmatmul.msk.f32.gmra.mxu1 %vm909_vm4, %v2104_v16 }
 0x78d   :  { %v2067_v43 = vpop.f32.mrf.mxu3 }
 0x78e   :  { %v2080_v60 = vadd.f32 %v2067_v43, %v1976_v5 }
 0x790   :  { %v2107_v10 = vpop.f32.mrf.mxu0 }
 0x791   :  { %5416 = vmatmul.msk.f32.gmra.mxu1 %vm909_vm4, %v2107_v10  ;;  %v2079_v10 = vadd.f32 %v2064_v33, %v1973_v46 }
 0x795   :  { %v2070_v37 = vpop.f32.mrf.mxu3 }
 0x796   :  { %v2081_v31 = vadd.f32 %v2070_v37, %v1979_v59  ;;  %v5472_v59 = vld [vmem:[%s8321_s12 + $0x50] sm:$0xff] }
 0x798   :  { %v2110_v19 = vpop.f32.mrf.mxu0 }
 0x799   :  { %5417 = vmatmul.msk.f32.gmra.mxu1 %vm909_vm4, %v2110_v19 }
 0x79d   :  { %v2073_v12 = vpop.f32.mrf.mxu3 }
 0x79e   :  { %v2082_v7 = vadd.f32 %v2073_v12, %v1982_v38  ;;  %v5473_v38 = vld [vmem:[%s8321_s12 + $0x58] sm:$0xff] }
 0x7a0   :  { %v2113_v25 = vpop.f32.mrf.mxu0 }
 0x7a1   :  { %5418 = vmatmul.msk.f32.gmra.mxu1 %vm909_vm4, %v2113_v25 }
 0x7a5   :  { %v2076_v18 = vpop.f32.mrf.mxu3 }
 0x7a6   :  { %v2083_v17 = vadd.f32 %v2076_v18, %v1985_v9  ;;  %v5470_v9 = vld [vmem:[%s8321_s12 + $0x40] sm:$0xff] }
 0x7ad   :  { %v2258_v21 = vpop.f32.mrf.mxu3 }
 0x7b5   :  { %v2261_v26 = vpop.f32.mrf.mxu3 }
 0x7bd   :  { %v2264_v50 = vpop.f32.mrf.mxu3 }
 0x7c5   :  { %v2267_v57 = vpop.f32.mrf.mxu3 }
 0x7cd   :  { %v2270_v16 = vpop.f32.mrf.mxu3 }
 0x7fe   :  { %v2161_v24 = vpop.f32.mrf.mxu1 }
 0x7ff   :  { %v2176_v27 = vadd.f32 %v2161_v24, %v2079_v10  ;;  %v2326_v24 = vld [vmem:[%s8321_s12 + $0x10] sm:$0xff] }
 0x801   :  { %v2273_v35 = vadd.f32 %v2258_v21, %v2176_v27  ;;  %v2327_v21 = vld [vmem:[%s8321_s12 + $0x18] sm:$0xff] }
 0x802   :  { %2439 = vmatpush.msrb.mxu3 %v2327_v21 }
 0x803   :  { %v2281_v33 = vadd.f32 %v5753_v4, %v2273_v35 }
 0x804   :  { %2440 = vmatpush.msrb.mxu3 %v2326_v24 }
 0x805   :  { %v7236_v18 = vmax.f32 %v2281_v33, 0.0 }
 0x806   :  { %v2164_v23 = vpop.f32.mrf.mxu1 }
 0x807   :  { %v2177_v19 = vadd.f32 %v2164_v23, %v2080_v60  ;;  %8366 = vst [vmem:[#allocation26_spill] sm:$0xff] %v7236_v18  ;;  %v7300_v23 = vld [vmem:[%s8357_s19 + $0x60] sm:$0xff] }
 0x809   :  { %v2274_v47 = vadd.f32 %v2261_v26, %v2177_v19  ;;  %v2325_v26 = vld [vmem:[%s8321_s12 + $0x8] sm:$0xff] }
 0x80a   :  { %2441 = vmatpush.msrb.mxu3 %v2325_v26 }
 0x80b   :  { %v2282_v58 = vadd.f32 %v5753_v4, %v2274_v47  ;;  %v5498_v47 = vld [vmem:[%s8321_s12 + $0x80] sm:$0xff] }
 0x80d   :  { %v7231_v39 = vmax.f32 %v2282_v58, 0.0 }
 0x80e   :  { %v2167_v54 = vpop.f32.mrf.mxu1 }
 0x80f   :  { %v2178_v34 = vadd.f32 %v2167_v54, %v2081_v31  ;;  %8365 = vst [vmem:[#allocation25_spill] sm:$0xff] %v7231_v39  ;;  %v2324_v54 = vld [vmem:[%s8321_s12] sm:$0xff] }
 0x810   :  { %2442 = vmatpush.msrb.mxu3 %v2324_v54 }
 0x811   :  { %v2275_v61 = vadd.f32 %v2264_v50, %v2178_v34  ;;  %v7307_v50 = vld [vmem:[%s8357_s19 + $0x68] sm:$0xff] }
 0x813   :  { %v2283_v37 = vadd.f32 %v5753_v4, %v2275_v61  ;;  %v5500_v61 = vld [vmem:[%s8321_s12 + $0x90] sm:$0xff] }
 0x815   :  { %v7226_v43 = vmax.f32 %v2283_v37, 0.0 }
 0x816   :  { %v2170_v36 = vpop.f32.mrf.mxu1 }
 0x817   :  { %v2179_v1 = vadd.f32 %v2170_v36, %v2082_v7  ;;  %8364 = vst [vmem:[#allocation24_spill] sm:$0xff] %v7226_v43  ;;  %v5471_v7 = vld [vmem:[%s8321_s12 + $0x48] sm:$0xff] }
 0x819   :  { %v2276_v25 = vadd.f32 %v2267_v57, %v2179_v1 }
 0x81b   :  { %v2284_v28 = vadd.f32 %v5753_v4, %v2276_v25 }
 0x81d   :  { %v7221_v13 = vmax.f32 %v2284_v28, 0.0 }
 0x81e   :  { %v2173_v48 = vpop.f32.mrf.mxu1 }
 0x81f   :  { %v2180_v14 = vadd.f32 %v2173_v48, %v2083_v17 }
 0x821   :  { %v2277_v53 = vadd.f32 %v2270_v16, %v2180_v14 }
 0x823   :  { %v2285_v6 = vadd.f32 %v5753_v4, %v2277_v53  ;;  %v5501_v4 = vld [vmem:[%s8321_s12 + $0x98] sm:$0xff]  ;;  %v5499_v53 = vld [vmem:[%s8321_s12 + $0x88] sm:$0xff] }
 0x825   :  { %v7219_v12 = vmax.f32 %v2285_v6, 0.0 }
 0x827   :  { %2303 = vmatpush.msrb.mxu0 %v7219_v12  ;;  %2339 = vmatpush.msrb.mxu1 %v7219_v12 }
 0x828   :  { %2559 = vmatpush.msrb.mxu2 %v7219_v12 }
 0x829   :  { %2304 = vmatpush.msrb.mxu0 %v7221_v13  ;;  %2340 = vmatpush.msrb.mxu1 %v7221_v13 }
 0x82a   :  { %2560 = vmatpush.msrb.mxu2 %v7221_v13 }
 0x82b   :  { %2305 = vmatpush.msrb.mxu0 %v7226_v43  ;;  %2341 = vmatpush.msrb.mxu1 %v7226_v43 }
 0x82c   :  { %2561 = vmatpush.msrb.mxu2 %v7226_v43 }
 0x82d   :  { %2306 = vmatpush.msrb.mxu0 %v7231_v39  ;;  %2342 = vmatpush.msrb.mxu1 %v7231_v39 }
 0x82e   :  { %2562 = vmatpush.msrb.mxu2 %v7231_v39 }
 0x82f   :  { %2307 = vmatpush.msrb.mxu0 %v7236_v18  ;;  %2343 = vmatpush.msrb.mxu1 %v7236_v18 }
 0x830   :  { %2563 = vmatpush.msrb.mxu2 %v7236_v18  ;;  %5441 = vmatmul.msk.f32.vlgmr.msrb.gmra.mxu0 %vm270_vm1, %v6908_v41 }
 0x831   :  { %5446 = vmatmul.msk.f32.vlgmr.msrb.gmra.mxu1 %vm270_vm1, %v6915_v42  ;;  %2470 = vmatpush.msra.mxu0 %v7219_v12 }
 0x832   :  { %2523 = vmatpush.msra.mxu1 %v5473_v38 }
 0x833   :  { %2471 = vmatpush.msra.mxu0 %v7221_v13 }
 0x834   :  { %2524 = vmatpush.msra.mxu1 %v5472_v59 }
 0x835   :  { %2472 = vmatpush.msra.mxu0 %v7226_v43 }
 0x836   :  { %2525 = vmatpush.msra.mxu1 %v5471_v7 }
 0x837   :  { %2473 = vmatpush.msra.mxu0 %v7231_v39 }
 0x838   :  { %5442 = vmatmul.msk.f32.gmra.mxu0 %vm270_vm1, %v6922_v30  ;;  %2526 = vmatpush.msra.mxu1 %v5470_v9 }
 0x839   :  { %5447 = vmatmul.msk.f32.gmra.mxu1 %vm270_vm1, %v6929_v32  ;;  %2474 = vmatpush.msra.mxu0 %v7236_v18 }
 0x83a   :  { %2701 = vmatpush.msrb.mxu1 %v5501_v4 }
 0x83b   :  { %2648 = vmatpush.msrb.mxu0 %v7219_v12 }
 0x83c   :  { %2702 = vmatpush.msrb.mxu1 %v5500_v61 }
 0x83d   :  { %2649 = vmatpush.msrb.mxu0 %v7221_v13 }
 0x83e   :  { %2703 = vmatpush.msrb.mxu1 %v5499_v53 }
 0x83f   :  { %2650 = vmatpush.msrb.mxu0 %v7226_v43  ;;  %v5754_v43 = vld [vmem:[#allocation7] ss:$0 sm:$0xff] }
 0x840   :  { %5443 = vmatmul.msk.f32.gmra.mxu0 %vm270_vm1, %v6936_v8  ;;  %2704 = vmatpush.msrb.mxu1 %v5498_v47 }
 0x841   :  { %2651 = vmatpush.msrb.mxu0 %v7231_v39  ;;  %5448 = vmatmul.msk.f32.gmra.mxu1 %vm270_vm1, %v6943_v11 }
 0x843   :  { %2652 = vmatpush.msrb.mxu0 %v7236_v18 }
 0x848   :  { %5444 = vmatmul.msk.f32.gmra.mxu0 %vm270_vm1, %v6950_v62 }
 0x849   :  { %5449 = vmatmul.msk.f32.gmra.mxu1 %vm270_vm1, %v6957_v3 }
 0x850   :  { %5445 = vmatmul.msk.f32.gmra.mxu0 %vm270_vm1, %v6964_v55 }
 0x851   :  { %5450 = vmatmul.msk.f32.gmra.mxu1 %vm270_vm1, %v6971_v15 }
 0x858   :  { %5465 = vmatmul.msk.f32.vlgmr.msra.gmra.mxu0 %vm270_vm1, %v7277_v20 }
 0x860   :  { %5466 = vmatmul.msk.f32.gmra.mxu0 %vm270_vm1, %v7293_v45 }
 0x868   :  { %5467 = vmatmul.msk.f32.gmra.mxu0 %vm270_vm1, %v7300_v23 }
 0x870   :  { %5468 = vmatmul.msk.f32.gmra.mxu0 %vm270_vm1, %v7307_v50 }
 0x878   :  { %5469 = vmatmul.msk.f32.gmra.mxu0 %vm270_vm1, %v7019_v51 }
 0x880   :  { %5493 = vmatmul.msk.f32.vlgmr.msrb.gmra.mxu0 %vm270_vm1, %v7026_v44 }
 0x888   :  { %5494 = vmatmul.msk.f32.gmra.mxu0 %vm270_vm1, %v7033_v49 }
 0x890   :  { %5495 = vmatmul.msk.f32.gmra.mxu0 %vm270_vm1, %v7040_v52 }
 0x898   :  { %5496 = vmatmul.msk.f32.gmra.mxu0 %vm270_vm1, %v7050_v29 }
 0x8a0   :  { %5497 = vmatmul.msk.f32.gmra.mxu0 %vm270_vm1, %v7057_v56 }
 0x8ad   :  { %v2309_v57 = vpop.f32.mrf.mxu0 }
 0x8ae   :  { %v2345_v36 = vpop.f32.mrf.mxu1  ;;  %5460 = vmatmul.msk.f32.vlgmr.msrb.gmra.mxu3 %vm216_vm0, %v2309_v57 }
 0x8af   :  { %5455 = vmatmul.msk.f32.vlgmr.msra.gmra.mxu2 %vm216_vm0, %v2345_v36 }
 0x8b5   :  { %v2312_v5 = vpop.f32.mrf.mxu0 }
 0x8b6   :  { %v2348_v31 = vpop.f32.mrf.mxu1  ;;  %5461 = vmatmul.msk.f32.gmra.mxu3 %vm216_vm0, %v2312_v5 }
 0x8b7   :  { %5456 = vmatmul.msk.f32.gmra.mxu2 %vm216_vm0, %v2348_v31 }
 0x8bd   :  { %v2315_v1 = vpop.f32.mrf.mxu0 }
 0x8be   :  { %v2351_v46 = vpop.f32.mrf.mxu1  ;;  %5462 = vmatmul.msk.f32.gmra.mxu3 %vm216_vm0, %v2315_v1 }
 0x8bf   :  { %5457 = vmatmul.msk.f32.gmra.mxu2 %vm216_vm0, %v2351_v46 }
 0x8c5   :  { %v2318_v60 = vpop.f32.mrf.mxu0 }
 0x8c6   :  { %v2354_v17 = vpop.f32.mrf.mxu1  ;;  %5463 = vmatmul.msk.f32.gmra.mxu3 %vm216_vm0, %v2318_v60 }
 0x8c7   :  { %5458 = vmatmul.msk.f32.gmra.mxu2 %vm216_vm0, %v2354_v17 }
 0x8cd   :  { %v2321_v34 = vpop.f32.mrf.mxu0 }
 0x8ce   :  { %v2357_v48 = vpop.f32.mrf.mxu1  ;;  %5464 = vmatmul.msk.f32.gmra.mxu3 %vm216_vm0, %v2321_v34 }
 0x8cf   :  { %5459 = vmatmul.msk.f32.gmra.mxu2 %vm216_vm0, %v2357_v48 }
 0x8d5   :  { %v2476_v16 = vpop.f32.mrf.mxu0 }
 0x8d6   :  { %5474 = vmatmul.msk.f32.vlgmr.msra.gmra.mxu1 %vm216_vm0, %v2476_v16 }
 0x8d7   :  { %5479 = vmatmul.msk.f32.vlgmr.msrb.gmra.mxu2 %vm270_vm1, %v6803_v22 }
 0x8dd   :  { %v2479_v10 = vpop.f32.mrf.mxu0 }
 0x8de   :  { %5475 = vmatmul.msk.f32.gmra.mxu1 %vm216_vm0, %v2479_v10  ;;  %v5524_v10 = vld [vmem:[%s8321_s12 + $0xd8] sm:$0xff] }
 0x8df   :  { %5480 = vmatmul.msk.f32.gmra.mxu2 %vm270_vm1, %v6811_v2  ;;  %v5487_v2 = vld [vmem:[%s8321_s12 + $0x78] sm:$0xff]  ;;  %2842 = vmatpush.msra.mxu0 %v5524_v10 }
 0x8e0   :  { %2612 = vmatpush.msra.mxu3 %v5487_v2  ;;  %v5521_v2 = vld [vmem:[%s8321_s12 + $0xc0] sm:$0xff] }
 0x8e5   :  { %v2482_v19 = vpop.f32.mrf.mxu0 }
 0x8e6   :  { %5476 = vmatmul.msk.f32.gmra.mxu1 %vm216_vm0, %v2482_v19 }
 0x8e7   :  { %5481 = vmatmul.msk.f32.gmra.mxu2 %vm270_vm1, %v6819_v0  ;;  %v5486_v0 = vld [vmem:[%s8321_s12 + $0x70] sm:$0xff] }
 0x8e8   :  { %2613 = vmatpush.msra.mxu3 %v5486_v0 }
 0x8ed   :  { %v2485_v25 = vpop.f32.mrf.mxu0 }
 0x8ee   :  { %5477 = vmatmul.msk.f32.gmra.mxu1 %vm216_vm0, %v2485_v25  ;;  %v5523_v25 = vld [vmem:[%s8321_s12 + $0xd0] sm:$0xff] }
 0x8ef   :  { %5482 = vmatmul.msk.f32.gmra.mxu2 %vm270_vm1, %v6827_v40  ;;  %v5485_v40 = vld [vmem:[%s8321_s12 + $0x68] sm:$0xff]  ;;  %2843 = vmatpush.msra.mxu0 %v5523_v25 }
 0x8f0   :  { %2614 = vmatpush.msra.mxu3 %v5485_v40 }
 0x8f5   :  { %v2488_v14 = vpop.f32.mrf.mxu0 }
 0x8f6   :  { %5478 = vmatmul.msk.f32.gmra.mxu1 %vm216_vm0, %v2488_v14  ;;  %v5522_v14 = vld [vmem:[%s8321_s12 + $0xc8] sm:$0xff] }
 0x8f7   :  { %5483 = vmatmul.msk.f32.gmra.mxu2 %vm270_vm1, %v6835_v63  ;;  %v5484_v63 = vld [vmem:[%s8321_s12 + $0x60] sm:$0xff]  ;;  %2844 = vmatpush.msra.mxu0 %v5522_v14 }
 0x8f8   :  { %2615 = vmatpush.msra.mxu3 %v5484_v63 }
 0x8f9   :  { %2845 = vmatpush.msra.mxu0 %v5521_v2 }
 0x8fd   :  { %v2654_v6 = vpop.f32.mrf.mxu0 }
 0x8fe   :  { %5502 = vmatmul.msk.f32.vlgmr.msrb.gmra.mxu1 %vm216_vm0, %v2654_v6 }
 0x905   :  { %v2657_v37 = vpop.f32.mrf.mxu0 }
 0x906   :  { %5503 = vmatmul.msk.f32.gmra.mxu1 %vm216_vm0, %v2657_v37 }
 0x90d   :  { %v2660_v33 = vpop.f32.mrf.mxu0 }
 0x90e   :  { %5504 = vmatmul.msk.f32.gmra.mxu1 %vm216_vm0, %v2660_v33 }
 0x915   :  { %v2663_v24 = vpop.f32.mrf.mxu0 }
 0x916   :  { %5505 = vmatmul.msk.f32.gmra.mxu1 %vm216_vm0, %v2663_v24 }
 0x91d   :  { %v2666_v54 = vpop.f32.mrf.mxu0 }
 0x91e   :  { %5506 = vmatmul.msk.f32.gmra.mxu1 %vm216_vm0, %v2666_v54 }
 0x931   :  { %v2444_v7 = vpop.f32.mrf.mxu3 }
 0x932   :  { %v7363_v22 = vpop.f32.mrf.mxu2 }
 0x939   :  { %v2447_v9 = vpop.f32.mrf.mxu3 }
 0x93a   :  { %v2400_v27 = vpop.f32.mrf.mxu2 }
 0x93b   :  { %v2448_v37 = vadd.f32 %v2447_v9, %v2400_v27 }
 0x941   :  { %v2450_v1 = vpop.f32.mrf.mxu3 }
 0x942   :  { %v2403_v28 = vpop.f32.mrf.mxu2 }
 0x943   :  { %v2451_v47 = vadd.f32 %v2450_v1, %v2403_v28 }
 0x949   :  { %v2453_v60 = vpop.f32.mrf.mxu3 }
 0x94a   :  { %v2406_v35 = vpop.f32.mrf.mxu2 }
 0x94b   :  { %v2454_v53 = vadd.f32 %v2453_v60, %v2406_v35 }
 0x951   :  { %v2456_v34 = vpop.f32.mrf.mxu3 }
 0x952   :  { %v2409_v58 = vpop.f32.mrf.mxu2 }
 0x953   :  { %v2528_v59 = vpop.f32.mrf.mxu1  ;;  %v2457_v33 = vadd.f32 %v2456_v34, %v2409_v58  ;;  %v7490_v34 = vld [vmem:[%s8357_s19 + $0x78] sm:$0xff] }
 0x95a   :  { %v2565_v21 = vpop.f32.mrf.mxu2 }
 0x95b   :  { %5488 = vmatmul.msk.f32.vlgmr.msra.gmra.mxu3 %vm216_vm0, %v2565_v21  ;;  %v2531_v5 = vpop.f32.mrf.mxu1 }
 0x95c   :  { %v2544_v54 = vadd.f32 %v2531_v5, %v2448_v37  ;;  %v5557_v37 = vld [vmem:[%s8321_s12 + $0x118] sm:$0xff] }
 0x962   :  { %v2568_v26 = vpop.f32.mrf.mxu2 }
 0x963   :  { %5489 = vmatmul.msk.f32.gmra.mxu3 %vm216_vm0, %v2568_v26  ;;  %v2534_v31 = vpop.f32.mrf.mxu1  ;;  %v2445_v26 = vadd.f32 %v2444_v7, %v7363_v22 }
 0x964   :  { %v2545_v21 = vadd.f32 %v2534_v31, %v2451_v47  ;;  %v5570_v47 = vld [vmem:[%s8321_s12 + $0x130] sm:$0xff] }
 0x965   :  { %v2543_v25 = vadd.f32 %v2528_v59, %v2445_v26  ;;  %v5568_v26 = vld [vmem:[%s8321_s12 + $0x120] sm:$0xff] }
 0x96a   :  { %v2571_v57 = vpop.f32.mrf.mxu2 }
 0x96b   :  { %5490 = vmatmul.msk.f32.gmra.mxu3 %vm216_vm0, %v2571_v57  ;;  %v2537_v46 = vpop.f32.mrf.mxu1 }
 0x96c   :  { %v2546_v6 = vadd.f32 %v2537_v46, %v2454_v53  ;;  %v5571_v53 = vld [vmem:[%s8321_s12 + $0x138] sm:$0xff] }
 0x972   :  { %v2574_v36 = vpop.f32.mrf.mxu2 }
 0x973   :  { %5491 = vmatmul.msk.f32.gmra.mxu3 %vm216_vm0, %v2574_v36  ;;  %v2540_v17 = vpop.f32.mrf.mxu1 }
 0x974   :  { %v2547_v57 = vadd.f32 %v2540_v17, %v2457_v33  ;;  %v5569_v33 = vld [vmem:[%s8321_s12 + $0x128] sm:$0xff] }
 0x97a   :  { %v2577_v38 = vpop.f32.mrf.mxu2 }
 0x97b   :  { %5492 = vmatmul.msk.f32.gmra.mxu3 %vm216_vm0, %v2577_v38  ;;  %v2706_v48 = vpop.f32.mrf.mxu1 }
 0x983   :  { %v2709_v19 = vpop.f32.mrf.mxu1 }
 0x98b   :  { %v2712_v40 = vpop.f32.mrf.mxu1 }
 0x993   :  { %v2715_v4 = vpop.f32.mrf.mxu1 }
 0x99b   :  { %v2718_v10 = vpop.f32.mrf.mxu1 }
 0x9de   :  { %v2617_v16 = vpop.f32.mrf.mxu3 }
 0x9df   :  { %v2632_v39 = vadd.f32 %v2617_v16, %v2543_v25  ;;  %v7498_v16 = vld [vmem:[%s8357_s19 + $0x80] sm:$0xff] }
 0x9e1   :  { %v2721_v9 = vadd.f32 %v2706_v48, %v2632_v39 }
 0x9e3   :  { %v2729_v5 = vadd.f32 %v5754_v43, %v2721_v9 }
 0x9e6   :  { %v2620_v0 = vpop.f32.mrf.mxu3 }
 0x9e7   :  { %v2633_v14 = vadd.f32 %v2620_v0, %v2544_v54  ;;  %v7506_v0 = vld [vmem:[%s8357_s19 + $0x88] sm:$0xff] }
 0x9e8   :  { %v5555_v54 = vld [vmem:[%s8321_s12 + $0x108] sm:$0xff] }
 0x9e9   :  { %v2722_v1 = vadd.f32 %v2709_v19, %v2633_v14 }
 0x9eb   :  { %v2730_v22 = vadd.f32 %v5754_v43, %v2722_v1 }
 0x9ed   :  { %v2735_v60 = vmax.f32 %v2730_v22, 0.0 }
 0x9ee   :  { %v2623_v63 = vpop.f32.mrf.mxu3 }
 0x9ef   :  { %v2634_v36 = vadd.f32 %v2623_v63, %v2545_v21  ;;  %v7514_v63 = vld [vmem:[%s8357_s19 + $0x90] sm:$0xff] }
 0x9f0   :  { %v5556_v21 = vld [vmem:[%s8321_s12 + $0x110] sm:$0xff] }
 0x9f1   :  { %v2723_v35 = vadd.f32 %v2712_v40, %v2634_v36 }
 0x9f3   :  { %v2731_v31 = vadd.f32 %v5754_v43, %v2723_v35 }
 0x9f5   :  { %v2736_v59 = vmax.f32 %v2731_v31, 0.0 }
 0x9f6   :  { %v2626_v61 = vpop.f32.mrf.mxu3 }
 0x9f7   :  { %v2635_v24 = vadd.f32 %v2626_v61, %v2546_v6  ;;  %v7522_v61 = vld [vmem:[%s8357_s19 + $0x98] sm:$0xff] }
 0x9f9   :  { %v2724_v2 = vadd.f32 %v2715_v4, %v2635_v24 }
 0x9fb   :  { %v2732_v27 = vadd.f32 %v5754_v43, %v2724_v2 }
 0x9fd   :  { %v2737_v7 = vmax.f32 %v2732_v27, 0.0 }
 0x9fe   :  { %v2629_v38 = vpop.f32.mrf.mxu3 }
 0x9ff   :  { %v2636_v18 = vadd.f32 %v2629_v38, %v2547_v57  ;;  %v5554_v57 = vld [vmem:[%s8321_s12 + $0x100] sm:$0xff] }
 0xa01   :  { %v2725_v28 = vadd.f32 %v2718_v10, %v2636_v18  ;;  %v2734_v18 = vmax.f32 %v2729_v5, 0.0 }
 0xa03   :  { %v2733_v58 = vadd.f32 %v5754_v43, %v2725_v28 }
 0xa05   :  { %v2738_v46 = vmax.f32 %v2733_v58, 0.0 }
 0xa07   :  { %2752 = vmatpush.msra.mxu2 %v2738_v46  ;;  %2789 = vmatpush.msrb.mxu3 %v2738_v46 }
 0xa08   :  { %3009 = vmatpush.msrb.mxu0 %v2738_v46 }
 0xa09   :  { %2753 = vmatpush.msra.mxu2 %v2737_v7  ;;  %2790 = vmatpush.msrb.mxu3 %v2737_v7 }
 0xa0a   :  { %3010 = vmatpush.msrb.mxu0 %v2737_v7 }
 0xa0b   :  { %2754 = vmatpush.msra.mxu2 %v2736_v59  ;;  %2791 = vmatpush.msrb.mxu3 %v2736_v59 }
 0xa0c   :  { %3011 = vmatpush.msrb.mxu0 %v2736_v59 }
 0xa0d   :  { %2755 = vmatpush.msra.mxu2 %v2735_v60  ;;  %2792 = vmatpush.msrb.mxu3 %v2735_v60 }
 0xa0e   :  { %3012 = vmatpush.msrb.mxu0 %v2735_v60 }
 0xa0f   :  { %2756 = vmatpush.msra.mxu2 %v2734_v18  ;;  %2793 = vmatpush.msrb.mxu3 %v2734_v18 }
 0xa10   :  { %3013 = vmatpush.msrb.mxu0 %v2734_v18  ;;  %5507 = vmatmul.msk.f32.vlgmr.msra.gmra.mxu2 %vm270_vm1, %v6908_v41  ;;  %v5515_v41 = vld [vmem:[%s8321_s12 + $0xb8] sm:$0xff] }
 0xa11   :  { %5516 = vmatmul.msk.f32.vlgmr.msrb.gmra.mxu3 %vm270_vm1, %v6915_v42  ;;  %2920 = vmatpush.msrb.mxu2 %v2738_v46  ;;  %v5514_v42 = vld [vmem:[%s8321_s12 + $0xb0] sm:$0xff] }
 0xa12   :  { %2889 = vmatpush.msra.mxu1 %v5515_v41 }
 0xa13   :  { %2921 = vmatpush.msrb.mxu2 %v2737_v7 }
 0xa14   :  { %2890 = vmatpush.msra.mxu1 %v5514_v42 }
 0xa15   :  { %2922 = vmatpush.msrb.mxu2 %v2736_v59 }
 0xa17   :  { %2923 = vmatpush.msrb.mxu2 %v2735_v60 }
 0xa18   :  { %5508 = vmatmul.msk.f32.gmra.mxu2 %vm270_vm1, %v6922_v30  ;;  %v5513_v30 = vld [vmem:[%s8321_s12 + $0xa8] sm:$0xff] }
 0xa19   :  { %5517 = vmatmul.msk.f32.gmra.mxu3 %vm270_vm1, %v6929_v32  ;;  %2924 = vmatpush.msrb.mxu2 %v2734_v18  ;;  %v5512_v32 = vld [vmem:[%s8321_s12 + $0xa0] sm:$0xff] }
 0xa1a   :  { %2891 = vmatpush.msra.mxu1 %v5513_v30 }
 0xa1b   :  { %3098 = vmatpush.msra.mxu2 %v2738_v46 }
 0xa1c   :  { %2892 = vmatpush.msra.mxu1 %v5512_v32 }
 0xa1d   :  { %3099 = vmatpush.msra.mxu2 %v2737_v7 }
 0xa1e   :  { %3062 = vmatpush.msrb.mxu1 %v5557_v37 }
 0xa1f   :  { %3100 = vmatpush.msra.mxu2 %v2736_v59 }
 0xa20   :  { %5509 = vmatmul.msk.f32.gmra.mxu2 %vm270_vm1, %v6936_v8  ;;  %3063 = vmatpush.msrb.mxu1 %v5556_v21 }
 0xa21   :  { %3101 = vmatpush.msra.mxu2 %v2735_v60  ;;  %5518 = vmatmul.msk.f32.gmra.mxu3 %vm270_vm1, %v6943_v11 }
 0xa22   :  { %3064 = vmatpush.msrb.mxu1 %v5555_v54 }
 0xa23   :  { %3102 = vmatpush.msra.mxu2 %v2734_v18 }
 0xa24   :  { %3065 = vmatpush.msrb.mxu1 %v5554_v57 }
 0xa28   :  { %5510 = vmatmul.msk.f32.gmra.mxu2 %vm270_vm1, %v6950_v62  ;;  %v5543_v62 = vld [vmem:[%s8321_s12 + $0xf8] sm:$0xff] }
 0xa29   :  { %5519 = vmatmul.msk.f32.gmra.mxu3 %vm270_vm1, %v6957_v3  ;;  %v5542_v3 = vld [vmem:[%s8321_s12 + $0xf0] sm:$0xff] }
 0xa2a   :  { %2973 = vmatpush.msra.mxu3 %v5543_v62  ;;  %v5590_v62 = vld [vmem:[%s8323_s14 + $0x38] sm:$0xff] }
 0xa2c   :  { %2974 = vmatpush.msra.mxu3 %v5542_v3  ;;  %v5589_v3 = vld [vmem:[%s8323_s14 + $0x30] sm:$0xff] }
 0xa30   :  { %5511 = vmatmul.msk.f32.gmra.mxu2 %vm270_vm1, %v6964_v55  ;;  %v5541_v55 = vld [vmem:[%s8321_s12 + $0xe8] sm:$0xff] }
 0xa31   :  { %5520 = vmatmul.msk.f32.gmra.mxu3 %vm270_vm1, %v6971_v15 }
 0xa32   :  { %2975 = vmatpush.msra.mxu3 %v5541_v55  ;;  %v5588_v55 = vld [vmem:[%s8323_s14 + $0x28] sm:$0xff] }
 0xa38   :  { %5535 = vmatmul.msk.f32.vlgmr.msrb.gmra.mxu2 %vm270_vm1, %v7277_v20 }
 0xa39   :  { %3295 = vmatpush.msrb.mxu2 %v5590_v62  ;;  %v5908_v62 = vld [vmem:[%s8357_s19 + $0x38] sm:$0xff] }
 0xa3b   :  { %3296 = vmatpush.msrb.mxu2 %v5589_v3  ;;  %v5909_v3 = vld [vmem:[%s8357_s19 + $0x18] sm:$0xff] }
 0xa3d   :  { %3297 = vmatpush.msrb.mxu2 %v5588_v55  ;;  %v5910_v55 = vld [vmem:[%s8357_s19 + $0x40] sm:$0xff] }
 0xa40   :  { %5536 = vmatmul.msk.f32.gmra.mxu2 %vm270_vm1, %v7293_v45 }
 0xa48   :  { %5537 = vmatmul.msk.f32.gmra.mxu2 %vm270_vm1, %v7300_v23 }
 0xa50   :  { %5538 = vmatmul.msk.f32.gmra.mxu2 %vm270_vm1, %v7307_v50 }
 0xa58   :  { %5539 = vmatmul.msk.f32.gmra.mxu2 %vm270_vm1, %v7019_v51  ;;  %v5540_v51 = vld [vmem:[%s8321_s12 + $0xe0] sm:$0xff] }
 0xa59   :  { %2976 = vmatpush.msra.mxu3 %v5540_v51  ;;  %v5587_v51 = vld [vmem:[%s8323_s14 + $0x20] sm:$0xff] }
 0xa5a   :  { %3298 = vmatpush.msrb.mxu2 %v5587_v51  ;;  %v5912_v51 = vld [vmem:[%s8357_s19 + $0x48] sm:$0xff] }
 0xa5b   :  { %3151 = vmatpush.msrb.mxu3 %v5571_v53 }
 0xa5d   :  { %3152 = vmatpush.msrb.mxu3 %v5570_v47 }
 0xa5f   :  { %3153 = vmatpush.msrb.mxu3 %v5569_v33 }
 0xa60   :  { %5563 = vmatmul.msk.f32.vlgmr.msra.gmra.mxu2 %vm270_vm1, %v7026_v44 }
 0xa61   :  { %3154 = vmatpush.msrb.mxu3 %v5568_v26 }
 0xa68   :  { %5564 = vmatmul.msk.f32.gmra.mxu2 %vm270_vm1, %v7033_v49 }
 0xa70   :  { %5565 = vmatmul.msk.f32.gmra.mxu2 %vm270_vm1, %v7040_v52 }
 0xa78   :  { %5566 = vmatmul.msk.f32.gmra.mxu2 %vm270_vm1, %v7050_v29 }
 0xa80   :  { %5567 = vmatmul.msk.f32.gmra.mxu2 %vm270_vm1, %v7057_v56 }
 0xa93   :  { %v2758_v8 = vpop.f32.mrf.mxu2 }
 0xa94   :  { %v2795_v11 = vpop.f32.mrf.mxu3  ;;  %5530 = vmatmul.msk.f32.vlgmr.msra.gmra.mxu1 %vm216_vm0, %v2758_v8 }
 0xa95   :  { %5525 = vmatmul.msk.f32.vlgmr.msra.gmra.mxu0 %vm216_vm0, %v2795_v11 }
 0xa9b   :  { %v2761_v15 = vpop.f32.mrf.mxu2 }
 0xa9c   :  { %v2798_v44 = vpop.f32.mrf.mxu3  ;;  %5531 = vmatmul.msk.f32.gmra.mxu1 %vm216_vm0, %v2761_v15 }
 0xa9d   :  { %5526 = vmatmul.msk.f32.gmra.mxu0 %vm216_vm0, %v2798_v44 }
 0xaa3   :  { %v2764_v49 = vpop.f32.mrf.mxu2 }
 0xaa4   :  { %v2801_v52 = vpop.f32.mrf.mxu3  ;;  %5532 = vmatmul.msk.f32.gmra.mxu1 %vm216_vm0, %v2764_v49 }
 0xaa5   :  { %5527 = vmatmul.msk.f32.gmra.mxu0 %vm216_vm0, %v2801_v52 }
 0xaab   :  { %v2767_v29 = vpop.f32.mrf.mxu2 }
 0xaac   :  { %v2804_v56 = vpop.f32.mrf.mxu3  ;;  %5533 = vmatmul.msk.f32.gmra.mxu1 %vm216_vm0, %v2767_v29 }
 0xaad   :  { %5528 = vmatmul.msk.f32.gmra.mxu0 %vm216_vm0, %v2804_v56 }
 0xab3   :  { %v2770_v43 = vpop.f32.mrf.mxu2 }
 0xab4   :  { %v2807_v39 = vpop.f32.mrf.mxu3  ;;  %5534 = vmatmul.msk.f32.gmra.mxu1 %vm216_vm0, %v2770_v43 }
 0xab5   :  { %5529 = vmatmul.msk.f32.gmra.mxu0 %vm216_vm0, %v2807_v39 }
 0xabb   :  { %v2926_v17 = vpop.f32.mrf.mxu2 }
 0xabc   :  { %5544 = vmatmul.msk.f32.vlgmr.msra.gmra.mxu3 %vm216_vm0, %v2926_v17 }
 0xabd   :  { %5549 = vmatmul.msk.f32.vlgmr.msrb.gmra.mxu0 %vm270_vm1, %v7490_v34 }
 0xac3   :  { %v2929_v48 = vpop.f32.mrf.mxu2 }
 0xac4   :  { %5545 = vmatmul.msk.f32.gmra.mxu3 %vm216_vm0, %v2929_v48 }
 0xac5   :  { %5550 = vmatmul.msk.f32.gmra.mxu0 %vm270_vm1, %v7498_v16 }
 0xacb   :  { %v2932_v19 = vpop.f32.mrf.mxu2 }
 0xacc   :  { %5546 = vmatmul.msk.f32.gmra.mxu3 %vm216_vm0, %v2932_v19 }
 0xacd   :  { %5551 = vmatmul.msk.f32.gmra.mxu0 %vm270_vm1, %v7506_v0 }
 0xad3   :  { %v2935_v40 = vpop.f32.mrf.mxu2 }
 0xad4   :  { %5547 = vmatmul.msk.f32.gmra.mxu3 %vm216_vm0, %v2935_v40 }
 0xad5   :  { %5552 = vmatmul.msk.f32.gmra.mxu0 %vm270_vm1, %v7514_v63 }
 0xadb   :  { %v2938_v4 = vpop.f32.mrf.mxu2 }
 0xadc   :  { %5548 = vmatmul.msk.f32.gmra.mxu3 %vm216_vm0, %v2938_v4 }
 0xadd   :  { %5553 = vmatmul.msk.f32.gmra.mxu0 %vm270_vm1, %v7522_v61 }
 0xae3   :  { %v3104_v24 = vpop.f32.mrf.mxu2 }
 0xae4   :  { %5572 = vmatmul.msk.f32.vlgmr.msrb.gmra.mxu3 %vm216_vm0, %v3104_v24 }
 0xaeb   :  { %v3107_v38 = vpop.f32.mrf.mxu2 }
 0xaec   :  { %5573 = vmatmul.msk.f32.gmra.mxu3 %vm216_vm0, %v3107_v38  ;;  %v5755_v38 = vld [vmem:[#allocation7 + $0x1] ss:$0 sm:$0xff] }
 0xaf3   :  { %v3110_v25 = vpop.f32.mrf.mxu2 }
 0xaf4   :  { %5574 = vmatmul.msk.f32.gmra.mxu3 %vm216_vm0, %v3110_v25 }
 0xafb   :  { %v3113_v2 = vpop.f32.mrf.mxu2 }
 0xafc   :  { %5575 = vmatmul.msk.f32.gmra.mxu3 %vm216_vm0, %v3113_v2 }
 0xb03   :  { %v3116_v28 = vpop.f32.mrf.mxu2 }
 0xb04   :  { %5576 = vmatmul.msk.f32.gmra.mxu3 %vm216_vm0, %v3116_v28 }
 0xb11   :  { %v2894_v22 = vpop.f32.mrf.mxu1 }
 0xb12   :  { %v7532_v6 = vpop.f32.mrf.mxu0 }
 0xb13   :  { %v2895_v40 = vadd.f32 %v2894_v22, %v7532_v6 }
 0xb19   :  { %v2897_v5 = vpop.f32.mrf.mxu1 }
 0xb1a   :  { %v2850_v36 = vpop.f32.mrf.mxu0 }
 0xb1b   :  { %v2898_v17 = vadd.f32 %v2897_v5, %v2850_v36 }
 0xb21   :  { %v2900_v60 = vpop.f32.mrf.mxu1 }
 0xb22   :  { %v2853_v10 = vpop.f32.mrf.mxu0 }
 0xb23   :  { %v2901_v43 = vadd.f32 %v2900_v60, %v2853_v10  ;;  %v8369_v60 = vld [vmem:[#allocation26_spill] sm:$0xff] }
 0xb29   :  { %v2903_v41 = vpop.f32.mrf.mxu1 }
 0xb2a   :  { %v2856_v14 = vpop.f32.mrf.mxu0 }
 0xb2b   :  { %v2904_v29 = vadd.f32 %v2903_v41, %v2856_v14 }
 0xb31   :  { %v2906_v30 = vpop.f32.mrf.mxu1 }
 0xb32   :  { %v2859_v35 = vpop.f32.mrf.mxu0 }
 0xb33   :  { %v2907_v4 = vadd.f32 %v2906_v30, %v2859_v35  ;;  %v5904_v30 = vld [vmem:[%s8357_s19 + $0x28] sm:$0xff] }
 0xb3a   :  { %v3015_v1 = vpop.f32.mrf.mxu0 }
 0xb3b   :  { %5558 = vmatmul.msk.f32.vlgmr.msrb.gmra.mxu1 %vm216_vm0, %v3015_v1 }
 0xb3f   :  { %v2978_v46 = vpop.f32.mrf.mxu3 }
 0xb40   :  { %v2993_v37 = vadd.f32 %v2978_v46, %v2895_v40  ;;  %v5607_v40 = vld [vmem:[%s8323_s14 + $0x48] sm:$0xff] }
 0xb42   :  { %v3018_v27 = vpop.f32.mrf.mxu0 }
 0xb43   :  { %5559 = vmatmul.msk.f32.gmra.mxu1 %vm216_vm0, %v3018_v27 }
 0xb47   :  { %v2981_v7 = vpop.f32.mrf.mxu3 }
 0xb48   :  { %v2994_v53 = vadd.f32 %v2981_v7, %v2898_v17  ;;  %v8368_v7 = vld [vmem:[#allocation25_spill] sm:$0xff] }
 0xb4a   :  { %v3021_v58 = vpop.f32.mrf.mxu0 }
 0xb4b   :  { %5560 = vmatmul.msk.f32.gmra.mxu1 %vm216_vm0, %v3021_v58 }
 0xb4f   :  { %v2984_v59 = vpop.f32.mrf.mxu3 }
 0xb50   :  { %v2995_v48 = vadd.f32 %v2984_v59, %v2901_v43  ;;  %v5918_v43 = vld [vmem:[%s8357_s19 + $0xc0] sm:$0xff] }
 0xb52   :  { %v3024_v9 = vpop.f32.mrf.mxu0 }
 0xb53   :  { %5561 = vmatmul.msk.f32.gmra.mxu1 %vm216_vm0, %v3024_v9 }
 0xb57   :  { %v2987_v18 = vpop.f32.mrf.mxu3 }
 0xb58   :  { %v2996_v39 = vadd.f32 %v2987_v18, %v2904_v29  ;;  %v5914_v29 = vld [vmem:[%s8357_s19 + $0xa0] sm:$0xff] }
 0xb5a   :  { %v3027_v31 = vpop.f32.mrf.mxu0 }
 0xb5b   :  { %5562 = vmatmul.msk.f32.gmra.mxu1 %vm216_vm0, %v3027_v31  ;;  %v8367_v31 = vld [vmem:[#allocation24_spill] sm:$0xff] }
 0xb5f   :  { %v2990_v42 = vpop.f32.mrf.mxu3 }
 0xb60   :  { %v2997_v33 = vadd.f32 %v2990_v42, %v2907_v4 }
 0xb67   :  { %v3156_v32 = vpop.f32.mrf.mxu3 }
 0xb6f   :  { %v3159_v11 = vpop.f32.mrf.mxu3 }
 0xb77   :  { %v3162_v44 = vpop.f32.mrf.mxu3 }
 0xb7f   :  { %v3165_v52 = vpop.f32.mrf.mxu3 }
 0xb87   :  { %v3168_v54 = vpop.f32.mrf.mxu3 }
 0xbb8   :  { %v3067_v8 = vpop.f32.mrf.mxu1 }
 0xbb9   :  { %v3082_v57 = vadd.f32 %v3067_v8, %v2993_v37  ;;  %v5906_v8 = vld [vmem:[%s8357_s19 + $0x30] sm:$0xff] }
 0xbbb   :  { %v3171_v28 = vadd.f32 %v3156_v32, %v3082_v57  ;;  %v5905_v32 = vld [vmem:[%s8357_s19 + $0x8] sm:$0xff] }
 0xbbd   :  { %v3179_v9 = vadd.f32 %v5755_v38, %v3171_v28  ;;  %v5636_v28 = vld [vmem:[%s8323_s14 + $0x90] sm:$0xff] }
 0xbbf   :  { %v3184_v18 = vadd.f32 %v3179_v9, %v8369_v60 }
 0xbc0   :  { %v3070_v15 = vpop.f32.mrf.mxu1 }
 0xbc1   :  { %v3083_v21 = vadd.f32 %v3070_v15, %v2994_v53  ;;  %v5911_v15 = vld [vmem:[%s8357_s19 + $0x20] sm:$0xff] }
 0xbc2   :  { %v5606_v53 = vld [vmem:[%s8323_s14 + $0x40] sm:$0xff] }
 0xbc3   :  { %v3172_v10 = vadd.f32 %v3159_v11, %v3083_v21  ;;  %v5907_v11 = vld [vmem:[%s8357_s19 + $0x10] sm:$0xff] }
 0xbc5   :  { %v3180_v6 = vadd.f32 %v5755_v38, %v3172_v10 }
 0xbc7   :  { %v3185_v5 = vadd.f32 %v3180_v6, %v8368_v7 }
 0xbc8   :  { %v3073_v49 = vpop.f32.mrf.mxu1 }
 0xbc9   :  { %v3084_v47 = vadd.f32 %v3073_v49, %v2995_v48  ;;  %v3190_v42 = vmax.f32 %v3185_v5, 0.0  ;;  %v3229_v49 = vld [vmem:[%s8323_s14 + $0x10] sm:$0xff]  ;;  %v5609_v48 = vld [vmem:[%s8323_s14 + $0x58] sm:$0xff] }
 0xbcb   :  { %v3173_v25 = vadd.f32 %v3162_v44, %v3084_v47  ;;  %v3230_v44 = vld [vmem:[%s8323_s14 + $0x18] sm:$0xff] }
 0xbcc   :  { %3342 = vmatpush.msra.mxu3 %v3230_v44 }
 0xbcd   :  { %v3181_v1 = vadd.f32 %v5755_v38, %v3173_v25 }
 0xbce   :  { %3343 = vmatpush.msra.mxu3 %v3229_v49 }
 0xbcf   :  { %v3186_v46 = vadd.f32 %v3181_v1, %v8367_v31  ;;  %v5635_v1 = vld [vmem:[%s8323_s14 + $0x88] sm:$0xff] }
 0xbd0   :  { %v3076_v56 = vpop.f32.mrf.mxu1 }
 0xbd1   :  { %v3085_v19 = vadd.f32 %v3076_v56, %v2996_v39  ;;  %v3191_v41 = vmax.f32 %v3186_v46, 0.0  ;;  %v5917_v56 = vld [vmem:[%s8357_s19 + $0xb8] sm:$0xff] }
 0xbd3   :  { %v3174_v24 = vadd.f32 %v3165_v52, %v3085_v19  ;;  %v3228_v52 = vld [vmem:[%s8323_s14 + $0x8] sm:$0xff]  ;;  %v5608_v19 = vld [vmem:[%s8323_s14 + $0x50] sm:$0xff] }
 0xbd4   :  { %3344 = vmatpush.msra.mxu3 %v3228_v52 }
 0xbd5   :  { %v3182_v2 = vadd.f32 %v5755_v38, %v3174_v24 }
 0xbd7   :  { %v3187_v35 = vadd.f32 %v3182_v2, %v7221_v13  ;;  %v5903_v13 = vld [vmem:[%s8357_s19] sm:$0xff] }
 0xbd8   :  { %v3079_v26 = vpop.f32.mrf.mxu1 }
 0xbd9   :  { %v3086_v14 = vadd.f32 %v3079_v26, %v2997_v33  ;;  %v3192_v59 = vmax.f32 %v3187_v35, 0.0 }
 0xbdb   :  { %v3175_v36 = vadd.f32 %v3168_v54, %v3086_v14 }
 0xbdd   :  { %v3183_v27 = vadd.f32 %v5755_v38, %v3175_v36  ;;  %v5637_v36 = vld [vmem:[%s8323_s14 + $0x98] sm:$0xff] }
 0xbdf   :  { %v3188_v58 = vadd.f32 %v3183_v27, %v7219_v12  ;;  %v3189_v12 = vmax.f32 %v3184_v18, 0.0  ;;  %v5634_v27 = vld [vmem:[%s8323_s14 + $0x80] sm:$0xff] }
 0xbe1   :  { %v3193_v22 = vmax.f32 %v3188_v58, 0.0 }
 0xbe3   :  { %3206 = vmatpush.msra.mxu0 %v3193_v22  ;;  %3242 = vmatpush.msra.mxu1 %v3193_v22 }
 0xbe4   :  { %3462 = vmatpush.msra.mxu2 %v3193_v22 }
 0xbe5   :  { %3207 = vmatpush.msra.mxu0 %v3192_v59  ;;  %3243 = vmatpush.msra.mxu1 %v3192_v59 }
 0xbe6   :  { %3463 = vmatpush.msra.mxu2 %v3192_v59 }
 0xbe7   :  { %3208 = vmatpush.msra.mxu0 %v3191_v41  ;;  %3244 = vmatpush.msra.mxu1 %v3191_v41 }
 0xbe8   :  { %3464 = vmatpush.msra.mxu2 %v3191_v41 }
 0xbe9   :  { %3209 = vmatpush.msra.mxu0 %v3190_v42  ;;  %3245 = vmatpush.msra.mxu1 %v3190_v42 }
 0xbea   :  { %3465 = vmatpush.msra.mxu2 %v3190_v42 }
 0xbeb   :  { %3210 = vmatpush.msra.mxu0 %v3189_v12  ;;  %3246 = vmatpush.msra.mxu1 %v3189_v12 }
 0xbec   :  { %3466 = vmatpush.msra.mxu2 %v3189_v12  ;;  %5577 = vmatmul.msk.f32.vlgmr.msra.gmra.mxu0 %vm270_vm1, %v5903_v13 }
 0xbed   :  { %5582 = vmatmul.msk.f32.vlgmr.msra.gmra.mxu1 %vm270_vm1, %v5904_v30  ;;  %3373 = vmatpush.msrb.mxu0 %v3193_v22 }
 0xbee   :  { %3426 = vmatpush.msrb.mxu1 %v5609_v48 }
 0xbef   :  { %3374 = vmatpush.msrb.mxu0 %v3192_v59 }
 0xbf0   :  { %3427 = vmatpush.msrb.mxu1 %v5608_v19 }
 0xbf1   :  { %3375 = vmatpush.msrb.mxu0 %v3191_v41 }
 0xbf2   :  { %3428 = vmatpush.msrb.mxu1 %v5607_v40 }
 0xbf3   :  { %3376 = vmatpush.msrb.mxu0 %v3190_v42 }
 0xbf4   :  { %5578 = vmatmul.msk.f32.gmra.mxu0 %vm270_vm1, %v5905_v32  ;;  %3429 = vmatpush.msrb.mxu1 %v5606_v53 }
 0xbf5   :  { %5583 = vmatmul.msk.f32.gmra.mxu1 %vm270_vm1, %v5906_v8  ;;  %3377 = vmatpush.msrb.mxu0 %v3189_v12 }
 0xbf6   :  { %3604 = vmatpush.msra.mxu1 %v5637_v36  ;;  %v5652_v36 = vld [vmem:[%s8325_s16 + $0x18] sm:$0xff] }
 0xbf7   :  { %3551 = vmatpush.msra.mxu0 %v3193_v22 }
 0xbf8   :  { %3605 = vmatpush.msra.mxu1 %v5636_v28  ;;  %v5658_v28 = vld [vmem:[%s8325_s16 + $0x28] sm:$0xff] }
 0xbf9   :  { %3552 = vmatpush.msra.mxu0 %v3192_v59 }
 0xbfa   :  { %3606 = vmatpush.msra.mxu1 %v5635_v1 }
 0xbfb   :  { %3553 = vmatpush.msra.mxu0 %v3191_v41 }
 0xbfc   :  { %5579 = vmatmul.msk.f32.gmra.mxu0 %vm270_vm1, %v5907_v11  ;;  %3607 = vmatpush.msra.mxu1 %v5634_v27 }
 0xbfd   :  { %3554 = vmatpush.msra.mxu0 %v3190_v42  ;;  %5584 = vmatmul.msk.f32.gmra.mxu1 %vm270_vm1, %v5908_v62 }
 0xbff   :  { %3555 = vmatpush.msra.mxu0 %v3189_v12 }
 0xc04   :  { %5580 = vmatmul.msk.f32.gmra.mxu0 %vm270_vm1, %v5909_v3 }
 0xc05   :  { %5585 = vmatmul.msk.f32.gmra.mxu1 %vm270_vm1, %v5910_v55 }
 0xc0c   :  { %5581 = vmatmul.msk.f32.gmra.mxu0 %vm270_vm1, %v5911_v15 }
 0xc0d   :  { %5586 = vmatmul.msk.f32.gmra.mxu1 %vm270_vm1, %v5912_v51 }
 0xc14   :  { %5601 = vmatmul.msk.f32.vlgmr.msrb.gmra.mxu0 %vm270_vm1, %v7277_v20  ;;  %v5913_v20 = vld [vmem:[%s8357_s19 + $0x70] sm:$0xff] }
 0xc15   :  { %3794 = vmatpush.msrb.mxu0 %v5658_v28 }
 0xc1c   :  { %5602 = vmatmul.msk.f32.gmra.mxu0 %vm270_vm1, %v7293_v45  ;;  %v5915_v45 = vld [vmem:[%s8357_s19 + $0xa8] sm:$0xff] }
 0xc24   :  { %5603 = vmatmul.msk.f32.gmra.mxu0 %vm270_vm1, %v7300_v23  ;;  %v3227_v23 = vld [vmem:[%s8323_s14] sm:$0xff] }
 0xc25   :  { %3345 = vmatpush.msra.mxu3 %v3227_v23 }
 0xc2c   :  { %5604 = vmatmul.msk.f32.gmra.mxu0 %vm270_vm1, %v7307_v50  ;;  %v5916_v50 = vld [vmem:[%s8357_s19 + $0xb0] sm:$0xff] }
 0xc34   :  { %5605 = vmatmul.msk.f32.gmra.mxu0 %vm270_vm1, %v5913_v20 }
 0xc3c   :  { %5629 = vmatmul.msk.f32.vlgmr.msra.gmra.mxu0 %vm270_vm1, %v5914_v29 }
 0xc44   :  { %5630 = vmatmul.msk.f32.gmra.mxu0 %vm270_vm1, %v5915_v45 }
 0xc4c   :  { %5631 = vmatmul.msk.f32.gmra.mxu0 %vm270_vm1, %v5916_v50 }
 0xc54   :  { %5632 = vmatmul.msk.f32.gmra.mxu0 %vm270_vm1, %v5917_v56 }
 0xc5c   :  { %5633 = vmatmul.msk.f32.gmra.mxu0 %vm270_vm1, %v5918_v43 }
 0xc69   :  { %v3212_v39 = vpop.f32.mrf.mxu0 }
 0xc6a   :  { %v3248_v17 = vpop.f32.mrf.mxu1  ;;  %5596 = vmatmul.msk.f32.vlgmr.msra.gmra.mxu3 %vm216_vm0, %v3212_v39 }
 0xc6b   :  { %5591 = vmatmul.msk.f32.vlgmr.msrb.gmra.mxu2 %vm216_vm0, %v3248_v17 }
 0xc71   :  { %v3215_v4 = vpop.f32.mrf.mxu0 }
 0xc72   :  { %v3251_v47 = vpop.f32.mrf.mxu1  ;;  %5597 = vmatmul.msk.f32.gmra.mxu3 %vm216_vm0, %v3215_v4 }
 0xc73   :  { %5592 = vmatmul.msk.f32.gmra.mxu2 %vm216_vm0, %v3251_v47 }
 0xc79   :  { %v3218_v37 = vpop.f32.mrf.mxu0 }
 0xc7a   :  { %v3254_v33 = vpop.f32.mrf.mxu1  ;;  %5598 = vmatmul.msk.f32.gmra.mxu3 %vm216_vm0, %v3218_v37 }
 0xc7b   :  { %5593 = vmatmul.msk.f32.gmra.mxu2 %vm216_vm0, %v3254_v33 }
 0xc81   :  { %v3221_v21 = vpop.f32.mrf.mxu0 }
 0xc82   :  { %v3257_v24 = vpop.f32.mrf.mxu1  ;;  %5599 = vmatmul.msk.f32.gmra.mxu3 %vm216_vm0, %v3221_v21 }
 0xc83   :  { %5594 = vmatmul.msk.f32.gmra.mxu2 %vm216_vm0, %v3257_v24 }
 0xc89   :  { %v3224_v26 = vpop.f32.mrf.mxu0 }
 0xc8a   :  { %v3260_v54 = vpop.f32.mrf.mxu1  ;;  %5600 = vmatmul.msk.f32.gmra.mxu3 %vm216_vm0, %v3224_v26 }
 0xc8b   :  { %5595 = vmatmul.msk.f32.gmra.mxu2 %vm216_vm0, %v3260_v54 }
 0xc91   :  { %v3379_v57 = vpop.f32.mrf.mxu0 }
 0xc92   :  { %5610 = vmatmul.msk.f32.vlgmr.msrb.gmra.mxu1 %vm216_vm0, %v3379_v57  ;;  %v5756_v57 = vld [vmem:[#allocation8] ss:$0 sm:$0xff] }
 0xc93   :  { %5615 = vmatmul.msk.f32.vlgmr.msra.gmra.mxu2 %vm270_vm1, %v7490_v34 }
 0xc99   :  { %v3382_v38 = vpop.f32.mrf.mxu0 }
 0xc9a   :  { %5611 = vmatmul.msk.f32.gmra.mxu1 %vm216_vm0, %v3382_v38 }
 0xc9b   :  { %5616 = vmatmul.msk.f32.gmra.mxu2 %vm270_vm1, %v7498_v16  ;;  %v5623_v16 = vld [vmem:[%s8323_s14 + $0x78] sm:$0xff] }
 0xc9c   :  { %3515 = vmatpush.msrb.mxu3 %v5623_v16 }
 0xca1   :  { %v3385_v25 = vpop.f32.mrf.mxu0 }
 0xca2   :  { %5612 = vmatmul.msk.f32.gmra.mxu1 %vm216_vm0, %v3385_v25 }
 0xca3   :  { %5617 = vmatmul.msk.f32.gmra.mxu2 %vm270_vm1, %v7506_v0  ;;  %v5622_v0 = vld [vmem:[%s8323_s14 + $0x70] sm:$0xff] }
 0xca4   :  { %3516 = vmatpush.msrb.mxu3 %v5622_v0 }
 0xca9   :  { %v3388_v14 = vpop.f32.mrf.mxu0 }
 0xcaa   :  { %5613 = vmatmul.msk.f32.gmra.mxu1 %vm216_vm0, %v3388_v14 }
 0xcab   :  { %5618 = vmatmul.msk.f32.gmra.mxu2 %vm270_vm1, %v7514_v63  ;;  %v5621_v63 = vld [vmem:[%s8323_s14 + $0x68] sm:$0xff] }
 0xcac   :  { %3517 = vmatpush.msrb.mxu3 %v5621_v63 }
 0xcb1   :  { %v3391_v10 = vpop.f32.mrf.mxu0 }
 0xcb2   :  { %5614 = vmatmul.msk.f32.gmra.mxu1 %vm216_vm0, %v3391_v10 }
 0xcb3   :  { %5619 = vmatmul.msk.f32.gmra.mxu2 %vm270_vm1, %v7522_v61  ;;  %v5620_v61 = vld [vmem:[%s8323_s14 + $0x60] sm:$0xff] }
 0xcb4   :  { %3518 = vmatpush.msrb.mxu3 %v5620_v61 }
 0xcb6   :  { %3757 = vmatpush.msra.mxu3 %v5652_v36 }
 0xcb9   :  { %v3557_v35 = vpop.f32.mrf.mxu0 }
 0xcba   :  { %5638 = vmatmul.msk.f32.vlgmr.msra.gmra.mxu1 %vm216_vm0, %v3557_v35 }
 0xcc1   :  { %v3560_v9 = vpop.f32.mrf.mxu0 }
 0xcc2   :  { %5639 = vmatmul.msk.f32.gmra.mxu1 %vm216_vm0, %v3560_v9  ;;  %v3643_v9 = vld [vmem:[%s8370_s3 + $0x8] sm:$0xff] }
 0xcc9   :  { %v3563_v46 = vpop.f32.mrf.mxu0 }
 0xcca   :  { %5640 = vmatmul.msk.f32.gmra.mxu1 %vm216_vm0, %v3563_v46  ;;  %v3645_v46 = vld [vmem:[%s8370_s3 + $0x18] sm:$0xff] }
 0xcd1   :  { %v3566_v7 = vpop.f32.mrf.mxu0 }
 0xcd2   :  { %5641 = vmatmul.msk.f32.gmra.mxu1 %vm216_vm0, %v3566_v7  ;;  %v5651_v7 = vld [vmem:[%s8325_s16 + $0x10] sm:$0xff] }
 0xcd3   :  { %3758 = vmatpush.msra.mxu3 %v5651_v7 }
 0xcd9   :  { %v3569_v59 = vpop.f32.mrf.mxu0 }
 0xcda   :  { %5642 = vmatmul.msk.f32.gmra.mxu1 %vm216_vm0, %v3569_v59  ;;  %v3687_v59 = vld [vmem:[%s8325_s16] sm:$0xff] }
 0xced   :  { %v3347_v12 = vpop.f32.mrf.mxu3 }
 0xcee   :  { %v7701_v34 = vpop.f32.mrf.mxu2 }
 0xcef   :  { %v3348_v19 = vadd.f32 %v3347_v12, %v7701_v34 }
 0xcf5   :  { %v3350_v30 = vpop.f32.mrf.mxu3 }
 0xcf6   :  { %v3303_v2 = vpop.f32.mrf.mxu2 }
 0xcf7   :  { %v3351_v43 = vadd.f32 %v3350_v30, %v3303_v2 }
 0xcfd   :  { %v3353_v8 = vpop.f32.mrf.mxu3 }
 0xcfe   :  { %v3306_v6 = vpop.f32.mrf.mxu2 }
 0xcff   :  { %v3354_v50 = vadd.f32 %v3353_v8, %v3306_v6 }
 0xd05   :  { %v3356_v62 = vpop.f32.mrf.mxu3 }
 0xd06   :  { %v3309_v58 = vpop.f32.mrf.mxu2 }
 0xd07   :  { %v3357_v23 = vadd.f32 %v3356_v62, %v3309_v58  ;;  %v3642_v58 = vld [vmem:[%s8370_s3] sm:$0xff] }
 0xd0d   :  { %v3359_v55 = vpop.f32.mrf.mxu3 }
 0xd0e   :  { %v3312_v31 = vpop.f32.mrf.mxu2 }
 0xd0f   :  { %v3431_v42 = vpop.f32.mrf.mxu1  ;;  %v3360_v39 = vadd.f32 %v3359_v55, %v3312_v31  ;;  %v3644_v31 = vld [vmem:[%s8370_s3 + $0x10] sm:$0xff]  ;;  %s8372_s3 = sld [smem:[#allocation31_spill]] }
 0xd10   :  { %v3446_v33 = vadd.f32 %v3431_v42, %v3348_v19 }
 0xd16   :  { %v3468_v22 = vpop.f32.mrf.mxu2 }
 0xd17   :  { %5624 = vmatmul.msk.f32.vlgmr.msrb.gmra.mxu3 %vm216_vm0, %v3468_v22  ;;  %v3434_v13 = vpop.f32.mrf.mxu1  ;;  %v3688_v22 = vld [vmem:[%s8325_s16 + $0x8] sm:$0xff] }
 0xd18   :  { %v3447_v40 = vadd.f32 %v3434_v13, %v3351_v43  ;;  %v5759_v13 = vld [vmem:[#allocation10] ss:$0 sm:$0xff] }
 0xd1e   :  { %v3471_v5 = vpop.f32.mrf.mxu2 }
 0xd1f   :  { %5625 = vmatmul.msk.f32.gmra.mxu3 %vm216_vm0, %v3471_v5  ;;  %v3437_v32 = vpop.f32.mrf.mxu1  ;;  %v5657_v5 = vld [vmem:[%s8325_s16 + $0x20] sm:$0xff] }
 0xd20   :  { %v3448_v17 = vadd.f32 %v3437_v32, %v3354_v50  ;;  %3795 = vmatpush.msrb.mxu0 %v5657_v5 }
 0xd26   :  { %v3474_v60 = vpop.f32.mrf.mxu2 }
 0xd27   :  { %5626 = vmatmul.msk.f32.gmra.mxu3 %vm216_vm0, %v3474_v60  ;;  %v3440_v11 = vpop.f32.mrf.mxu1 }
 0xd28   :  { %v3449_v56 = vadd.f32 %v3440_v11, %v3357_v23 }
 0xd2e   :  { %v3477_v18 = vpop.f32.mrf.mxu2 }
 0xd2f   :  { %5627 = vmatmul.msk.f32.gmra.mxu3 %vm216_vm0, %v3477_v18  ;;  %v3443_v3 = vpop.f32.mrf.mxu1 }
 0xd30   :  { %v3450_v4 = vadd.f32 %v3443_v3, %v3360_v39  ;;  %v5763_v3 = vld [vmem:[%s8371_s7 + $0x3] ss:$0 sm:$0xff]  ;;  %v7802_v39 = vld [vmem:[%s8371_s7] ss:$0 sm:$0xff] }
 0xd36   :  { %v3480_v41 = vpop.f32.mrf.mxu2 }
 0xd37   :  { %5628 = vmatmul.msk.f32.gmra.mxu3 %vm216_vm0, %v3480_v41  ;;  %v3609_v15 = vpop.f32.mrf.mxu1 }
 0xd3f   :  { %v3612_v44 = vpop.f32.mrf.mxu1 }
 0xd47   :  { %v3615_v52 = vpop.f32.mrf.mxu1 }
 0xd4f   :  { %v3618_v29 = vpop.f32.mrf.mxu1 }
 0xd57   :  { %v3621_v37 = vpop.f32.mrf.mxu1 }
 0xd9a   :  { %v3520_v51 = vpop.f32.mrf.mxu3 }
 0xd9b   :  { %v3535_v54 = vadd.f32 %v3520_v51, %v3446_v33 }
 0xd9d   :  { %v3624_v0 = vadd.f32 %v3609_v15, %v3535_v54 }
 0xd9f   :  { %v3632_v1 = vadd.f32 %v5756_v57, %v3624_v0 }
 0xda1   :  { %v3637_v35 = vmax.f32 %v3632_v1, 0.0 }
 0xda2   :  { %v3523_v49 = vpop.f32.mrf.mxu3 }
 0xda3   :  { %v3536_v21 = vadd.f32 %v3523_v49, %v3447_v40 }
 0xda5   :  { %v3625_v14 = vadd.f32 %v3612_v44, %v3536_v21 }
 0xda7   :  { %v3633_v34 = vadd.f32 %v5756_v57, %v3625_v14 }
 0xda9   :  { %v3638_v6 = vmax.f32 %v3633_v34, 0.0 }
 0xdaa   :  { %v3526_v20 = vpop.f32.mrf.mxu3 }
 0xdab   :  { %v3537_v53 = vadd.f32 %v3526_v20, %v3448_v17  ;;  %v7807_v17 = vld [vmem:[%s8371_s7 + $0x1] ss:$0 sm:$0xff] }
 0xdad   :  { %v3626_v38 = vadd.f32 %v3615_v52, %v3537_v53 }
 0xdaf   :  { %v3634_v63 = vadd.f32 %v5756_v57, %v3626_v38 }
 0xdb1   :  { %v3639_v27 = vmax.f32 %v3634_v63, 0.0 }
 0xdb2   :  { %v3529_v45 = vpop.f32.mrf.mxu3 }
 0xdb3   :  { %v3538_v48 = vadd.f32 %v3529_v45, %v3449_v56  ;;  %v5757_v45 = vld [vmem:[#allocation10 + $0x2] ss:$0 sm:$0xff] }
 0xdb5   :  { %v3627_v24 = vadd.f32 %v3618_v29, %v3538_v48 }
 0xdb7   :  { %v3635_v10 = vadd.f32 %v5756_v57, %v3627_v24 }
 0xdb9   :  { %v3640_v2 = vmax.f32 %v3635_v10, 0.0 }
 0xdba   :  { %v3532_v47 = vpop.f32.mrf.mxu3 }
 0xdbb   :  { %v3539_v26 = vadd.f32 %v3532_v47, %v3450_v4 }
 0xdbd   :  { %v3628_v25 = vadd.f32 %v3621_v37, %v3539_v26  ;;  %v5758_v37 = vld [vmem:[#allocation10 + $0x1] ss:$0 sm:$0xff] }
 0xdbf   :  { %v3636_v16 = vadd.f32 %v5756_v57, %v3628_v25 }
 0xdc1   :  { %v3641_v61 = vmax.f32 %v3636_v16, 0.0 }
 0xdc3   :  { %3669 = vmatpush.msrb.mxu2 %v3641_v61 }
 0xdc5   :  { %3670 = vmatpush.msrb.mxu2 %v3640_v2 }
 0xdc7   :  { %3671 = vmatpush.msrb.mxu2 %v3639_v27  ;;  %v5762_v27 = vld [vmem:[%s8371_s7 + $0x2] ss:$0 sm:$0xff] }
 0xdc9   :  { %3672 = vmatpush.msrb.mxu2 %v3638_v6 }
 0xdcb   :  { %3673 = vmatpush.msrb.mxu2 %v3637_v35 }
 0xdcc   :  { %5643 = vmatmul.msk.f32.vlgmr.msrb.gmra.mxu2 %vm270_vm1, %v3642_v58 }
 0xdcd   :  { %3720 = vmatpush.msra.mxu2 %v3688_v22 }
 0xdcf   :  { %3721 = vmatpush.msra.mxu2 %v3687_v59 }
 0xdd4   :  { %5644 = vmatmul.msk.f32.gmra.mxu2 %vm270_vm1, %v3643_v9 }
 0xddc   :  { %5645 = vmatmul.msk.f32.gmra.mxu2 %vm270_vm1, %v3644_v31 }
 0xde4   :  { %5646 = vmatmul.msk.f32.gmra.mxu2 %vm270_vm1, %v3645_v46 }
 0xe4f   :  { %v3675_v60 = vpop.f32.mrf.mxu2 }
 0xe50   :  { %5653 = vmatmul.msk.f32.vlgmr.msra.gmra.mxu3 %vm3693_vm5, %v3675_v60  ;;  %5659 = vmatmul.msk.f32.vlgmr.msrb.gmra.mxu0 %vm3693_vm5, %v3675_v60 }
 0xe51   :  { %5647 = vmatmul.msk.f32.vlgmr.msra.gmra.mxu2 %vm3693_vm5, %v3675_v60 }
 0xe57   :  { %v3678_v18 = vpop.f32.mrf.mxu2 }
 0xe58   :  { %5654 = vmatmul.msk.f32.gmra.mxu3 %vm3693_vm5, %v3678_v18  ;;  %5660 = vmatmul.msk.f32.gmra.mxu0 %vm3693_vm5, %v3678_v18 }
 0xe59   :  { %5648 = vmatmul.msk.f32.gmra.mxu2 %vm3693_vm5, %v3678_v18 }
 0xe5f   :  { %v3681_v41 = vpop.f32.mrf.mxu2 }
 0xe60   :  { %5655 = vmatmul.msk.f32.gmra.mxu3 %vm3693_vm5, %v3681_v41  ;;  %5661 = vmatmul.msk.f32.gmra.mxu0 %vm3693_vm5, %v3681_v41 }
 0xe61   :  { %5649 = vmatmul.msk.f32.gmra.mxu2 %vm3693_vm5, %v3681_v41 }
 0xe67   :  { %v3684_v42 = vpop.f32.mrf.mxu2 }
 0xe68   :  { %5656 = vmatmul.msk.f32.gmra.mxu3 %vm3693_vm5, %v3684_v42  ;;  %5662 = vmatmul.msk.f32.gmra.mxu0 %vm3693_vm5, %v3684_v42 }
 0xe69   :  { %5650 = vmatmul.msk.f32.gmra.mxu2 %vm3693_vm5, %v3684_v42 }
 0xecd   :  { %v3797_v12 = vpop.f32.mrf.mxu0 }
 0xece   :  { %v3798_v24 = vadd.f32 %v5757_v45, %v3797_v12 }
 0xed0   :  { %v4124_v10 = vmul.f32 %v7807_v17, %v3798_v24  ;;  %v3974_v16 = vmul.f32 %v7802_v39, %v3798_v24  ;;  %v4551_v1 = vmul.f32 %v5763_v3, %v3798_v24  ;;  %v4356_v22 = vmul.f32 %v5762_v27, %v3798_v24 }
 0xed3   :  { %v7784_v30 = vpop.f32.mrf.mxu3 }
 0xed4   :  { %v3723_v32 = vpop.f32.mrf.mxu2  ;;  %v3761_v6 = vadd.f32 %v5758_v37, %v7784_v30 }
 0xed5   :  { %v3800_v8 = vpop.f32.mrf.mxu0  ;;  %v3724_v11 = vadd.f32 %v5759_v13, %v3723_v32  ;;  %v7876_v32 = vld [vmem:[%s8372_s3] sm:$0xff] }
 0xed6   :  { %v3801_v53 = vadd.f32 %v5757_v45, %v3800_v8 }
 0xed7   :  { %v7786_v62 = vmul.f32 0.5, %v3724_v11 }
 0xed8   :  { %v4125_v38 = vmul.f32 %v7807_v17, %v3801_v53  ;;  %v3975_v25 = vmul.f32 %v7802_v39, %v3801_v53  ;;  %v4552_v36 = vmul.f32 %v5763_v3, %v3801_v53  ;;  %v4357_v46 = vmul.f32 %v5762_v27, %v3801_v53 }
 0xed9   :  { %v7792_v55 = vmul.f32 %v5763_v3, %v7786_v62  ;;  %v3821_v58 = vmul.f32 %v7802_v39, %v7786_v62  ;;  %v3983_v9 = vmul.f32 %v7807_v17, %v7786_v62  ;;  %v4215_v42 = vmul.f32 %v5762_v27, %v7786_v62 }
 0xedb   :  { %v3763_v15 = vpop.f32.mrf.mxu3 }
 0xedc   :  { %v3726_v51 = vpop.f32.mrf.mxu2  ;;  %v3764_v28 = vadd.f32 %v5758_v37, %v3763_v15 }
 0xedd   :  { %v3803_v44 = vpop.f32.mrf.mxu0  ;;  %v3727_v49 = vadd.f32 %v5759_v13, %v3726_v51 }
 0xede   :  { %v3804_v43 = vadd.f32 %v5757_v45, %v3803_v44 }
 0xedf   :  { %v7794_v52 = vmul.f32 0.5, %v3727_v49  ;;  %v7890_v49 = vld [vmem:[%s8372_s3 + $0x10] sm:$0xff] }
 0xee0   :  { %v4126_v33 = vmul.f32 %v7807_v17, %v3804_v43  ;;  %v3976_v21 = vmul.f32 %v7802_v39, %v3804_v43  ;;  %v4553_v34 = vmul.f32 %v5763_v3, %v3804_v43  ;;  %v4358_v31 = vmul.f32 %v5762_v27, %v3804_v43 }
 0xee1   :  { %v7797_v20 = vmul.f32 %v5763_v3, %v7794_v52  ;;  %v3822_v7 = vmul.f32 %v7802_v39, %v7794_v52  ;;  %v3984_v5 = vmul.f32 %v7807_v17, %v7794_v52  ;;  %v4216_v12 = vmul.f32 %v5762_v27, %v7794_v52 }
 0xee3   :  { %v3766_v29 = vpop.f32.mrf.mxu3 }
 0xee4   :  { %v3729_v23 = vpop.f32.mrf.mxu2  ;;  %v3767_v61 = vadd.f32 %v5758_v37, %v3766_v29 }
 0xee5   :  { %v3806_v50 = vpop.f32.mrf.mxu0  ;;  %v3730_v56 = vadd.f32 %v5759_v13, %v3729_v23  ;;  %v7897_v23 = vld [vmem:[%s8372_s3 + $0x18] sm:$0xff] }
 0xee6   :  { %v3807_v48 = vadd.f32 %v5757_v45, %v3806_v50 }
 0xee7   :  { %v7809_v19 = vmul.f32 0.5, %v3730_v56 }
 0xee8   :  { %v4127_v40 = vmul.f32 %v7807_v17, %v3807_v48  ;;  %v3977_v4 = vmul.f32 %v7802_v39, %v3807_v48  ;;  %v4554_v63 = vmul.f32 %v5763_v3, %v3807_v48  ;;  %v4359_v35 = vmul.f32 %v5762_v27, %v3807_v48 }
 0xee9   :  { %v7814_v47 = vmul.f32 %v5763_v3, %v7809_v19  ;;  %v3823_v59 = vmul.f32 %v7802_v39, %v7809_v19  ;;  %v3985_v60 = vmul.f32 %v7807_v17, %v7809_v19 }
 0xeea   :  { %4152 = vmatpush.msrb.mxu3 %v4127_v40  ;;  %4193 = vmatpush.msra.mxu0 %v3977_v4 }
 0xeeb   :  { %v3769_v26 = vpop.f32.mrf.mxu3 }
 0xeec   :  { %v3770_v54 = vadd.f32 %v5758_v37, %v3769_v26  ;;  %4153 = vmatpush.msrb.mxu3 %v4126_v33  ;;  %4194 = vmatpush.msra.mxu0 %v3976_v21  ;;  %v3732_v57 = vpop.f32.mrf.mxu2 }
 0xeed   :  { %v3733_v14 = vadd.f32 %v5759_v13, %v3732_v57  ;;  %v4217_v13 = vmul.f32 %v5762_v27, %v7809_v19 }
 0xeee   :  { %5663 = vmatpush.xpose.msk.msrb.mxu1 %vm3693_vm5, %v3770_v54  ;;  %5672 = vmatpush.xpose.msk.msrb.mxu2 %vm3693_vm5, %v3770_v54 }
 0xeef   :  { %4154 = vmatpush.msrb.mxu3 %v4125_v38  ;;  %4195 = vmatpush.msra.mxu0 %v3975_v25  ;;  %v3812_v0 = vmul.f32 0.5, %v3733_v14 }
 0xef1   :  { %4155 = vmatpush.msrb.mxu3 %v4124_v10  ;;  %4196 = vmatpush.msra.mxu0 %v3974_v16  ;;  %v7825_v2 = vmul.f32 %v5763_v3, %v3812_v0  ;;  %v3824_v18 = vmul.f32 %v7802_v39, %v3812_v0  ;;  %v3986_v41 = vmul.f32 %v7807_v17, %v3812_v0  ;;  %v7883_v3 = vld [vmem:[%s8372_s3 + $0x8] sm:$0xff] }
 0xef2   :  { %5664 = vmatpush.xpose.msk.msrb.mxu1 %vm3693_vm5, %v3767_v61  ;;  %5673 = vmatpush.xpose.msk.msrb.mxu2 %vm3693_vm5, %v3767_v61  ;;  %v4218_v30 = vmul.f32 %v5762_v27, %v3812_v0 }
 0xef3   :  { %5702 = vmatpush.xpose.msk.msra.mxu3 %vm3693_vm5, %v3770_v54  ;;  %4579 = vmatpush.msrb.mxu0 %v4554_v63 }
 0xef5   :  { %4580 = vmatpush.msrb.mxu0 %v4553_v34 }
 0xef6   :  { %5665 = vmatpush.xpose.msk.msrb.mxu1 %vm3693_vm5, %v3764_v28  ;;  %5674 = vmatpush.xpose.msk.msrb.mxu2 %vm3693_vm5, %v3764_v28 }
 0xef7   :  { %5703 = vmatpush.xpose.msk.msra.mxu3 %vm3693_vm5, %v3767_v61  ;;  %4581 = vmatpush.msrb.mxu0 %v4552_v36 }
 0xef9   :  { %4582 = vmatpush.msrb.mxu0 %v4551_v1 }
 0xefa   :  { %5666 = vmatpush.xpose.msk.msrb.mxu1 %vm3693_vm5, %v3761_v6  ;;  %5675 = vmatpush.xpose.msk.msrb.mxu2 %vm3693_vm5, %v3761_v6 }
 0xefb   :  { %5704 = vmatpush.xpose.msk.msra.mxu3 %vm3693_vm5, %v3764_v28 }
 0xefd   :  { %5667 = vmatmul.msk.f32.vlgmr.msrb.gmra.mxu1 %vm3693_vm5, %v3821_v58  ;;  %5676 = vmatmul.msk.f32.vlgmr.msrb.gmra.mxu2 %vm3693_vm5, %v3983_v9 }
 0xefe   :  { %5689 = vmatpush.xpose.msk.msra.mxu1 %vm3693_vm5, %v3770_v54  ;;  %4384 = vmatpush.msra.mxu2 %v4359_v35 }
 0xeff   :  { %5705 = vmatpush.xpose.msk.msra.mxu3 %vm3693_vm5, %v3761_v6 }
 0xf00   :  { %4385 = vmatpush.msra.mxu2 %v4358_v31 }
 0xf02   :  { %5690 = vmatpush.xpose.msk.msra.mxu1 %vm3693_vm5, %v3767_v61  ;;  %4386 = vmatpush.msra.mxu2 %v4357_v46 }
 0xf04   :  { %4387 = vmatpush.msra.mxu2 %v4356_v22 }
 0xf05   :  { %5668 = vmatmul.msk.f32.gmra.mxu1 %vm3693_vm5, %v3822_v7  ;;  %5677 = vmatmul.msk.f32.gmra.mxu2 %vm3693_vm5, %v3984_v5 }
 0xf06   :  { %5691 = vmatpush.xpose.msk.msra.mxu1 %vm3693_vm5, %v3764_v28 }
 0xf0a   :  { %5692 = vmatpush.xpose.msk.msra.mxu1 %vm3693_vm5, %v3761_v6 }
 0xf0d   :  { %5669 = vmatmul.msk.f32.gmra.mxu1 %vm3693_vm5, %v3823_v59  ;;  %5678 = vmatmul.msk.f32.gmra.mxu2 %vm3693_vm5, %v3985_v60 }
 0xf15   :  { %5670 = vmatmul.msk.f32.gmra.mxu1 %vm3693_vm5, %v3824_v18  ;;  %5679 = vmatmul.msk.f32.gmra.mxu2 %vm3693_vm5, %v3986_v41 }
 0xf1d   :  { %5693 = vmatmul.msk.f32.vlgmr.msra.gmra.mxu1 %vm3693_vm5, %v4215_v42 }
 0xf25   :  { %5694 = vmatmul.msk.f32.gmra.mxu1 %vm3693_vm5, %v4216_v12 }
 0xf2d   :  { %5695 = vmatmul.msk.f32.gmra.mxu1 %vm3693_vm5, %v4217_v13 }
 0xf35   :  { %5696 = vmatmul.msk.f32.gmra.mxu1 %vm3693_vm5, %v4218_v30 }
 0xf7a   :  { %v3866_v39 = vpop.f32.mrf.mxu1 }
 0xf7b   :  { %v7910_v10 = vadd.f32 %v3866_v39, %v7876_v32 }
 0xf7d   :  { %v3878_v28 = vsel %vm216_vm0, %v7910_v10, -inf }
 0xf80   :  { %v4016_v8 = vpop.f32.mrf.mxu2 }
 0xf81   :  { %v4017_v11 = vadd.f32 %v4016_v8, %v7876_v32 }
 0xf82   :  { %v3869_v17 = vpop.f32.mrf.mxu1 }
 0xf83   :  { %v4028_v62 = vsel %vm216_vm0, %v4017_v11, -inf  ;;  %v7919_v1 = vadd.f32 %v3869_v17, %v7883_v3 }
 0xf84   :  { %4029 = vmax.xlane.f32.xlu0 %v4028_v62 }
 0xf85   :  { %v3881_v9 = vsel %vm216_vm0, %v7919_v1, -inf }
 0xf88   :  { %v4019_v15 = vpop.f32.mrf.mxu2 }
 0xf89   :  { %v4020_v51 = vadd.f32 %v4019_v15, %v7883_v3 }
 0xf8a   :  { %v3872_v4 = vpop.f32.mrf.mxu1 }
 0xf8b   :  { %v4031_v44 = vsel %vm216_vm0, %v4020_v51, -inf  ;;  %v7933_v46 = vadd.f32 %v3872_v4, %v7890_v49 }
 0xf8c   :  { %4032 = vmax.xlane.f32.xlu0 %v4031_v44 }
 0xf8d   :  { %v3884_v7 = vsel %vm216_vm0, %v7933_v46, -inf }
 0xf90   :  { %v4022_v52 = vpop.f32.mrf.mxu2 }
 0xf91   :  { %v4023_v29 = vadd.f32 %v4022_v52, %v7890_v49 }
 0xf92   :  { %v3875_v26 = vpop.f32.mrf.mxu1 }
 0xf93   :  { %v4034_v45 = vsel %vm216_vm0, %v4023_v29, -inf  ;;  %v7922_v27 = vadd.f32 %v3875_v26, %v7897_v23 }
 0xf94   :  { %4035 = vmax.xlane.f32.xlu1 %v4034_v45 }
 0xf95   :  { %v3887_v31 = vsel %vm216_vm0, %v7922_v27, -inf }
 0xf98   :  { %v4025_v50 = vpop.f32.mrf.mxu2 }
 0xf99   :  { %v4026_v56 = vadd.f32 %v4025_v50, %v7897_v23 }
 0xf9a   :  { %v4248_v0 = vpop.f32.mrf.mxu1 }
 0xf9b   :  { %v4037_v43 = vsel %vm216_vm0, %v4026_v56, -inf  ;;  %v7936_v22 = vadd.f32 %v4248_v0, %v7876_v32 }
 0xf9c   :  { %4038 = vmax.xlane.f32.xlu1 %v4037_v43 }
 0xf9d   :  { %v4260_v5 = vsel %vm216_vm0, %v7936_v22, -inf }
 0xfa2   :  { %v4251_v35 = vpop.f32.mrf.mxu1 }
 0xfa3   :  { %v7943_v60 = vadd.f32 %v4251_v35, %v7883_v3 }
 0xfa5   :  { %v4263_v41 = vsel %vm216_vm0, %v7943_v60, -inf }
 0xfaa   :  { %v4254_v59 = vpop.f32.mrf.mxu1 }
 0xfab   :  { %v7946_v18 = vadd.f32 %v4254_v59, %v7890_v49 }
 0xfad   :  { %v4266_v42 = vsel %vm216_vm0, %v7946_v18, -inf }
 0xff7   :  { %v4030_v48 = vpop.xlane.xlu0 %4029 }
 0xff8   :  { %v4040_v19 = vsub.f32 %v4017_v11, %v4030_v48 }
 0xffa   :  { %v4044_v40 = vmul.f32 1.442695, %v4040_v19 }
 0xffc   :  { %5771 = vpow2.f32 %v4044_v40 }
 0xfff   :  { %v4033_v53 = vpop.xlane.xlu0 %4032 }
0x1000   :  { %v4041_v37 = vsub.f32 %v4020_v51, %v4033_v53 }
0x1002   :  { %v7901_v33 = vpop.eup %5771  ;;  %v4046_v21 = vmul.f32 1.442695, %v4041_v37 }
0x1003   :  { %v4052_v24 = vsel %vm216_vm0, %v7901_v33, 0.0 }
0x1004   :  { %5773 = vpow2.f32 %v4046_v21  ;;  %4053 = vadd.xlane.f32.xlu2 %v4052_v24 }
0x1007   :  { %v4036_v54 = vpop.xlane.xlu1 %4035 }
0x1008   :  { %v4042_v57 = vsub.f32 %v4023_v29, %v4036_v54 }
0x100a   :  { %v7905_v38 = vpop.eup %5773  ;;  %v4048_v25 = vmul.f32 1.442695, %v4042_v57 }
0x100b   :  { %v4055_v14 = vsel %vm216_vm0, %v7905_v38, 0.0 }
0x100c   :  { %5775 = vpow2.f32 %v4048_v25  ;;  %4056 = vadd.xlane.f32.xlu2 %v4055_v14 }
0x100f   :  { %v4039_v16 = vpop.xlane.xlu1 %4038 }
0x1010   :  { %v4043_v63 = vsub.f32 %v4026_v56, %v4039_v16 }
0x1012   :  { %v7912_v61 = vpop.eup %5775  ;;  %v4050_v34 = vmul.f32 1.442695, %v4043_v63 }
0x1013   :  { %v4058_v36 = vsel %vm216_vm0, %v7912_v61, 0.0 }
0x1014   :  { %5777 = vpow2.f32 %v4050_v34  ;;  %4059 = vadd.xlane.f32.xlu0 %v4058_v36  ;;  %3879 = vmax.xlane.f32.xlu2 %v3878_v28 }
0x101a   :  { %v7924_v6 = vpop.eup %5777 }
0x101b   :  { %v4061_v58 = vsel %vm216_vm0, %v7924_v6, 0.0 }
0x101c   :  { %4062 = vadd.xlane.f32.xlu1 %v4061_v58  ;;  %3882 = vmax.xlane.f32.xlu0 %v3881_v9 }
0x101d   :  { %3888 = vmax.xlane.f32.xlu2 %v3887_v31 }
0x1024   :  { %3885 = vmax.xlane.f32.xlu1 %v3884_v7  ;;  %4261 = vmax.xlane.f32.xlu0 %v4260_v5 }
0x102c   :  { %4264 = vmax.xlane.f32.xlu1 %v4263_v41  ;;  %4267 = vmax.xlane.f32.xlu0 %v4266_v42 }
0x1077   :  { %v4054_v12 = vpop.xlane.xlu2 %4053 }
0x1078   :  { %5779 = vrcp.f32 %v4054_v12  ;;  %v4075_v62 = vand.u32 2147483648, %v4054_v12  ;;  %v4073_v51 = vand.u32 2147483647, %v4054_v12  ;;  %vm4069_vm7 = vweird.f32 %v4054_v12 }
0x107a   :  { %v4076_v29 = vor.u32 1.1754944e-38, %v4075_v62  ;;  %vm4074_vm9 = vcmp.eq.f32.partialorder %v4073_v51, 8.507059e+37 }
0x107e   :  { %v5780_v13 = vpop.eup %5779 }
0x107f   :  { %v4065_v30 = vmul.f32 %v5780_v13, %v4054_v12  ;;  %v4057_v8 = vpop.xlane.xlu2 %4056  ;;  %vm4070_vm6 = vweird.f32 %v5780_v13 }
0x1080   :  { %5781 = vrcp.f32 %v4057_v8  ;;  %vm4071_vm8 = vmor %vm4069_vm7, %vm4070_vm6  ;;  %v4090_v19 = vand.u32 2147483648, %v4057_v8  ;;  %v4088_v40 = vand.u32 2147483647, %v4057_v8  ;;  %vm4084_vm11 = vweird.f32 %v4057_v8 }
0x1081   :  { %v4066_v11 = vsub.f32 1.0, %v4065_v30 }
0x1082   :  { %v4091_v37 = vor.u32 1.1754944e-38, %v4090_v19  ;;  %vm4089_vm13 = vcmp.eq.f32.partialorder %v4088_v40, 8.507059e+37 }
0x1083   :  { %v4067_v15 = vmul.f32 %v5780_v13, %v4066_v11 }
0x1085   :  { %v4068_v44 = vadd.f32 %v5780_v13, %v4067_v15 }
0x1086   :  { %v5782_v52 = vpop.eup %5781 }
0x1087   :  { %v4072_v45 = vsel %vm4071_vm8, %v5780_v13, %v4068_v44  ;;  %v4080_v50 = vmul.f32 %v5782_v52, %v4057_v8  ;;  %v4060_v56 = vpop.xlane.xlu0 %4059  ;;  %vm4085_vm10 = vweird.f32 %v5782_v52  ;;  %v3880_v8 = vpop.xlane.xlu2 %3879 }
0x1088   :  { %v4077_v43 = vsel %vm4074_vm9, %v4076_v29, %v4072_v45  ;;  %5783 = vrcp.f32 %v4060_v56  ;;  %vm4086_vm12 = vmor %vm4084_vm11, %vm4085_vm10  ;;  %v4103_v16 = vand.u32 2147483647, %v4060_v56  ;;  %vm4099_vm15 = vweird.f32 %v4060_v56 }
0x1089   :  { %v4078_v39 = vmul.f32 %v7901_v33, %v4077_v43  ;;  %v4081_v17 = vsub.f32 1.0, %v4080_v50  ;;  %v4105_v33 = vand.u32 2147483648, %v4060_v56 }
0x108a   :  { %vm4104_vm2 = vcmp.eq.f32.partialorder %v4103_v16, 8.507059e+37 }
0x108b   :  { %v4082_v48 = vmul.f32 %v5782_v52, %v4081_v17  ;;  %5680 = vmatmul.msk.f32.vlgmr.msrb.gmra.mxu3 %vm216_vm0, %v4078_v39  ;;  %v4106_v34 = vor.u32 1.1754944e-38, %v4105_v33 }
0x108d   :  { %v4083_v4 = vadd.f32 %v5782_v52, %v4082_v48 }
0x108e   :  { %v5784_v53 = vpop.eup %5783 }
0x108f   :  { %v4095_v21 = vmul.f32 %v5784_v53, %v4060_v56  ;;  %v4063_v24 = vpop.xlane.xlu1 %4062  ;;  %v4087_v26 = vsel %vm4086_vm12, %v5782_v52, %v4083_v4  ;;  %vm4100_vm14 = vweird.f32 %v5784_v53  ;;  %v3883_v62 = vpop.xlane.xlu0 %3882 }
0x1090   :  { %5785 = vrcp.f32 %v4063_v24  ;;  %v4092_v57 = vsel %vm4089_vm13, %v4091_v37, %v4087_v26  ;;  %vm4101_vm1 = vmor %vm4099_vm15, %vm4100_vm14  ;;  %v4120_v31 = vand.u32 2147483648, %v4063_v24  ;;  %vm4114_vm4 = vweird.f32 %v4063_v24  ;;  %v3889_v39 = vpop.xlane.xlu2 %3888 }
0x1091   :  { %v4096_v54 = vsub.f32 1.0, %v4095_v21  ;;  %v4093_v25 = vmul.f32 %v7905_v38, %v4092_v57  ;;  %v4118_v38 = vand.u32 2147483647, %v4063_v24 }
0x1092   :  { %v4121_v59 = vor.u32 1.1754944e-38, %v4120_v31 }
0x1093   :  { %v4097_v14 = vmul.f32 %v5784_v53, %v4096_v54  ;;  %5681 = vmatmul.msk.f32.gmra.mxu3 %vm216_vm0, %v4093_v25  ;;  %vm4119_vm7 = vcmp.eq.f32.partialorder %v4118_v38, 8.507059e+37 }
0x1095   :  { %v4098_v0 = vadd.f32 %v5784_v53, %v4097_v14 }
0x1096   :  { %v5786_v63 = vpop.eup %5785 }
0x1097   :  { %v4110_v36 = vmul.f32 %v5786_v63, %v4063_v24  ;;  %v4102_v28 = vsel %vm4101_vm1, %v5784_v53, %v4098_v0  ;;  %vm4115_vm3 = vweird.f32 %v5786_v63  ;;  %v3886_v51 = vpop.xlane.xlu1 %3885  ;;  %v4262_v56 = vpop.xlane.xlu0 %4261 }
0x1098   :  { %v4107_v35 = vsel %vm4104_vm2, %v4106_v34, %v4102_v28  ;;  %vm4116_vm6 = vmor %vm4114_vm4, %vm4115_vm3  ;;  %v4272_v40 = vsub.f32 %v7936_v22, %v4262_v56 }
0x1099   :  { %v4111_v58 = vsub.f32 1.0, %v4110_v36  ;;  %v4108_v9 = vmul.f32 %v7912_v61, %v4107_v35 }
0x109a   :  { %v4276_v24 = vmul.f32 1.442695, %v4272_v40 }
0x109b   :  { %v4112_v7 = vmul.f32 %v5786_v63, %v4111_v58  ;;  %5682 = vmatmul.msk.f32.gmra.mxu3 %vm216_vm0, %v4108_v9 }
0x109d   :  { %v4113_v5 = vadd.f32 %v5786_v63, %v4112_v7 }
0x109f   :  { %v4117_v41 = vsel %vm4116_vm6, %v5786_v63, %v4113_v5  ;;  %v4268_v54 = vpop.xlane.xlu0 %4267 }
0x10a0   :  { %v4122_v42 = vsel %vm4119_vm7, %v4121_v59, %v4117_v41 }
0x10a1   :  { %v4123_v12 = vmul.f32 %v7924_v6, %v4122_v42 }
0x10a3   :  { %5683 = vmatmul.msk.f32.gmra.mxu3 %vm216_vm0, %v4123_v12 }
0x10ab   :  { %5706 = vmatmul.msk.f32.vlgmr.msra.gmra.mxu3 %vm3693_vm5, %v7792_v55 }
0x10b3   :  { %5707 = vmatmul.msk.f32.gmra.mxu3 %vm3693_vm5, %v7797_v20  ;;  %v3890_v20 = vsub.f32 %v7910_v10, %v3880_v8  ;;  %v3892_v10 = vsub.f32 %v7933_v46, %v3886_v51 }
0x10b5   :  { %v3894_v15 = vmul.f32 1.442695, %v3890_v20  ;;  %v3898_v17 = vmul.f32 1.442695, %v3892_v10 }
0x10b7   :  { %5787 = vpow2.f32 %v3894_v15 }
0x10bb   :  { %5708 = vmatmul.msk.f32.gmra.mxu3 %vm3693_vm5, %v7814_v47 }
0x10bd   :  { %v7994_v48 = vpop.eup %5787 }
0x10be   :  { %v3902_v37 = vsel %vm216_vm0, %v7994_v48, 0.0 }
0x10c3   :  { %5709 = vmatmul.msk.f32.gmra.mxu3 %vm3693_vm5, %v7825_v2  ;;  %v4257_v2 = vpop.f32.mrf.mxu1 }
0x10c4   :  { %v7983_v44 = vadd.f32 %v4257_v2, %v7897_v23 }
0x10c6   :  { %v4269_v50 = vsel %vm216_vm0, %v7983_v44, -inf }
0x110e   :  { %v7968_v61 = vpop.f32.mrf.mxu3 }
0x1116   :  { %v7970_v13 = vpop.f32.mrf.mxu3 }
0x111e   :  { %v7972_v30 = vpop.f32.mrf.mxu3 }
0x1126   :  { %v7974_v6 = vpop.f32.mrf.mxu3 }
0x112e   :  { %v4443_v11 = vpop.f32.mrf.mxu3 }
0x112f   :  { %v7977_v55 = vadd.f32 %v4443_v11, %v7876_v32  ;;  %v3891_v32 = vsub.f32 %v7919_v1, %v3883_v62  ;;  %v3893_v1 = vsub.f32 %v7922_v27, %v3889_v39 }
0x1131   :  { %v4455_v47 = vsel %vm216_vm0, %v7977_v55, -inf  ;;  %v3896_v43 = vmul.f32 1.442695, %v3891_v32  ;;  %v3900_v21 = vmul.f32 1.442695, %v3893_v1 }
0x1132   :  { %4456 = vmax.xlane.f32.xlu2 %v4455_v47 }
0x1133   :  { %5789 = vpow2.f32 %v3896_v43 }
0x1134   :  { %5791 = vpow2.f32 %v3898_v17 }
0x1135   :  { %5793 = vpow2.f32 %v3900_v21 }
0x1136   :  { %v4446_v52 = vpop.f32.mrf.mxu3  ;;  %5795 = vpow2.f32 %v4276_v24 }
0x1137   :  { %v7986_v29 = vadd.f32 %v4446_v52, %v7883_v3  ;;  %v4265_v3 = vpop.xlane.xlu1 %4264 }
0x1138   :  { %v4273_v4 = vsub.f32 %v7943_v60, %v4265_v3  ;;  %v4274_v60 = vsub.f32 %v7946_v18, %v4268_v54 }
0x1139   :  { %v4458_v45 = vsel %vm216_vm0, %v7986_v29, -inf  ;;  %v8003_v27 = vpop.eup %5789 }
0x113a   :  { %4459 = vmax.xlane.f32.xlu1 %v4458_v45  ;;  %4270 = vmax.xlane.f32.xlu2 %v4269_v50  ;;  %v4278_v26 = vmul.f32 1.442695, %v4273_v4  ;;  %v8005_v57 = vpop.eup %5791  ;;  %v3905_v33 = vsel %vm216_vm0, %v8003_v27, 0.0  ;;  %v4280_v16 = vmul.f32 1.442695, %v4274_v60 }
0x113b   :  { %v3908_v14 = vsel %vm216_vm0, %v8005_v57, 0.0  ;;  %v8017_v0 = vpop.eup %5793 }
0x113c   :  { %5797 = vpow2.f32 %v4278_v26  ;;  %v3911_v34 = vsel %vm216_vm0, %v8017_v0, 0.0 }
0x113d   :  { %5799 = vpow2.f32 %v4280_v16 }
0x113e   :  { %v4449_v19 = vpop.f32.mrf.mxu3 }
0x113f   :  { %v4450_v46 = vadd.f32 %v4449_v19, %v7890_v49 }
0x1141   :  { %v4461_v53 = vsel %vm216_vm0, %v4450_v46, -inf }
0x1142   :  { %4462 = vmax.xlane.f32.xlu0 %v4461_v53  ;;  %3903 = vadd.xlane.f32.xlu1 %v3902_v37 }
0x1146   :  { %v4452_v49 = vpop.f32.mrf.mxu3 }
0x1147   :  { %v8008_v22 = vadd.f32 %v4452_v49, %v7897_v23  ;;  %v8019_v23 = vpop.eup %5795 }
0x1148   :  { %v8021_v63 = vpop.eup %5797  ;;  %v4284_v18 = vsel %vm216_vm0, %v8019_v23, 0.0 }
0x1149   :  { %v4464_v25 = vsel %vm216_vm0, %v8008_v22, -inf  ;;  %v4287_v36 = vsel %vm216_vm0, %v8021_v63, 0.0  ;;  %v8029_v28 = vpop.eup %5799 }
0x114a   :  { %3906 = vadd.xlane.f32.xlu0 %v3905_v33  ;;  %4465 = vmax.xlane.f32.xlu2 %v4464_v25  ;;  %v4290_v35 = vsel %vm216_vm0, %v8029_v28, 0.0 }
0x114b   :  { %3909 = vadd.xlane.f32.xlu1 %v3908_v14 }
0x1152   :  { %4285 = vadd.xlane.f32.xlu0 %v4284_v18  ;;  %3912 = vadd.xlane.f32.xlu2 %v3911_v34 }
0x1153   :  { %4288 = vadd.xlane.f32.xlu1 %v4287_v36 }
0x115a   :  { %4291 = vadd.xlane.f32.xlu0 %v4290_v35 }
0x11a5   :  { %v4457_v58 = vpop.xlane.xlu2 %4456 }
0x11a6   :  { %v4467_v9 = vsub.f32 %v7977_v55, %v4457_v58 }
0x11a8   :  { %v4471_v31 = vmul.f32 1.442695, %v4467_v9 }
0x11aa   :  { %5801 = vpow2.f32 %v4471_v31 }
0x11ad   :  { %v4460_v7 = vpop.xlane.xlu1 %4459  ;;  %v4271_v38 = vpop.xlane.xlu2 %4270 }
0x11ae   :  { %v4468_v5 = vsub.f32 %v7986_v29, %v4460_v7  ;;  %v4275_v59 = vsub.f32 %v7983_v44, %v4271_v38 }
0x11b0   :  { %v8036_v41 = vpop.eup %5801  ;;  %v4473_v42 = vmul.f32 1.442695, %v4468_v5  ;;  %v4282_v12 = vmul.f32 1.442695, %v4275_v59 }
0x11b1   :  { %v4479_v8 = vsel %vm216_vm0, %v8036_v41, 0.0 }
0x11b2   :  { %5803 = vpow2.f32 %v4473_v42  ;;  %4480 = vadd.xlane.f32.xlu2 %v4479_v8 }
0x11b3   :  { %5805 = vpow2.f32 %v4282_v12 }
0x11b5   :  { %v4463_v11 = vpop.xlane.xlu0 %4462  ;;  %v3904_v55 = vpop.xlane.xlu1 %3903 }
0x11b6   :  { %v4469_v20 = vsub.f32 %v4450_v46, %v4463_v11  ;;  %5807 = vrcp.f32 %v3904_v55  ;;  %v3925_v56 = vand.u32 2147483648, %v3904_v55  ;;  %v3923_v17 = vand.u32 2147483647, %v3904_v55 }
0x11b7   :  { %vm3919_vm9 = vweird.f32 %v3904_v55 }
0x11b8   :  { %v8040_v62 = vpop.eup %5803  ;;  %v4475_v47 = vmul.f32 1.442695, %v4469_v20  ;;  %v3926_v40 = vor.u32 1.1754944e-38, %v3925_v56  ;;  %vm3924_vm11 = vcmp.eq.f32.partialorder %v3923_v17, 8.507059e+37 }
0x11b9   :  { %v8042_v2 = vpop.eup %5805  ;;  %v4482_v15 = vsel %vm216_vm0, %v8040_v62, 0.0 }
0x11ba   :  { %5809 = vpow2.f32 %v4475_v47  ;;  %4483 = vadd.xlane.f32.xlu1 %v4482_v15  ;;  %v4293_v51 = vsel %vm216_vm0, %v8042_v2, 0.0 }
0x11bb   :  { %4294 = vadd.xlane.f32.xlu2 %v4293_v51 }
0x11bc   :  { %v5808_v44 = vpop.eup %5807 }
0x11bd   :  { %v3915_v52 = vmul.f32 %v5808_v44, %v3904_v55  ;;  %v3907_v29 = vpop.xlane.xlu0 %3906  ;;  %v4466_v32 = vpop.xlane.xlu2 %4465  ;;  %vm3920_vm8 = vweird.f32 %v5808_v44 }
0x11be   :  { %5811 = vrcp.f32 %v3907_v29  ;;  %v8048_v10 = vpop.xlane.xlu1 %3909  ;;  %v4470_v43 = vsub.f32 %v8008_v22, %v4466_v32  ;;  %vm3921_vm10 = vmor %vm3919_vm9, %vm3920_vm8  ;;  %v3940_v16 = vand.u32 2147483648, %v3907_v29  ;;  %vm3934_vm13 = vweird.f32 %v3907_v29 }
0x11bf   :  { %v3916_v45 = vsub.f32 1.0, %v3915_v52  ;;  %5813 = vrcp.f32 %v8048_v10  ;;  %v3938_v34 = vand.u32 2147483647, %v3907_v29  ;;  %v3955_v59 = vand.u32 2147483648, %v8048_v10 }
0x11c0   :  { %v8051_v50 = vpop.eup %5809  ;;  %v4477_v19 = vmul.f32 1.442695, %v4470_v43  ;;  %v3941_v5 = vor.u32 1.1754944e-38, %v3940_v16  ;;  %vm3949_vm3 = vweird.f32 %v8048_v10  ;;  %v3953_v52 = vand.u32 2147483647, %v8048_v10 }
0x11c1   :  { %v3917_v39 = vmul.f32 %v5808_v44, %v3916_v45  ;;  %v4485_v3 = vsel %vm216_vm0, %v8051_v50, 0.0  ;;  %vm3939_vm15 = vcmp.eq.f32.partialorder %v3938_v34, 8.507059e+37 }
0x11c2   :  { %4486 = vadd.xlane.f32.xlu0 %v4485_v3  ;;  %5815 = vpow2.f32 %v4477_v19 }
0x11c3   :  { %v3918_v1 = vadd.f32 %v5808_v44, %v3917_v39 }
0x11c4   :  { %v5812_v46 = vpop.eup %5811 }
0x11c5   :  { %v8056_v4 = vpop.eup %5813  ;;  %v3922_v53 = vsel %vm3921_vm10, %v5808_v44, %v3918_v1  ;;  %v3930_v37 = vmul.f32 %v5812_v46, %v3907_v29  ;;  %v4286_v21 = vpop.xlane.xlu0 %4285  ;;  %vm3935_vm12 = vweird.f32 %v5812_v46  ;;  %v3956_v29 = vor.u32 1.1754944e-38, %v3955_v59 }
0x11c6   :  { %v3927_v24 = vsel %vm3924_vm11, %v3926_v40, %v3922_v53  ;;  %v3945_v26 = vmul.f32 %v8056_v4, %v8048_v10  ;;  %5817 = vrcp.f32 %v4286_v21  ;;  %v8060_v54 = vpop.xlane.xlu1 %4288  ;;  %v8063_v60 = vpop.xlane.xlu2 %3912  ;;  %vm8070_vm14 = vmor %vm3934_vm13, %vm3935_vm12  ;;  %vm3950_vm1 = vweird.f32 %v8056_v4 }
0x11c7   :  { %v3928_v49 = vmul.f32 %v7994_v48, %v3927_v24  ;;  %v3931_v22 = vsub.f32 1.0, %v3930_v37  ;;  %5819 = vrcp.f32 %v8060_v54  ;;  %v4305_v55 = vand.u32 2147483647, %v4286_v21  ;;  %vm8092_vm4 = vmor %vm3949_vm3, %vm3950_vm1 }
0x11c8   :  { %v3946_v33 = vsub.f32 1.0, %v3945_v26  ;;  %v8067_v14 = vpop.eup %5815  ;;  %5821 = vrcp.f32 %v8063_v60  ;;  %v4307_v20 = vand.u32 2147483648, %v4286_v21  ;;  %vm4301_vm6 = vweird.f32 %v4286_v21 }
0x11c9   :  { %v3932_v25 = vmul.f32 %v5812_v46, %v3931_v22  ;;  %5684 = vmatmul.msk.f32.vlgmr.msra.gmra.mxu0 %vm216_vm0, %v3928_v49  ;;  %v4488_v58 = vsel %vm216_vm0, %v8067_v14, 0.0  ;;  %vm4306_vm8 = vcmp.eq.f32.partialorder %v4305_v55, 8.507059e+37  ;;  %vm3954_vm10 = vcmp.eq.f32.partialorder %v3953_v52, 8.507059e+37 }
0x11ca   :  { %v3947_v35 = vmul.f32 %v8056_v4, %v3946_v33  ;;  %4489 = vadd.xlane.f32.xlu1 %v4488_v58  ;;  %v4308_v3 = vor.u32 1.1754944e-38, %v4307_v20  ;;  %vm4316_vm11 = vweird.f32 %v8060_v54  ;;  %v4322_v53 = vand.u32 2147483648, %v8060_v54 }
0x11cb   :  { %v3933_v18 = vadd.f32 %v5812_v46, %v3932_v25  ;;  %v3970_v22 = vand.u32 2147483648, %v8063_v60 }
0x11cc   :  { %v5818_v36 = vpop.eup %5817  ;;  %v3948_v11 = vadd.f32 %v8056_v4, %v3947_v35 }
0x11cd   :  { %v4297_v9 = vmul.f32 %v5818_v36, %v4286_v21  ;;  %v8077_v31 = vpop.xlane.xlu0 %4291  ;;  %v3937_v7 = vsel %vm8070_vm14, %v5812_v46, %v3933_v18  ;;  %v5820_v38 = vpop.eup %5819  ;;  %vm4302_vm2 = vweird.f32 %v5818_v36  ;;  %v4320_v21 = vand.u32 2147483647, %v8060_v54 }
0x11ce   :  { %5823 = vrcp.f32 %v8077_v31  ;;  %v4312_v12 = vmul.f32 %v5820_v38, %v8060_v54  ;;  %v5822_v8 = vpop.eup %5821  ;;  %v3942_v47 = vsel %vm3939_vm15, %v3941_v5, %v3937_v7  ;;  %vm4303_vm7 = vmor %vm4301_vm6, %vm4302_vm2  ;;  %vm4317_vm9 = vweird.f32 %v5820_v38 }
0x11cf   :  { %v4298_v42 = vsub.f32 1.0, %v4297_v9  ;;  %v3960_v44 = vmul.f32 %v5822_v8, %v8063_v60  ;;  %v3943_v32 = vmul.f32 %v8003_v27, %v3942_v47  ;;  %v3952_v27 = vsel %vm8092_vm4, %v8056_v4, %v3948_v11  ;;  %vm8106_vm12 = vmor %vm4316_vm11, %vm4317_vm9 }
0x11d0   :  { %v4313_v51 = vsub.f32 1.0, %v4312_v12  ;;  %v3957_v26 = vsel %vm3954_vm10, %v3956_v29, %v3952_v27  ;;  %vm3965_vm13 = vweird.f32 %v5822_v8  ;;  %vm3964_vm14 = vweird.f32 %v8063_v60 }
0x11d1   :  { %v4299_v15 = vmul.f32 %v5818_v36, %v4298_v42  ;;  %v3961_v39 = vsub.f32 1.0, %v3960_v44  ;;  %5685 = vmatmul.msk.f32.gmra.mxu0 %vm216_vm0, %v3943_v32  ;;  %v3968_v54 = vand.u32 2147483647, %v8063_v60  ;;  %v3958_v16 = vmul.f32 %v8005_v57, %v3957_v26  ;;  %vm3966_vm1 = vmor %vm3964_vm14, %vm3965_vm13 }
0x11d2   :  { %v4314_v43 = vmul.f32 %v5820_v38, %v4313_v51  ;;  %vm4321_vm15 = vcmp.eq.f32.partialorder %v4320_v21, 8.507059e+37  ;;  %v4337_v35 = vand.u32 2147483648, %v8077_v31  ;;  %vm4331_vm4 = vweird.f32 %v8077_v31 }
0x11d3   :  { %v4300_v56 = vadd.f32 %v5818_v36, %v4299_v15  ;;  %v3962_v1 = vmul.f32 %v5822_v8, %v3961_v39  ;;  %vm3969_vm3 = vcmp.eq.f32.partialorder %v3968_v54, 8.507059e+37  ;;  %v4335_v58 = vand.u32 2147483647, %v8077_v31 }
0x11d4   :  { %v5824_v17 = vpop.eup %5823  ;;  %v4315_v19 = vadd.f32 %v5820_v38, %v4314_v43  ;;  %v4338_v7 = vor.u32 1.1754944e-38, %v4337_v35 }
0x11d5   :  { %v4304_v10 = vsel %vm4303_vm7, %v5818_v36, %v4300_v56  ;;  %v4327_v46 = vmul.f32 %v5824_v17, %v8077_v31  ;;  %v3963_v49 = vadd.f32 %v5822_v8, %v3962_v1  ;;  %v3971_v36 = vor.u32 1.1754944e-38, %v3970_v22 }
0x11d6   :  { %v4309_v40 = vsel %vm4306_vm8, %v4308_v3, %v4304_v10  ;;  %v4319_v25 = vsel %vm8106_vm12, %v5820_v38, %v4315_v19  ;;  %vm4332_vm2 = vweird.f32 %v5824_v17  ;;  %vm4336_vm7 = vcmp.eq.f32.partialorder %v4335_v58, 8.507059e+37 }
0x11d7   :  { %v4310_v37 = vmul.f32 %v8019_v23, %v4309_v40  ;;  %v4328_v24 = vsub.f32 1.0, %v4327_v46  ;;  %v4323_v23 = vor.u32 1.1754944e-38, %v4322_v53  ;;  %v3967_v18 = vsel %vm3966_vm1, %v5822_v8, %v3963_v49  ;;  %vm4333_vm6 = vmor %vm4331_vm4, %vm4332_vm2 }
0x11d8   :  { %v3972_v9 = vsel %vm3969_vm3, %v3971_v36, %v3967_v18 }
0x11d9   :  { %v4329_v33 = vmul.f32 %v5824_v17, %v4328_v24  ;;  %5697 = vmatmul.msk.f32.vlgmr.msra.gmra.mxu2 %vm216_vm0, %v4310_v37  ;;  %5686 = vmatmul.msk.f32.gmra.mxu0 %vm216_vm0, %v3958_v16  ;;  %v4324_v34 = vsel %vm4321_vm15, %v4323_v23, %v4319_v25  ;;  %v3973_v38 = vmul.f32 %v8017_v0, %v3972_v9 }
0x11da   :  { %v4325_v60 = vmul.f32 %v8021_v63, %v4324_v34 }
0x11db   :  { %v4330_v48 = vadd.f32 %v5824_v17, %v4329_v33 }
0x11dd   :  { %v4334_v57 = vsel %vm4333_vm6, %v5824_v17, %v4330_v48 }
0x11de   :  { %v4339_v5 = vsel %vm4336_vm7, %v4338_v7, %v4334_v57 }
0x11df   :  { %v4340_v59 = vmul.f32 %v8029_v28, %v4339_v5 }
0x11e1   :  { %5698 = vmatmul.msk.f32.gmra.mxu2 %vm216_vm0, %v4325_v60  ;;  %5687 = vmatmul.msk.f32.gmra.mxu0 %vm216_vm0, %v3973_v38 }
0x11e9   :  { %5699 = vmatmul.msk.f32.gmra.mxu2 %vm216_vm0, %v4340_v59 }
0x1225   :  { %v4481_v42 = vpop.xlane.xlu2 %4480 }
0x1226   :  { %5825 = vrcp.f32 %v4481_v42  ;;  %v4502_v55 = vand.u32 2147483648, %v4481_v42  ;;  %v4500_v0 = vand.u32 2147483647, %v4481_v42  ;;  %vm4496_vm9 = vweird.f32 %v4481_v42 }
0x1228   :  { %v4503_v28 = vor.u32 1.1754944e-38, %v4502_v55  ;;  %vm4501_vm11 = vcmp.eq.f32.partialorder %v4500_v0, 8.507059e+37 }
0x122c   :  { %v5826_v31 = vpop.eup %5825 }
0x122d   :  { %v4492_v12 = vmul.f32 %v5826_v31, %v4481_v42  ;;  %v4484_v63 = vpop.xlane.xlu1 %4483  ;;  %vm4497_vm8 = vweird.f32 %v5826_v31 }
0x122e   :  { %5827 = vrcp.f32 %v4484_v63  ;;  %v4295_v8 = vpop.xlane.xlu2 %4294  ;;  %vm4498_vm10 = vmor %vm4496_vm9, %vm4497_vm8  ;;  %v4517_v39 = vand.u32 2147483648, %v4484_v63  ;;  %v4515_v27 = vand.u32 2147483647, %v4484_v63  ;;  %vm4511_vm14 = vweird.f32 %v4484_v63 }
0x122f   :  { %v4493_v11 = vsub.f32 1.0, %v4492_v12  ;;  %5829 = vrcp.f32 %v4295_v8  ;;  %v4352_v10 = vand.u32 2147483648, %v4295_v8  ;;  %v4350_v1 = vand.u32 2147483647, %v4295_v8  ;;  %v5715_v12 = vld [vmem:[%s8325_s16 + $0x38] sm:$0xff] }
0x1230   :  { %v4518_v53 = vor.u32 1.1754944e-38, %v4517_v39  ;;  %vm4346_vm1 = vweird.f32 %v4295_v8  ;;  %vm4516_vm2 = vcmp.eq.f32.partialorder %v4515_v27, 8.507059e+37  ;;  %4634 = vmatpush.msrb.mxu1 %v5715_v12 }
0x1231   :  { %v4494_v20 = vmul.f32 %v5826_v31, %v4493_v11  ;;  %vm4351_vm4 = vcmp.eq.f32.partialorder %v4350_v1, 8.507059e+37 }
0x1233   :  { %v4495_v47 = vadd.f32 %v5826_v31, %v4494_v20 }
0x1234   :  { %v5828_v15 = vpop.eup %5827 }
0x1235   :  { %v5830_v51 = vpop.eup %5829  ;;  %v4499_v44 = vsel %vm4498_vm10, %v5826_v31, %v4495_v47  ;;  %v4507_v52 = vmul.f32 %v5828_v15, %v4484_v63  ;;  %v4487_v29 = vpop.xlane.xlu0 %4486  ;;  %vm4512_vm12 = vweird.f32 %v5828_v15  ;;  %v5714_v63 = vld [vmem:[%s8325_s16 + $0x30] sm:$0xff] }
0x1236   :  { %v4504_v32 = vsel %vm4501_vm11, %v4503_v28, %v4499_v44  ;;  %v4342_v45 = vmul.f32 %v5830_v51, %v4295_v8  ;;  %5831 = vrcp.f32 %v4487_v29  ;;  %vm4347_vm13 = vweird.f32 %v5830_v51  ;;  %vm4513_vm15 = vmor %vm4511_vm14, %vm4512_vm12  ;;  %4635 = vmatpush.msrb.mxu1 %v5714_v63 }
0x1237   :  { %v4505_v56 = vmul.f32 %v8036_v41, %v4504_v32  ;;  %v4508_v43 = vsub.f32 1.0, %v4507_v52  ;;  %vm4348_vm3 = vmor %vm4346_vm1, %vm4347_vm13  ;;  %v4353_v41 = vor.u32 1.1754944e-38, %v4352_v10  ;;  %v4532_v25 = vand.u32 2147483648, %v4487_v29 }
0x1238   :  { %v4343_v17 = vsub.f32 1.0, %v4342_v45  ;;  %v4530_v18 = vand.u32 2147483647, %v4487_v29  ;;  %vm4526_vm7 = vweird.f32 %v4487_v29 }
0x1239   :  { %v4509_v3 = vmul.f32 %v5828_v15, %v4508_v43  ;;  %5710 = vmatmul.msk.f32.vlgmr.msrb.gmra.mxu0 %vm216_vm0, %v4505_v56  ;;  %v4533_v36 = vor.u32 1.1754944e-38, %v4532_v25  ;;  %v6184_v25 = vmov 16.0  }
0x123a   :  { %v4344_v19 = vmul.f32 %v5830_v51, %v4343_v17  ;;  %vm4531_vm9 = vcmp.eq.f32.partialorder %v4530_v18, 8.507059e+37 }
0x123b   :  { %v4510_v46 = vadd.f32 %v5828_v15, %v4509_v3 }
0x123c   :  { %v5832_v40 = vpop.eup %5831  ;;  %v4345_v37 = vadd.f32 %v5830_v51, %v4344_v19 }
0x123d   :  { %v4522_v21 = vmul.f32 %v5832_v40, %v4487_v29  ;;  %v4514_v24 = vsel %vm4513_vm15, %v5828_v15, %v4510_v46  ;;  %v4490_v23 = vpop.xlane.xlu1 %4489  ;;  %vm4527_vm6 = vweird.f32 %v5832_v40 }
0x123e   :  { %v4349_v26 = vsel %vm4348_vm3, %v5830_v51, %v4345_v37  ;;  %v4519_v4 = vsel %vm4516_vm2, %v4518_v53, %v4514_v24  ;;  %5833 = vrcp.f32 %v4490_v23  ;;  %vm4528_vm8 = vmor %vm4526_vm7, %vm4527_vm6  ;;  %v4547_v60 = vand.u32 2147483648, %v4490_v23 }
0x123f   :  { %v4523_v49 = vsub.f32 1.0, %v4522_v21  ;;  %v4354_v22 = vsel %vm4351_vm4, %v4353_v41, %v4349_v26  ;;  %v4520_v33 = vmul.f32 %v8040_v62, %v4519_v4  ;;  %v4545_v7 = vand.u32 2147483647, %v4490_v23 }
0x1240   :  { %v4355_v54 = vmul.f32 %v8042_v2, %v4354_v22  ;;  %vm4541_vm11 = vweird.f32 %v4490_v23  ;;  %v4548_v5 = vor.u32 1.1754944e-38, %v4547_v60  ;;  %5835 = vrcp.f32 %v6184_v25 }
0x1241   :  { %v4524_v16 = vmul.f32 %v5832_v40, %v4523_v49  ;;  %5711 = vmatmul.msk.f32.gmra.mxu0 %vm216_vm0, %v4520_v33  ;;  %vm4546_vm13 = vcmp.eq.f32.partialorder %v4545_v7, 8.507059e+37 }
0x1242   :  { %5700 = vmatmul.msk.f32.gmra.mxu2 %vm216_vm0, %v4355_v54 }
0x1243   :  { %v4525_v34 = vadd.f32 %v5832_v40, %v4524_v16 }
0x1244   :  { %v5834_v62 = vpop.eup %5833 }
0x1245   :  { %v4529_v48 = vsel %vm4528_vm8, %v5832_v40, %v4525_v34  ;;  %v4537_v9 = vmul.f32 %v5834_v62, %v4490_v23  ;;  %vm4542_vm10 = vweird.f32 %v5834_v62 }
0x1246   :  { %v4534_v35 = vsel %vm4531_vm9, %v4533_v36, %v4529_v48  ;;  %vm4543_vm12 = vmor %vm4541_vm11, %vm4542_vm10  ;;  %v5836_v23 = vpop.eup %5835 }
0x1247   :  { %v4535_v58 = vmul.f32 %v8051_v50, %v4534_v35  ;;  %v4538_v2 = vsub.f32 1.0, %v4537_v9  ;;  %v4198_v50 = vpop.f32.mrf.mxu0  ;;  %v4669_v54 = vmul.f32 16.0, %v5836_v23  ;;  %vm4673_vm14 = vweird.f32 %v5836_v23 }
0x1248   :  { %v4199_v0 = vadd.f32 %v4198_v50, %v7968_v61 }
0x1249   :  { %5712 = vmatmul.msk.f32.gmra.mxu0 %vm216_vm0, %v4535_v58  ;;  %v4539_v57 = vmul.f32 %v5834_v62, %v4538_v2  ;;  %v4670_v16 = vsub.f32 1.0, %v4669_v54 }
0x124b   :  { %v4540_v38 = vadd.f32 %v5834_v62, %v4539_v57  ;;  %v4671_v18 = vmul.f32 %v5836_v23, %v4670_v16 }
0x124d   :  { %v4544_v59 = vsel %vm4543_vm12, %v5834_v62, %v4540_v38  ;;  %v4672_v34 = vadd.f32 %v5836_v23, %v4671_v18 }
0x124e   :  { %v4549_v42 = vsel %vm4546_vm13, %v4548_v5, %v4544_v59 }
0x124f   :  { %v4550_v31 = vmul.f32 %v8067_v14, %v4549_v42  ;;  %v4201_v8 = vpop.f32.mrf.mxu0  ;;  %v8155_v36 = vsel %vm4673_vm14, %v5836_v23, %v4672_v34 }
0x1250   :  { %v4202_v51 = vadd.f32 %v4201_v8, %v7970_v13  ;;  %v5764_v13 = vld [vmem:[#allocation10 + $0x3] ss:$0 sm:$0xff] }
0x1251   :  { %5713 = vmatmul.msk.f32.gmra.mxu0 %vm216_vm0, %v4550_v31 }
0x1257   :  { %v4204_v11 = vpop.f32.mrf.mxu0 }
0x1258   :  { %v4205_v45 = vadd.f32 %v4204_v11, %v7972_v30 }
0x125c   :  { %v4389_v55 = vpop.f32.mrf.mxu2 }
0x125d   :  { %v4401_v14 = vadd.f32 %v4389_v55, %v4199_v0 }
0x125f   :  { %v4207_v20 = vpop.f32.mrf.mxu0 }
0x1260   :  { %v4208_v17 = vadd.f32 %v4207_v20, %v7974_v6  ;;  %v4766_v20 = vld [vmem:[#allocation11 + $0x8] sm:$0xff] }
0x1261   :  { %4797 = vmatpush.msrb.mxu2 %v4766_v20 }
0x1264   :  { %v4392_v28 = vpop.f32.mrf.mxu2 }
0x1265   :  { %v4402_v44 = vadd.f32 %v4392_v28, %v4202_v51 }
0x126c   :  { %v4395_v32 = vpop.f32.mrf.mxu2 }
0x126d   :  { %v4403_v56 = vadd.f32 %v4395_v32, %v4205_v45 }
0x12b6   :  { %v4584_v47 = vpop.f32.mrf.mxu0 }
0x12b7   :  { %v4596_v15 = vadd.f32 %v4584_v47, %v4401_v14  ;;  %v4765_v47 = vld [vmem:[#allocation11] sm:$0xff] }
0x12b8   :  { %4798 = vmatpush.msrb.mxu2 %v4765_v47 }
0x12b9   :  { %5716 = vmatmul.msk.f32.vlgmr.msrb.gmra.mxu1 %vm3693_vm5, %v4596_v15 }
0x12be   :  { %v4587_v52 = vpop.f32.mrf.mxu0 }
0x12bf   :  { %v4597_v29 = vadd.f32 %v4587_v52, %v4402_v44 }
0x12c1   :  { %5717 = vmatmul.msk.f32.gmra.mxu1 %vm3693_vm5, %v4597_v29 }
0x12c5   :  { %v4398_v61 = vpop.f32.mrf.mxu2 }
0x12c6   :  { %v4590_v43 = vpop.f32.mrf.mxu0  ;;  %v4404_v3 = vadd.f32 %v4398_v61, %v4208_v17 }
0x12c7   :  { %v4598_v39 = vadd.f32 %v4590_v43, %v4403_v56 }
0x12c9   :  { %5718 = vmatmul.msk.f32.gmra.mxu1 %vm3693_vm5, %v4598_v39 }
0x12ce   :  { %v4593_v27 = vpop.f32.mrf.mxu0 }
0x12cf   :  { %v4599_v10 = vadd.f32 %v4593_v27, %v4404_v3 }
0x12d1   :  { %5719 = vmatmul.msk.f32.gmra.mxu1 %vm3693_vm5, %v4599_v10 }
0x1336   :  { %v4637_v19 = vpop.f32.mrf.mxu1 }
0x1337   :  { %v4638_v1 = vadd.f32 %v5764_v13, %v4637_v19 }
0x1339   :  { %v4649_v46 = vadd.f32 %v4638_v1, %v4596_v15  ;;  %v5766_v1 = vld [vmem:[#allocation16 + $0x1] ss:$0 sm:$0xff] }
0x133b   :  { %v4656_v40 = vsel %vm3693_vm5, %v4649_v46, 0.0 }
0x133c   :  { %4657 = vadd.xlane.f32.xlu2 %v4656_v40 }
0x133e   :  { %v4640_v30 = vpop.f32.mrf.mxu1 }
0x133f   :  { %v4641_v53 = vadd.f32 %v5764_v13, %v4640_v30 }
0x1341   :  { %v4650_v37 = vadd.f32 %v4641_v53, %v4597_v29 }
0x1343   :  { %v4659_v41 = vsel %vm3693_vm5, %v4650_v37, 0.0 }
0x1344   :  { %4660 = vadd.xlane.f32.xlu0 %v4659_v41 }
0x1346   :  { %v4643_v21 = vpop.f32.mrf.mxu1 }
0x1347   :  { %v4644_v6 = vadd.f32 %v5764_v13, %v4643_v21 }
0x1349   :  { %v4651_v24 = vadd.f32 %v4644_v6, %v4598_v39 }
0x134b   :  { %v4662_v26 = vsel %vm3693_vm5, %v4651_v24, 0.0 }
0x134c   :  { %4663 = vadd.xlane.f32.xlu1 %v4662_v26 }
0x134e   :  { %v4646_v4 = vpop.f32.mrf.mxu1 }
0x134f   :  { %v4647_v49 = vadd.f32 %v5764_v13, %v4646_v4 }
0x1351   :  { %v4652_v22 = vadd.f32 %v4647_v49, %v4599_v10  ;;  %v5765_v10 = vld [vmem:[#allocation16] ss:$0 sm:$0xff] }
0x1353   :  { %v4665_v33 = vsel %vm3693_vm5, %v4652_v22, 0.0 }
0x1354   :  { %4666 = vadd.xlane.f32.xlu2 %v4665_v33 }
0x13af   :  { %v4658_v48 = vpop.xlane.xlu2 %4657 }
0x13b0   :  { %v4675_v35 = vmul.f32 %v8155_v36, %v4658_v48 }
0x13b2   :  { %v4679_v62 = vsub.f32 %v4649_v46, %v4675_v35 }
0x13b4   :  { %v4683_v58 = vmul.f32 %v4679_v62, %v4679_v62 }
0x13b6   :  { %v4687_v9 = vsel %vm3693_vm5, %v4683_v58, 0.0 }
0x13b7   :  { %v4661_v2 = vpop.xlane.xlu0 %4660  ;;  %4688 = vadd.xlane.f32.xlu0 %v4687_v9 }
0x13b8   :  { %v4676_v60 = vmul.f32 %v8155_v36, %v4661_v2 }
0x13ba   :  { %v8160_v57 = vsub.f32 %v4650_v37, %v4676_v60 }
0x13bc   :  { %v4684_v7 = vmul.f32 %v8160_v57, %v8160_v57 }
0x13be   :  { %v4690_v38 = vsel %vm3693_vm5, %v4684_v7, 0.0 }
0x13bf   :  { %4691 = vadd.xlane.f32.xlu1 %v4690_v38  ;;  %v4664_v5 = vpop.xlane.xlu1 %4663 }
0x13c0   :  { %v4677_v59 = vmul.f32 %v8155_v36, %v4664_v5 }
0x13c2   :  { %v8166_v42 = vsub.f32 %v4651_v24, %v4677_v59 }
0x13c4   :  { %v4685_v31 = vmul.f32 %v8166_v42, %v8166_v42 }
0x13c6   :  { %v4693_v50 = vsel %vm3693_vm5, %v4685_v31, 0.0 }
0x13c7   :  { %4694 = vadd.xlane.f32.xlu2 %v4693_v50  ;;  %v4667_v12 = vpop.xlane.xlu2 %4666 }
0x13c8   :  { %v4678_v63 = vmul.f32 %v8155_v36, %v4667_v12 }
0x13ca   :  { %v8172_v8 = vsub.f32 %v4652_v22, %v4678_v63 }
0x13cc   :  { %v4686_v11 = vmul.f32 %v8172_v8, %v8172_v8 }
0x13ce   :  { %v4696_v55 = vsel %vm3693_vm5, %v4686_v11, 0.0 }
0x13cf   :  { %4697 = vadd.xlane.f32.xlu0 %v4696_v55 }
0x142a   :  { %v4689_v0 = vpop.xlane.xlu0 %4688 }
0x142b   :  { %v4699_v14 = vmul.f32 %v4689_v0, %v8155_v36 }
0x142d   :  { %v4703_v15 = vadd.f32 1e-12, %v4699_v14 }
0x142f   :  { %5837 = vrsqrt.f32 %v4703_v15  ;;  %vm4713_vm1 = vweird.f32 %v4703_v15 }
0x1432   :  { %v4692_v28 = vpop.xlane.xlu1 %4691 }
0x1433   :  { %v4700_v51 = vmul.f32 %v4692_v28, %v8155_v36 }
0x1435   :  { %v5838_v44 = vpop.eup %5837  ;;  %v4704_v52 = vadd.f32 1e-12, %v4700_v51 }
0x1436   :  { %v4708_v29 = vmul.f32 %v5838_v44, %v4703_v15  ;;  %vm4714_vm15 = vweird.f32 %v5838_v44 }
0x1437   :  { %5839 = vrsqrt.f32 %v4704_v52  ;;  %vm4715_vm2 = vmor %vm4713_vm1, %vm4714_vm15  ;;  %vm4723_vm4 = vweird.f32 %v4704_v52 }
0x1438   :  { %v4709_v32 = vmul.f32 %v5838_v44, %v4708_v29 }
0x143a   :  { %v4710_v45 = vmul.f32 0.5, %v4709_v32  ;;  %v4695_v56 = vpop.xlane.xlu2 %4694 }
0x143b   :  { %v4701_v43 = vmul.f32 %v4695_v56, %v8155_v36 }
0x143c   :  { %v4711_v39 = vsub.f32 1.5, %v4710_v45 }
0x143d   :  { %v5840_v61 = vpop.eup %5839  ;;  %v4705_v17 = vadd.f32 1e-12, %v4701_v43 }
0x143e   :  { %v4712_v3 = vmul.f32 %v5838_v44, %v4711_v39  ;;  %v4718_v27 = vmul.f32 %v5840_v61, %v4704_v52  ;;  %vm4724_vm3 = vweird.f32 %v5840_v61 }
0x143f   :  { %5841 = vrsqrt.f32 %v4705_v17  ;;  %vm4725_vm6 = vmor %vm4723_vm4, %vm4724_vm3  ;;  %vm4733_vm8 = vweird.f32 %v4705_v17 }
0x1440   :  { %v4716_v13 = vsel %vm4715_vm2, %v5838_v44, %v4712_v3  ;;  %v4719_v19 = vmul.f32 %v5840_v61, %v4718_v27 }
0x1441   :  { %v4747_v46 = vmul.f32 %v4716_v13, %v4679_v62 }
0x1442   :  { %v4720_v40 = vmul.f32 0.5, %v4719_v19  ;;  %v4698_v21 = vpop.xlane.xlu0 %4697 }
0x1443   :  { %v4754_v30 = vmul.f32 %v5765_v10, %v4747_v46  ;;  %v4702_v26 = vmul.f32 %v4698_v21, %v8155_v36 }
0x1444   :  { %v4721_v53 = vsub.f32 1.5, %v4720_v40 }
0x1445   :  { %v5842_v37 = vpop.eup %5841  ;;  %v8180_v41 = vadd.f32 %v5766_v1, %v4754_v30  ;;  %v4706_v22 = vadd.f32 1e-12, %v4702_v26  ;;  %v4973_v30 = vld [vmem:[%s8329_s20 + $0x8] sm:$0xff] }
0x1446   :  { %v4722_v6 = vmul.f32 %v5840_v61, %v4721_v53  ;;  %v4728_v24 = vmul.f32 %v5842_v37, %v4705_v17  ;;  %vm4734_vm7 = vweird.f32 %v5842_v37  ;;  %v4975_v17 = vld [vmem:[%s8329_s20 + $0x18] sm:$0xff] }
0x1447   :  { %5720 = vmatmul.msk.f32.vlgmr.msrb.gmra.mxu2 %vm3693_vm5, %v8180_v41  ;;  %5843 = vrsqrt.f32 %v4706_v22  ;;  %vm4735_vm9 = vmor %vm4733_vm8, %vm4734_vm7  ;;  %vm4743_vm11 = vweird.f32 %v4706_v22  ;;  %5004 = vmatpush.msrb.mxu3 %v4975_v17 }
0x1448   :  { %v4726_v4 = vsel %vm4725_vm6, %v5840_v61, %v4722_v6  ;;  %v4729_v49 = vmul.f32 %v5842_v37, %v4728_v24  ;;  %v4972_v24 = vld [vmem:[%s8329_s20] sm:$0xff] }
0x1449   :  { %v4748_v33 = vmul.f32 %v4726_v4, %v8160_v57 }
0x144a   :  { %v4730_v25 = vmul.f32 0.5, %v4729_v49 }
0x144b   :  { %v4755_v23 = vmul.f32 %v5765_v10, %v4748_v33 }
0x144c   :  { %v4731_v54 = vsub.f32 1.5, %v4730_v25 }
0x144d   :  { %v8186_v16 = vadd.f32 %v5766_v1, %v4755_v23  ;;  %v5844_v34 = vpop.eup %5843 }
0x144e   :  { %v4732_v18 = vmul.f32 %v5842_v37, %v4731_v54  ;;  %v4738_v62 = vmul.f32 %v5844_v34, %v4706_v22  ;;  %vm4744_vm10 = vweird.f32 %v5844_v34 }
0x144f   :  { %5721 = vmatmul.msk.f32.gmra.mxu2 %vm3693_vm5, %v8186_v16  ;;  %vm4745_vm12 = vmor %vm4743_vm11, %vm4744_vm10 }
0x1450   :  { %v4736_v48 = vsel %vm4735_vm9, %v5842_v37, %v4732_v18  ;;  %v4739_v58 = vmul.f32 %v5844_v34, %v4738_v62 }
0x1451   :  { %v4749_v35 = vmul.f32 %v4736_v48, %v8166_v42  ;;  %v5767_v42 = vld [vmem:[#allocation13] ss:$0 sm:$0xff] }
0x1452   :  { %v4740_v2 = vmul.f32 0.5, %v4739_v58 }
0x1453   :  { %v4756_v9 = vmul.f32 %v5765_v10, %v4749_v35 }
0x1454   :  { %v4741_v57 = vsub.f32 1.5, %v4740_v2 }
0x1455   :  { %v8191_v60 = vadd.f32 %v5766_v1, %v4756_v9 }
0x1456   :  { %v4742_v7 = vmul.f32 %v5844_v34, %v4741_v57 }
0x1457   :  { %5722 = vmatmul.msk.f32.gmra.mxu2 %vm3693_vm5, %v8191_v60 }
0x1458   :  { %v4746_v38 = vsel %vm4745_vm12, %v5844_v34, %v4742_v7 }
0x1459   :  { %v4750_v5 = vmul.f32 %v4746_v38, %v8172_v8 }
0x145b   :  { %v4757_v59 = vmul.f32 %v5765_v10, %v4750_v5  ;;  %v4974_v10 = vld [vmem:[%s8329_s20 + $0x10] sm:$0xff]  ;;  %s6186_s20 = smov [#allocation17]  }
0x145c   :  { %5005 = vmatpush.msrb.mxu3 %v4974_v10  ;;  %s5139_s22 = sshll.u32 %s6186_s20, 4  ;;  %s5140_s22 = int_to_ptr.vmem [resolvable:$true] %s5139_s22 }
0x145d   :  { %v8196_v31 = vadd.f32 %v5766_v1, %v4757_v59 }
0x145e   :  { %5006 = vmatpush.msrb.mxu3 %v4973_v30 }
0x145f   :  { %5723 = vmatmul.msk.f32.gmra.mxu2 %vm3693_vm5, %v8196_v31 }
0x1460   :  { %5007 = vmatpush.msrb.mxu3 %v4972_v24 }
0x14ca   :  { %v4800_v50 = vpop.f32.mrf.mxu2 }
0x14cb   :  { %v8200_v12 = vadd.f32 %v5767_v42, %v4800_v50 }
0x14cd   :  { %v8203_v63 = vmul.f32 0.70710677, %v8200_v12 }
0x14cf   :  { %v4828_v11 = vand.u32 2147483647, %v8203_v63  ;;  %vm4820_vm11 = vcmp.ge.f32.partialorder %v8203_v63, 0.0  ;;  %v4812_v63 = vmul.f32 0.5, %v8200_v12 }
0x14d1   :  { %v4832_v55 = vmul.f32 0.3275911, %v4828_v11  ;;  %v4936_v19 = vsub.f32 0.0, %v4828_v11 }
0x14d2   :  { %v4803_v20 = vpop.f32.mrf.mxu2 }
0x14d3   :  { %v4836_v0 = vadd.f32 1.0, %v4832_v55  ;;  %v8206_v14 = vadd.f32 %v5767_v42, %v4803_v20  ;;  %v4940_v26 = vmul.f32 %v4936_v19, %v4828_v11 }
0x14d5   :  { %5845 = vrcp.f32 %v4836_v0  ;;  %v8209_v8 = vmul.f32 0.70710677, %v8206_v14  ;;  %v4851_v56 = vand.u32 2147483648, %v4836_v0  ;;  %v4849_v61 = vand.u32 2147483647, %v4836_v0 }
0x14d6   :  { %vm4845_vm14 = vweird.f32 %v4836_v0  ;;  %v4944_v48 = vmul.f32 1.442695, %v4940_v26 }
0x14d7   :  { %v8212_v47 = vand.u32 2147483647, %v8209_v8  ;;  %v4852_v13 = vor.u32 1.1754944e-38, %v4851_v56  ;;  %vm4850_vm1 = vcmp.eq.f32.partialorder %v4849_v61, 8.507059e+37 }
0x14d9   :  { %v4833_v15 = vmul.f32 0.3275911, %v8212_v47  ;;  %v4937_v59 = vsub.f32 0.0, %v8212_v47 }
0x14da   :  { %v4806_v28 = vpop.f32.mrf.mxu2 }
0x14db   :  { %v5846_v51 = vpop.eup %5845  ;;  %v8215_v44 = vadd.f32 %v5767_v42, %v4806_v28  ;;  %v4837_v29 = vadd.f32 1.0, %v4833_v15 }
0x14dc   :  { %v4841_v52 = vmul.f32 %v5846_v51, %v4836_v0  ;;  %vm4846_vm13 = vweird.f32 %v5846_v51 }
0x14dd   :  { %v8218_v32 = vmul.f32 0.70710677, %v8215_v44  ;;  %5847 = vrcp.f32 %v4837_v29  ;;  %vm4847_vm15 = vmor %vm4845_vm14, %vm4846_vm13  ;;  %v4866_v33 = vand.u32 2147483648, %v4837_v29  ;;  %v4864_v23 = vand.u32 2147483647, %v4837_v29 }
0x14de   :  { %v4842_v45 = vsub.f32 1.0, %v4841_v52  ;;  %vm4860_vm3 = vweird.f32 %v4837_v29  ;;  %v4941_v52 = vmul.f32 %v4937_v59, %v8212_v47  ;;  %vm4821_vm14 = vcmp.ge.f32.partialorder %v8209_v8, 0.0 }
0x14df   :  { %v8221_v43 = vand.u32 2147483647, %v8218_v32  ;;  %v4867_v9 = vor.u32 1.1754944e-38, %v4866_v33  ;;  %vm4865_vm6 = vcmp.eq.f32.partialorder %v4864_v23, 8.507059e+37 }
0x14e0   :  { %v4843_v39 = vmul.f32 %v5846_v51, %v4842_v45  ;;  %v4946_v19 = vmul.f32 1.442695, %v4941_v52 }
0x14e1   :  { %v4834_v3 = vmul.f32 0.3275911, %v8221_v43  ;;  %v4938_v10 = vsub.f32 0.0, %v8221_v43 }
0x14e2   :  { %v4844_v27 = vadd.f32 %v5846_v51, %v4843_v39  ;;  %v4809_v21 = vpop.f32.mrf.mxu2 }
0x14e3   :  { %v4838_v1 = vadd.f32 1.0, %v4834_v3  ;;  %v5848_v46 = vpop.eup %5847  ;;  %v8236_v49 = vadd.f32 %v5767_v42, %v4809_v21 }
0x14e4   :  { %v4848_v40 = vsel %vm4847_vm15, %v5846_v51, %v4844_v27  ;;  %v4856_v37 = vmul.f32 %v5848_v46, %v4837_v29  ;;  %vm4861_vm2 = vweird.f32 %v5848_v46 }
0x14e5   :  { %v4853_v53 = vsel %vm4850_vm1, %v4852_v13, %v4848_v40  ;;  %5849 = vrcp.f32 %v4838_v1  ;;  %v8239_v54 = vmul.f32 0.70710677, %v8236_v49  ;;  %vm4862_vm4 = vmor %vm4860_vm3, %vm4861_vm2  ;;  %v4881_v11 = vand.u32 2147483648, %v4838_v1 }
0x14e6   :  { %v4900_v6 = vmul.f32 1.0614054, %v4853_v53  ;;  %v4857_v4 = vsub.f32 1.0, %v4856_v37  ;;  %5851 = vpow2.f32 %v4944_v48  ;;  %v4879_v15 = vand.u32 2147483647, %v4838_v1 }
0x14e7   :  { %v8242_v62 = vand.u32 2147483647, %v8239_v54  ;;  %vm4875_vm8 = vweird.f32 %v4838_v1  ;;  %v4882_v56 = vor.u32 1.1754944e-38, %v4881_v11  ;;  %vm4822_vm2 = vcmp.ge.f32.partialorder %v8218_v32, 0.0 }
0x14e8   :  { %v4904_v22 = vadd.f32 -1.4531521, %v4900_v6  ;;  %v4858_v25 = vmul.f32 %v5848_v46, %v4857_v4  ;;  %vm4880_vm10 = vcmp.eq.f32.partialorder %v4879_v15, 8.507059e+37  ;;  %v4942_v6 = vmul.f32 %v4938_v10, %v8221_v43 }
0x14e9   :  { %v4835_v7 = vmul.f32 0.3275911, %v8242_v62  ;;  %v4939_v12 = vsub.f32 0.0, %v8242_v62  ;;  %vm4823_vm3 = vcmp.ge.f32.partialorder %v8239_v54, 0.0 }
0x14ea   :  { %v4908_v18 = vmul.f32 %v4904_v22, %v4853_v53  ;;  %v4859_v35 = vadd.f32 %v5848_v46, %v4858_v25  ;;  %v6185_v22 = vmov -1.0  }
0x14eb   :  { %v5850_v34 = vpop.eup %5849  ;;  %v4839_v55 = vadd.f32 1.0, %v4835_v7  ;;  %v4824_v33 = vsel %vm4820_vm11, 1.0, %v6185_v22 }
0x14ec   :  { %v4912_v58 = vadd.f32 1.4214138, %v4908_v18  ;;  %v4871_v2 = vmul.f32 %v5850_v34, %v4838_v1  ;;  %v4863_v57 = vsel %vm4862_vm4, %v5848_v46, %v4859_v35  ;;  %vm4876_vm7 = vweird.f32 %v5850_v34  ;;  %v5852_v17 = vpop.eup %5851 }
0x14ed   :  { %v4868_v5 = vsel %vm4865_vm6, %v4867_v9, %v4863_v57  ;;  %5853 = vrcp.f32 %v4839_v55  ;;  %vm4877_vm9 = vmor %vm4875_vm8, %vm4876_vm7  ;;  %v4894_v25 = vand.u32 2147483647, %v4839_v55  ;;  %v4896_v23 = vand.u32 2147483648, %v4839_v55 }
0x14ee   :  { %v4916_v38 = vmul.f32 %v4912_v58, %v4853_v53  ;;  %v4872_v42 = vsub.f32 1.0, %v4871_v2  ;;  %v4901_v50 = vmul.f32 1.0614054, %v4868_v5  ;;  %5855 = vpow2.f32 %v4946_v19 }
0x14ef   :  { %v4948_v58 = vmul.f32 1.442695, %v4942_v6  ;;  %vm4890_vm13 = vweird.f32 %v4839_v55  ;;  %v4897_v7 = vor.u32 1.1754944e-38, %v4896_v23  ;;  %vm4895_vm1 = vcmp.eq.f32.partialorder %v4894_v25, 8.507059e+37 }
0x14f0   :  { %v4920_v20 = vadd.f32 -0.28449672, %v4916_v38  ;;  %v4873_v0 = vmul.f32 %v5850_v34, %v4872_v42  ;;  %v4905_v28 = vadd.f32 -1.4531521, %v4901_v50 }
0x14f1   :  { %5857 = vpow2.f32 %v4948_v58 }
0x14f2   :  { %v4924_v51 = vmul.f32 %v4920_v20, %v4853_v53  ;;  %v4874_v29 = vadd.f32 %v5850_v34, %v4873_v0  ;;  %v4909_v45 = vmul.f32 %v4905_v28, %v4868_v5 }
0x14f3   :  { %v5854_v40 = vpop.eup %5853 }
0x14f4   :  { %v4928_v39 = vadd.f32 0.2548296, %v4924_v51  ;;  %v4878_v61 = vsel %vm4877_vm9, %v5850_v34, %v4874_v29  ;;  %v4913_v3 = vadd.f32 1.4214138, %v4909_v45  ;;  %v4886_v37 = vmul.f32 %v5854_v40, %v4839_v55  ;;  %v5856_v38 = vpop.eup %5855 }
0x14f5   :  { %v4883_v27 = vsel %vm4880_vm10, %v4882_v56, %v4878_v61  ;;  %vm4891_vm12 = vweird.f32 %v5854_v40  ;;  %v4943_v29 = vmul.f32 %v4939_v12, %v8242_v62  ;;  %v4813_v61 = vmul.f32 0.5, %v8206_v14 }
0x14f6   :  { %v4932_v13 = vmul.f32 %v4928_v39, %v4853_v53  ;;  %v4902_v46 = vmul.f32 1.0614054, %v4883_v27  ;;  %v4917_v30 = vmul.f32 %v4913_v3, %v4868_v5  ;;  %v4887_v4 = vsub.f32 1.0, %v4886_v37  ;;  %vm4892_vm15 = vmor %vm4890_vm13, %vm4891_vm12 }
0x14f7   :  { %v5858_v39 = vpop.eup %5857  ;;  %v4950_v19 = vmul.f32 1.442695, %v4943_v29 }
0x14f8   :  { %v4952_v47 = vmul.f32 %v5852_v17, %v4932_v13  ;;  %v4906_v1 = vadd.f32 -1.4531521, %v4902_v46  ;;  %v4921_v21 = vadd.f32 -0.28449672, %v4917_v30  ;;  %v4888_v48 = vmul.f32 %v5854_v40, %v4887_v4 }
0x14f9   :  { %5859 = vpow2.f32 %v4950_v19 }
0x14fa   :  { %v4956_v24 = vsub.f32 1.0, %v4952_v47  ;;  %v4910_v26 = vmul.f32 %v4906_v1, %v4883_v27  ;;  %v4925_v53 = vmul.f32 %v4921_v21, %v4868_v5  ;;  %v4889_v2 = vadd.f32 %v5854_v40, %v4888_v48 }
0x14fc   :  { %v4960_v18 = vmul.f32 %v4956_v24, %v4824_v33  ;;  %v4914_v34 = vadd.f32 1.4214138, %v4910_v26  ;;  %v4929_v35 = vadd.f32 0.2548296, %v4925_v53  ;;  %v4893_v50 = vsel %vm4892_vm15, %v5854_v40, %v4889_v2 }
0x14fd   :  { %v4898_v20 = vsel %vm4895_vm1, %v4897_v7, %v4893_v50  ;;  %v4826_v40 = vsel %vm4822_vm2, 1.0, %v6185_v22  ;;  %v4827_v26 = vsel %vm4823_vm3, 1.0, %v6185_v22  ;;  %v4815_v33 = vmul.f32 0.5, %v8236_v49 }
0x14fe   :  { %v4964_v9 = vadd.f32 1.0, %v4960_v18  ;;  %v4918_v43 = vmul.f32 %v4914_v34, %v4883_v27  ;;  %v4933_v57 = vmul.f32 %v4929_v35, %v4868_v5  ;;  %v4903_v15 = vmul.f32 1.0614054, %v4898_v20 }
0x14ff   :  { %v4825_v5 = vsel %vm4821_vm14, 1.0, %v6185_v22  ;;  %v5860_v21 = vpop.eup %5859 }
0x1500   :  { %v4968_v59 = vmul.f32 %v4964_v9, %v4812_v63  ;;  %v4922_v42 = vadd.f32 -0.28449672, %v4918_v43  ;;  %v4953_v11 = vmul.f32 %v5856_v38, %v4933_v57  ;;  %v4907_v51 = vadd.f32 -1.4531521, %v4903_v15 }
0x1502   :  { %v4926_v0 = vmul.f32 %v4922_v42, %v4883_v27  ;;  %5724 = vmatmul.msk.f32.vlgmr.msrb.gmra.mxu3 %vm216_vm0, %v4968_v59  ;;  %v4957_v55 = vsub.f32 1.0, %v4953_v11  ;;  %v4911_v56 = vmul.f32 %v4907_v51, %v4898_v20 }
0x1504   :  { %v4930_v28 = vadd.f32 0.2548296, %v4926_v0  ;;  %v4961_v52 = vmul.f32 %v4957_v55, %v4825_v5  ;;  %v4915_v10 = vadd.f32 1.4214138, %v4911_v56 }
0x1506   :  { %v4934_v45 = vmul.f32 %v4930_v28, %v4883_v27  ;;  %v4965_v17 = vadd.f32 1.0, %v4961_v52  ;;  %v4919_v8 = vmul.f32 %v4915_v10, %v4898_v20  ;;  %v4814_v27 = vmul.f32 0.5, %v8215_v44  ;;  %v5768_v44 = vld [vmem:[#allocation14] ss:$0 sm:$0xff] }
0x1508   :  { %v4954_v3 = vmul.f32 %v5858_v39, %v4934_v45  ;;  %v4969_v13 = vmul.f32 %v4965_v17, %v4813_v61  ;;  %v4923_v62 = vadd.f32 -0.28449672, %v4919_v8 }
0x150a   :  { %v4958_v46 = vsub.f32 1.0, %v4954_v3  ;;  %5725 = vmatmul.msk.f32.gmra.mxu3 %vm216_vm0, %v4969_v13  ;;  %v4927_v14 = vmul.f32 %v4923_v62, %v4898_v20 }
0x150c   :  { %v4962_v30 = vmul.f32 %v4958_v46, %v4826_v40  ;;  %v4931_v37 = vadd.f32 0.2548296, %v4927_v14 }
0x150e   :  { %v4966_v47 = vadd.f32 1.0, %v4962_v30  ;;  %v4935_v32 = vmul.f32 %v4931_v37, %v4898_v20  ;;  %v5769_v37 = vld [vmem:[#allocation16 + $0x2] ss:$0 sm:$0xff] }
0x1510   :  { %v4970_v1 = vmul.f32 %v4966_v47, %v4814_v27  ;;  %v4955_v6 = vmul.f32 %v5860_v21, %v4935_v32 }
0x1512   :  { %5726 = vmatmul.msk.f32.gmra.mxu3 %vm216_vm0, %v4970_v1  ;;  %v4959_v24 = vsub.f32 1.0, %v4955_v6  ;;  %v5770_v6 = vld [vmem:[#allocation16 + $0x3] ss:$0 sm:$0xff] }
0x1514   :  { %v4963_v4 = vmul.f32 %v4959_v24, %v4827_v26 }
0x1516   :  { %v4967_v53 = vadd.f32 1.0, %v4963_v4 }
0x1518   :  { %v4971_v25 = vmul.f32 %v4967_v53, %v4815_v33 }
0x151a   :  { %5727 = vmatmul.msk.f32.gmra.mxu3 %vm216_vm0, %v4971_v25 }
0x1585   :  { %v5009_v23 = vpop.f32.mrf.mxu3 }
0x1586   :  { %v5010_v18 = vadd.f32 %v5768_v44, %v5009_v23 }
0x1588   :  { %v5021_v34 = vadd.f32 %v5010_v18, %v8180_v41 }
0x158a   :  { %v5029_v48 = vsel %vm3693_vm5, %v5021_v34, 0.0 }
0x158b   :  { %5030 = vadd.xlane.f32.xlu1 %v5029_v48 }
0x158d   :  { %v5012_v54 = vpop.f32.mrf.mxu3 }
0x158e   :  { %v5013_v63 = vadd.f32 %v5768_v44, %v5012_v54 }
0x1590   :  { %v5022_v35 = vadd.f32 %v5013_v63, %v8186_v16 }
0x1592   :  { %v5032_v22 = vsel %vm3693_vm5, %v5022_v35, 0.0 }
0x1593   :  { %5033 = vadd.xlane.f32.xlu2 %v5032_v22 }
0x1595   :  { %v5015_v49 = vpop.f32.mrf.mxu3 }
0x1596   :  { %v5016_v58 = vadd.f32 %v5768_v44, %v5015_v49 }
0x1598   :  { %v5023_v9 = vadd.f32 %v5016_v58, %v8191_v60 }
0x159a   :  { %v5035_v43 = vsel %vm3693_vm5, %v5023_v9, 0.0 }
0x159b   :  { %5036 = vadd.xlane.f32.xlu0 %v5035_v43 }
0x159d   :  { %v5018_v2 = vpop.f32.mrf.mxu3 }
0x159e   :  { %v5019_v57 = vadd.f32 %v5768_v44, %v5018_v2 }
0x15a0   :  { %v5024_v41 = vadd.f32 %v5019_v57, %v8196_v31 }
0x15a2   :  { %v5038_v7 = vsel %vm3693_vm5, %v5024_v41, 0.0 }
0x15a3   :  { %5039 = vadd.xlane.f32.xlu1 %v5038_v7 }
0x15fe   :  { %v5031_v38 = vpop.xlane.xlu1 %5030 }
0x15ff   :  { %v5041_v16 = vmul.f32 %v5031_v38, %v8155_v36 }
0x1601   :  { %v5045_v59 = vsub.f32 %v5021_v34, %v5041_v16 }
0x1603   :  { %v5049_v42 = vmul.f32 %v5045_v59, %v5045_v59 }
0x1605   :  { %v5053_v50 = vsel %vm3693_vm5, %v5049_v42, 0.0 }
0x1606   :  { %5054 = vadd.xlane.f32.xlu2 %v5053_v50  ;;  %v5034_v11 = vpop.xlane.xlu2 %5033 }
0x1607   :  { %v5042_v60 = vmul.f32 %v5034_v11, %v8155_v36 }
0x1609   :  { %v5046_v20 = vsub.f32 %v5022_v35, %v5042_v60 }
0x160b   :  { %v5050_v12 = vmul.f32 %v5046_v20, %v5046_v20 }
0x160d   :  { %v5056_v0 = vsel %vm3693_vm5, %v5050_v12, 0.0 }
0x160e   :  { %v5037_v15 = vpop.xlane.xlu0 %5036  ;;  %5057 = vadd.xlane.f32.xlu0 %v5056_v0 }
0x160f   :  { %v5043_v31 = vmul.f32 %v5037_v15, %v8155_v36 }
0x1611   :  { %v8282_v55 = vsub.f32 %v5023_v9, %v5043_v31 }
0x1613   :  { %v5051_v5 = vmul.f32 %v8282_v55, %v8282_v55 }
0x1615   :  { %v5059_v28 = vsel %vm3693_vm5, %v5051_v5, 0.0 }
0x1616   :  { %5060 = vadd.xlane.f32.xlu1 %v5059_v28  ;;  %v5040_v51 = vpop.xlane.xlu1 %5039 }
0x1617   :  { %v5044_v52 = vmul.f32 %v5040_v51, %v8155_v36 }
0x1619   :  { %v8288_v29 = vsub.f32 %v5024_v41, %v5044_v52 }
0x161b   :  { %v5052_v45 = vmul.f32 %v8288_v29, %v8288_v29 }
0x161d   :  { %v5062_v56 = vsel %vm3693_vm5, %v5052_v45, 0.0 }
0x161e   :  { %5063 = vadd.xlane.f32.xlu2 %v5062_v56 }
0x1679   :  { %v5055_v39 = vpop.xlane.xlu2 %5054 }
0x167a   :  { %v5065_v61 = vmul.f32 %v5055_v39, %v8155_v36 }
0x167c   :  { %v5069_v17 = vadd.f32 1e-12, %v5065_v61 }
0x167e   :  { %5861 = vrsqrt.f32 %v5069_v17  ;;  %vm5079_vm4 = vweird.f32 %v5069_v17 }
0x1681   :  { %v5058_v3 = vpop.xlane.xlu0 %5057 }
0x1682   :  { %v5066_v10 = vmul.f32 %v5058_v3, %v8155_v36 }
0x1684   :  { %v5862_v13 = vpop.eup %5861  ;;  %v5070_v46 = vadd.f32 1e-12, %v5066_v10 }
0x1685   :  { %v5074_v19 = vmul.f32 %v5862_v13, %v5069_v17  ;;  %vm5080_vm0 = vweird.f32 %v5862_v13 }
0x1686   :  { %5863 = vrsqrt.f32 %v5070_v46  ;;  %vm5081_vm6 = vmor %vm5079_vm4, %vm5080_vm0  ;;  %vm5089_vm8 = vweird.f32 %v5070_v46 }
0x1687   :  { %v5075_v8 = vmul.f32 %v5862_v13, %v5074_v19 }
0x1689   :  { %v5076_v40 = vmul.f32 0.5, %v5075_v8  ;;  %v5061_v30 = vpop.xlane.xlu1 %5060 }
0x168a   :  { %v5067_v27 = vmul.f32 %v5061_v30, %v8155_v36 }
0x168b   :  { %v5077_v62 = vsub.f32 1.5, %v5076_v40 }
0x168c   :  { %v5864_v47 = vpop.eup %5863  ;;  %v5071_v1 = vadd.f32 1e-12, %v5067_v27 }
0x168d   :  { %v5078_v14 = vmul.f32 %v5862_v13, %v5077_v62  ;;  %v5084_v32 = vmul.f32 %v5864_v47, %v5070_v46  ;;  %vm5090_vm7 = vweird.f32 %v5864_v47 }
0x168e   :  { %5865 = vrsqrt.f32 %v5071_v1  ;;  %vm5091_vm9 = vmor %vm5089_vm8, %vm5090_vm7  ;;  %vm5099_vm11 = vweird.f32 %v5071_v1 }
0x168f   :  { %v5082_v21 = vsel %vm5081_vm6, %v5862_v13, %v5078_v14  ;;  %v5085_v26 = vmul.f32 %v5864_v47, %v5084_v32 }
0x1690   :  { %v5113_v24 = vmul.f32 %v5082_v21, %v5045_v59 }
0x1691   :  { %v5086_v33 = vmul.f32 0.5, %v5085_v26  ;;  %v5064_v23 = vpop.xlane.xlu2 %5063 }
0x1692   :  { %v5120_v4 = vmul.f32 %v5769_v37, %v5113_v24  ;;  %v5068_v48 = vmul.f32 %v5064_v23, %v8155_v36 }
0x1693   :  { %v5087_v25 = vsub.f32 1.5, %v5086_v33 }
0x1694   :  { %v5127_v53 = vadd.f32 %v5770_v6, %v5120_v4  ;;  %v5866_v44 = vpop.eup %5865  ;;  %v5072_v35 = vadd.f32 1e-12, %v5068_v48 }
0x1695   :  { %v5088_v18 = vmul.f32 %v5864_v47, %v5087_v25  ;;  %v5094_v34 = vmul.f32 %v5866_v44, %v5071_v1  ;;  %vm5100_vm10 = vweird.f32 %v5866_v44 }
0x1696   :  { %5131 = vst.msk [vmem:[#allocation17] sm:$0xff] %vm3693_vm5, %v5127_v53  ;;  %5867 = vrsqrt.f32 %v5072_v35  ;;  %vm5101_vm12 = vmor %vm5099_vm11, %vm5100_vm10  ;;  %vm5109_vm14 = vweird.f32 %v5072_v35 }
0x1697   :  { %v5092_v54 = vsel %vm5091_vm9, %v5864_v47, %v5088_v18  ;;  %v5095_v63 = vmul.f32 %v5866_v44, %v5094_v34 }
0x1698   :  { %v5114_v22 = vmul.f32 %v5092_v54, %v5046_v20 }
0x1699   :  { %v5096_v49 = vmul.f32 0.5, %v5095_v63 }
0x169a   :  { %v5121_v58 = vmul.f32 %v5769_v37, %v5114_v22 }
0x169b   :  { %v5097_v9 = vsub.f32 1.5, %v5096_v49 }
0x169c   :  { %v5128_v43 = vadd.f32 %v5770_v6, %v5121_v58  ;;  %v5868_v57 = vpop.eup %5867 }
0x169d   :  { %v5098_v2 = vmul.f32 %v5866_v44, %v5097_v9  ;;  %v5104_v7 = vmul.f32 %v5868_v57, %v5072_v35  ;;  %vm5110_vm13 = vweird.f32 %v5868_v57 }
0x169e   :  { %5132 = vst.msk [vmem:[#allocation17 + $0x8] sm:$0xff] %vm3693_vm5, %v5128_v43  ;;  %vm5111_vm15 = vmor %vm5109_vm14, %vm5110_vm13 }
0x169f   :  { %v5102_v41 = vsel %vm5101_vm12, %v5866_v44, %v5098_v2  ;;  %v5105_v16 = vmul.f32 %v5868_v57, %v5104_v7 }
0x16a0   :  { %v5115_v36 = vmul.f32 %v5102_v41, %v8282_v55 }
0x16a1   :  { %v5106_v42 = vmul.f32 0.5, %v5105_v16 }
0x16a2   :  { %v5122_v38 = vmul.f32 %v5769_v37, %v5115_v36 }
0x16a3   :  { %v5107_v50 = vsub.f32 1.5, %v5106_v42 }
0x16a4   :  { %v5129_v59 = vadd.f32 %v5770_v6, %v5122_v38 }
0x16a5   :  { %v5108_v11 = vmul.f32 %v5868_v57, %v5107_v50 }
0x16a6   :  { %5133 = vst.msk [vmem:[#allocation17 + $0x10] sm:$0xff] %vm3693_vm5, %v5129_v59 }
0x16a7   :  { %v5112_v60 = vsel %vm5111_vm15, %v5868_v57, %v5108_v11 }
0x16a8   :  { %v5116_v20 = vmul.f32 %v5112_v60, %v8288_v29 }
0x16aa   :  { %v5123_v12 = vmul.f32 %v5769_v37, %v5116_v20 }
0x16ac   :  { %v5130_v0 = vadd.f32 %v5770_v6, %v5123_v12 }
0x16ae   :  { %5134 = vst.msk [vmem:[#allocation17 + $0x18] sm:$0xff] %vm3693_vm5, %v5130_v0 }
0x16af   :  { %5147 = dma.vmem_to_hbm [thread:$0]  %s5140_s22, 512, %s5142_s9, [#allocation4], %s6174_s25, %s6174_s25, %s6175_s15  }
0x16b0   :  { %6169 = dma.done.wait [#allocation4], 512  }
0x16b1   :  { %6170 = vsyncadd [#allocation4], 4294966784 }
0x16b2   :  { %5152 = vsyncpa [#allocation3], 1 }
0x16b3   :  { %5153 = vsyncpa [#allocation6], 1 }
0x16b4   :  { %5154 = vsyncpa [#allocation9], 1 }
0x16b5   :  { %5155 = vsyncpa [#allocation12], 1 }
0x16b6   :  { %5156 = vsyncpa [#allocation15], 1 }
0x16b7   :  { %5157 = vsyncpa [#allocation4], 1 }

</bundles_post_ra>
